<compile_context>
chip_gen: v5e
topology: v5e:2x2
jax: 0.10.0
libtpu: 0.0.40
codegen_flags: <defaults>
</compile_context>

<pallas_src>
import numpy as np

import jax
import jax.numpy as jnp
from jax import lax
from jax.experimental import pallas as pl
from jax.experimental.pallas import tpu as pltpu

_EPS = 1e-5
_WDT = jnp.bfloat16          # MXU operand dtype (weights + activations at dot inputs)


# -----------------------------------------------------------------------------
# Host-side (one-time) weight preprocessing.
# -----------------------------------------------------------------------------
def _bn_fold(gamma, beta, mean, var, eps=_EPS):
    scale = np.asarray(gamma) / np.sqrt(np.asarray(var) + eps)
    shift = np.asarray(beta) - np.asarray(mean) * scale
    return scale.astype(np.float32), shift.astype(np.float32)


def _banded_conv_weights(w_hwio, scale, w_in, pad):
    """T[i] of shape (w_in*cin, w_out*cout) so that out[r] = sum_i x[r+i] @ T[i].

    Activations are (rows, W*C) with w-major / c-minor lanes.  W-direction zero
    padding is built into T; H-direction padding is handled by the slab layout.
    The (positive) BatchNorm scale is folded into the weights here.
    """
    w = np.asarray(w_hwio, np.float32) * np.asarray(scale, np.float32)[None, None, None, :]
    kh, kw, cin, cout = w.shape
    w_out = w_in + 2 * pad - kw + 1
    t = np.zeros((kh, w_in * cin, w_out * cout), np.float32)
    for i in range(kh):
        for j in range(kw):
            for wo in range(w_out):
                wi = wo + j - pad
                if 0 <= wi < w_in:
                    t[i, wi * cin:(wi + 1) * cin, wo * cout:(wo + 1) * cout] += w[i, j]
    return jnp.asarray(t)


def _lane_pool_selectors(w_in, c):
    """W-direction 2x stride-2 max-pool as two lane-select matmuls (floor mode)."""
    w_out = w_in // 2
    s = np.zeros((2, w_in * c, w_out * c), np.float32)
    for d in range(2):
        for wo in range(w_out):
            for ch in range(c):
                s[d, (2 * wo + d) * c + ch, wo * c + ch] = 1.0
    return jnp.asarray(s)


def _row_pool_selectors(b_tile, r_in, s_in, s_out, off_out, h_out):
    """H-direction 2x stride-2 max-pool + slab re-packing as row-select matmuls.

    P[d, b*s_out + off_out + ho, b*s_in + 2*ho + d] = 1 ; unselected output rows
    stay exactly zero (max(0, 0)), which provides the zero rows the next padded
    conv relies on.
    """
    p = np.zeros((2, b_tile * s_out, r_in), np.float32)
    for d in range(2):
        for b in range(b_tile):
            for ho in range(h_out):
                p[d, b * s_out + off_out + ho, b * s_in + 2 * ho + d] = 1.0
    return jnp.asarray(p)


def _row_mask(n_rows, stride, lo, hi):
    """(n_rows, 1) mask keeping slab offsets in [lo, hi], zeroing the rest."""
    m = np.zeros((n_rows, 1), np.float32)
    for r in range(n_rows):
        if lo <= (r % stride) <= hi:
            m[r, 0] = 1.0
    return jnp.asarray(m)


def _fc_row_selector(b_tile, r_in, s_in):
    """(b_tile, r_in) selector extracting row b*s_in (the per-image logits row)."""
    p = np.zeros((b_tile, r_in), np.float32)
    for b in range(b_tile):
        p[b, b * s_in] = 1.0
    return jnp.asarray(p)


def _conv6_fc_weights(w6_hwio, fc_w):
    """Fold conv6 (1x1, linear) + PyTorch view(-1, 90) + fc1 into G[h] (96, 10).

    logits(b) = fc_b + sum_h a5[b, h, :] @ G[h] with a5 in (3, 3*32) w-major /
    c-minor layout; PyTorch flattens NCHW so fc input index k = c*9 + h*3 + w.
    """
    w6 = np.asarray(w6_hwio, np.float32)[0, 0]              # (32, 10)
    fc = np.asarray(fc_w, np.float32)                       # (90, 10)
    cin, cout = w6.shape
    g = np.zeros((3, 3 * cin, 10), np.float32)
    for h in range(3):
        for w in range(3):
            f_hw = fc[np.arange(cout) * 9 + h * 3 + w, :]   # (10, 10)
            g[h, w * cin:(w + 1) * cin, :] = w6 @ f_hw
    return jnp.asarray(g)


def build_kernel_params(p, b_tile=8):
    """Turn PyTorch-style parameters into the resident VMEM kernel operands."""
    assert b_tile % 8 == 0, "b_tile must be a multiple of 8 (sublane tiling)"
    scales, shifts = {}, {}
    for i in range(1, 6):
        # relu(x*s) == relu(x)*s requires s > 0 (true for eval-mode default BN).
        scales[i], shifts[i] = _bn_fold(p[f"bn{i}_gamma"], p[f"bn{i}_beta"],
                                        p[f"bn{i}_mean"], p[f"bn{i}_var"])
    kp = {}
    kp["t1"] = _banded_conv_weights(p["w1"], scales[1], w_in=28, pad=1).astype(_WDT)  # (3, 28, 112)
    kp["t2"] = _banded_conv_weights(p["w2"], scales[2], w_in=28, pad=0).astype(_WDT)  # (3, 112, 208)
    kp["t3"] = _banded_conv_weights(p["w3"], scales[3], w_in=13, pad=0).astype(_WDT)  # (3, 104, 88)
    kp["t4"] = _banded_conv_weights(p["w4"], scales[4], w_in=11, pad=1).astype(_WDT)  # (3, 88, 176)
    kp["t5"] = _banded_conv_weights(p["w5"], scales[5], w_in=5, pad=0).astype(_WDT)   # (3, 80, 96)
    kp["b1"] = jnp.asarray(np.tile(shifts[1], 28))[None, :]                           # (1, 112) f32
    kp["b2"] = jnp.asarray(np.tile(shifts[2], 26))[None, :]                           # (1, 208)
    kp["b3"] = jnp.asarray(np.tile(shifts[3], 11))[None, :]                           # (1, 88)
    kp["b4"] = jnp.asarray(np.tile(shifts[4], 11))[None, :]                           # (1, 176)
    kp["b5"] = jnp.asarray(np.tile(shifts[5], 3))[None, :]                            # (1, 96)
    kp["s1"] = _lane_pool_selectors(26, 8).astype(_WDT)                               # (2, 208, 104)
    kp["s2"] = _lane_pool_selectors(11, 16).astype(_WDT)                              # (2, 176, 80)
    # Slab strides: stage1 = 30 rows/img, stage2 = 16, stage3 = 5.
    kp["p1"] = _row_pool_selectors(b_tile, b_tile * 30 - 4, 30, 16, 1, 13).astype(_WDT)  # (2, B*16, B*30-4)
    kp["p2"] = _row_pool_selectors(b_tile, b_tile * 16 - 4, 16, 5, 0, 5).astype(_WDT)    # (2, B*5,  B*16-4)
    kp["m3"] = _row_mask(b_tile * 16 - 2, 16, 1, 11)                                  # (B*16-2, 1) f32
    kp["g"] = _conv6_fc_weights(p["w6"], p["fc_w"]).astype(_WDT)                      # (3, 96, 10)
    kp["pfc"] = _fc_row_selector(b_tile, b_tile * 5 - 4, 5)                           # (B, B*5-4) f32
    kp["fcb"] = jnp.asarray(p["fc_b"], jnp.float32)[None, :]                          # (1, 10)
    return kp


# -----------------------------------------------------------------------------
# The fused Pallas kernel: one grid step = B_TILE images through the whole net.
# -----------------------------------------------------------------------------
def _model1_kernel(x_ref,
                   t1_ref, b1_ref, t2_ref, b2_ref, s1_ref, p1_ref,
                   t3_ref, b3_ref, m3_ref, t4_ref, b4_ref, s2_ref, p2_ref,
                   t5_ref, b5_ref, g_ref, pfc_ref, fcb_ref,
                   o_ref):
    f32 = jnp.float32

    def mxu(x, w):
        # bf16 x bf16 -> f32 accumulation on the MXU.
        return jnp.dot(x.astype(_WDT), w, preferred_element_type=f32)

    def conv_block(x, t_ref, b_ref, mask_ref=None):
        # Banded conv: out[r] = sum_i x[r+i] @ T[i]   (Conv -> ReLU -> BN shift).
        n = x.shape[0] - 2
        acc = mxu(x[0:n, :], t_ref[0])
        for i in range(1, 3):
            acc = acc + mxu(x[i:i + n, :], t_ref[i])
        out = jnp.maximum(acc, 0.0) + b_ref[...]
        if mask_ref is not None:
            out = out * mask_ref[...]      # zero rows outside each image's valid region
        return out

    def max_pool(x, s_ref, p_ref):
        # W-direction 2->1 max via lane-select matmuls, then H-direction 2->1 max
        # plus slab re-packing via row-select matmuls.
        cm = jnp.maximum(mxu(x, s_ref[0]), mxu(x, s_ref[1]))
        cmb = cm.astype(_WDT)
        return jnp.maximum(
            jnp.dot(p_ref[0], cmb, preferred_element_type=f32),
            jnp.dot(p_ref[1], cmb, preferred_element_type=f32))

    a = x_ref[...]                              # (B*30, 28); rows 0 & 29 of each slab = 0
    a = conv_block(a, t1_ref, b1_ref)           # (B*30-2, 28*4)   convblock1 (pad=1)
    a = conv_block(a, t2_ref, b2_ref)           # (B*30-4, 26*8)   convblock2
    a = max_pool(a, s1_ref, p1_ref)             # (B*16,   13*8)   pool1 (stride 16, offset 1)
    a = conv_block(a, t3_ref, b3_ref, m3_ref)   # (B*16-2, 11*8)   convblock3 (+ pad rows for conv4)
    a = conv_block(a, t4_ref, b4_ref)           # (B*16-4, 11*16)  convblock4 (pad=1)
    a = max_pool(a, s2_ref, p2_ref)             # (B*5,    5*16)   pool2 (stride 5)
    a = conv_block(a, t5_ref, b5_ref)           # (B*5-2,  3*32)   convblock5

    # convblock6 (1x1, linear) + view(-1, 90) + fc1, folded into g_ref.  Image b's
    # logits land at row 5*b of z; extract them with one small selector matmul.
    nz = a.shape[0] - 2
    z = mxu(a[0:nz, :], g_ref[0])
    for h in range(1, 3):
        z = z + mxu(a[h:h + nz, :], g_ref[h])
    logits = jnp.dot(pfc_ref[...], z, preferred_element_type=f32) + fcb_ref[...]

    # log_softmax over exactly 10 valid lanes (f32 throughout).
    m = jnp.max(logits, axis=-1, keepdims=True)
    e = jnp.exp(logits - m)
    o_ref[...] = (logits - m) - jnp.log(jnp.sum(e, axis=-1, keepdims=True))


_WEIGHT_ORDER = ("t1", "b1", "t2", "b2", "s1", "p1",
                 "t3", "b3", "m3", "t4", "b4", "s2", "p2",
                 "t5", "b5", "g", "pfc", "fcb")


def _const_index_map(ndim):
    return lambda i: (0,) * ndim


def model1_forward(kp, x_nchw):
    """Forward pass.  x_nchw: (N, 1, 28, 28) float32 -> (N, 10) log-probs."""
    n = x_nchw.shape[0]
    b_tile = kp["p1"].shape[1] // 16            # selectors were built for this tile
    n_pad = -(-n // b_tile) * b_tile
    grid = (n_pad // b_tile,)

    # Host-side prep (tiny): drop channel dim, zero-pad H 28->30 (the two zero
    # rows are conv1's H padding), flatten to the 2-D (N*30, 28) slab layout.
    x = x_nchw[:, 0, :, :]
    if n_pad != n:
        x = jnp.pad(x, ((0, n_pad - n), (0, 0), (0, 0)))
    x = jnp.pad(x, ((0, 0), (1, 1), (0, 0)))                  # (N_pad, 30, 28)
    x2 = x.reshape(n_pad * 30, 28)

    weights = [kp[name] for name in _WEIGHT_ORDER]
    in_specs = [pl.BlockSpec((b_tile * 30, 28), lambda i: (i, 0))]
    # Constant index maps -> weights fetched once, VMEM-resident across the grid.
    in_specs += [pl.BlockSpec(w.shape, _const_index_map(w.ndim)) for w in weights]

    out = pl.pallas_call(
        _model1_kernel,
        out_shape=jax.ShapeDtypeStruct((n_pad, 10), jnp.float32),
        grid=grid,
        in_specs=in_specs,
        out_specs=pl.BlockSpec((b_tile, 10), lambda i: (i, 0)),
        compiler_params=pltpu.CompilerParams(
            dimension_semantics=("parallel",)),   # megacore / v7x two-TC split
    )(x2, *weights)
    return out[:n]


# -----------------------------------------------------------------------------
# Parameters + pure-JAX reference (for verification against the PyTorch spec).
# -----------------------------------------------------------------------------
def init_params(key):
    """PyTorch-default-style initialization (eval-mode BN buffers)."""
    ks = jax.random.split(key, 8)

    def conv_w(k, kh, kw, cin, cout):
        bound = 1.0 / np.sqrt(cin * kh * kw)
        return jax.random.uniform(k, (kh, kw, cin, cout), jnp.float32, -bound, bound)

    fcb = 1.0 / np.sqrt(90.0)
    p = {
        "w1": conv_w(ks[0], 3, 3, 1, 4),
        "w2": conv_w(ks[1], 3, 3, 4, 8),
        "w3": conv_w(ks[2], 3, 3, 8, 8),
        "w4": conv_w(ks[3], 3, 3, 8, 16),
        "w5": conv_w(ks[4], 3, 3, 16, 32),
        "w6": conv_w(ks[5], 1, 1, 32, 10),
        "fc_w": jax.random.uniform(ks[6], (90, 10), jnp.float32, -fcb, fcb),
        "fc_b": jax.random.uniform(ks[7], (10,), jnp.float32, -fcb, fcb),
    }
    for i, c in zip(range(1, 6), (4, 8, 8, 16, 32)):
        p[f"bn{i}_gamma"] = jnp.ones((c,), jnp.float32)
        p[f"bn{i}_beta"] = jnp.zeros((c,), jnp.float32)
        p[f"bn{i}_mean"] = jnp.zeros((c,), jnp.float32)
        p[f"bn{i}_var"] = jnp.ones((c,), jnp.float32)
    return p


def reference_forward(params, x):
    """Pure-JAX/XLA reference mirroring PyTorch Model1.forward (eval mode, f32)."""
    hi = lax.Precision.HIGHEST

    def conv(x, w, pad):
        return lax.conv_general_dilated(
            x, w, (1, 1), [(pad, pad), (pad, pad)],
            dimension_numbers=("NCHW", "HWIO", "NCHW"), precision=hi)

    def bn(x, i):
        scale = params[f"bn{i}_gamma"] / jnp.sqrt(params[f"bn{i}_var"] + _EPS)
        shift = params[f"bn{i}_beta"] - params[f"bn{i}_mean"] * scale
        return x * scale[None, :, None, None] + shift[None, :, None, None]

    def block(x, w, i, pad):        # Conv -> ReLU -> BN (-> Dropout: identity)
        return bn(jax.nn.relu(conv(x, w, pad)), i)

    def pool(x):
        return lax.reduce_window(x, -jnp.inf, lax.max,
                                 (1, 1, 2, 2), (1, 1, 2, 2), "VALID")

    x = block(x, params["w1"], 1, 1)
    x = block(x, params["w2"], 2, 0)
    x = pool(x)
    x = block(x, params["w3"], 3, 0)
    x = block(x, params["w4"], 4, 1)
    x = pool(x)
    x = block(x, params["w5"], 5, 0)
    x = conv(x, params["w6"], 0)                 # (N, 10, 3, 3)
    x = x.reshape(-1, 90)                        # PyTorch view(-1, 90)
    logits = jnp.dot(x, params["fc_w"], precision=hi) + params["fc_b"]
    return jax.nn.log_softmax(logits, axis=-1)


if __name__ == "__main__":
    key = jax.random.PRNGKey(0)
    pkey, xkey = jax.random.split(key)
    params = init_params(pkey)
    kparams = build_kernel_params(params, b_tile=8)

    # Model1's view(-1, 90) implies 28x28 single-channel input.  N=16 -> 2 grid
    # steps of 8 images (even grid length so v7x's two TensorCores stay balanced).
    x = jax.random.normal(xkey, (16, 1, 28, 28), dtype=jnp.float32)

    out = jax.jit(model1_forward)(kparams, x)
    out = jax.block_until_ready(out)

    assert out.shape == (16, 10)
    # Valid log-probabilities: every row exponentiates to ~1 (softmax is f32).
    assert bool(jnp.all(jnp.abs(jnp.sum(jnp.exp(out), axis=-1) - 1.0) < 1e-4))
    # Matches the pure-JAX f32 reference; the tolerance only absorbs the bf16
    # rounding of the MXU operands (selector/mask matrices are exact in bf16).
    ref = jax.jit(reference_forward)(params, x)
    max_err = float(jnp.max(jnp.abs(out - ref)))
    assert max_err < 5e-2, f"kernel/reference mismatch: max |diff| = {max_err}"
    print("KERNEL_OK")
</pallas_src>

<mosaic_0001>
module attributes {stable_mosaic.version = 11 : i64} {
  func.func @_model1_kernel(%arg0: i32, %arg1: memref<240x28xf32, #tpu.memory_space<vmem>>, %arg2: memref<3x28x112xbf16, #tpu.memory_space<vmem>>, %arg3: memref<1x112xf32, #tpu.memory_space<vmem>>, %arg4: memref<3x112x208xbf16, #tpu.memory_space<vmem>>, %arg5: memref<1x208xf32, #tpu.memory_space<vmem>>, %arg6: memref<2x208x104xbf16, #tpu.memory_space<vmem>>, %arg7: memref<2x128x236xbf16, #tpu.memory_space<vmem>>, %arg8: memref<3x104x88xbf16, #tpu.memory_space<vmem>>, %arg9: memref<1x88xf32, #tpu.memory_space<vmem>>, %arg10: memref<126x1xf32, #tpu.memory_space<vmem>>, %arg11: memref<3x88x176xbf16, #tpu.memory_space<vmem>>, %arg12: memref<1x176xf32, #tpu.memory_space<vmem>>, %arg13: memref<2x176x80xbf16, #tpu.memory_space<vmem>>, %arg14: memref<2x40x124xbf16, #tpu.memory_space<vmem>>, %arg15: memref<3x80x96xbf16, #tpu.memory_space<vmem>>, %arg16: memref<1x96xf32, #tpu.memory_space<vmem>>, %arg17: memref<3x96x10xbf16, #tpu.memory_space<vmem>>, %arg18: memref<8x36xf32, #tpu.memory_space<vmem>>, %arg19: memref<1x10xf32, #tpu.memory_space<vmem>>, %arg20: memref<8x10xf32, #tpu.memory_space<vmem>>) attributes {dimension_semantics = [#tpu.dimension_semantics<parallel>], iteration_bounds = array<i64: 2>, scalar_prefetch = 0 : i64, scratch_operands = 0 : i64, tpu.core_type = #tpu.core_type<tc>, window_params = [{transform_indices = @transform_0, window_bounds = array<i64: 240, 28>}, {pipeline_mode = #tpu.pipeline_mode<synchronous>, transform_indices = @transform_1, window_bounds = array<i64: 3, 28, 112>}, {pipeline_mode = #tpu.pipeline_mode<synchronous>, transform_indices = @transform_2, window_bounds = array<i64: 1, 112>}, {pipeline_mode = #tpu.pipeline_mode<synchronous>, transform_indices = @transform_3, window_bounds = array<i64: 3, 112, 208>}, {pipeline_mode = #tpu.pipeline_mode<synchronous>, transform_indices = @transform_4, window_bounds = array<i64: 1, 208>}, {pipeline_mode = #tpu.pipeline_mode<synchronous>, transform_indices = @transform_5, window_bounds = array<i64: 2, 208, 104>}, {pipeline_mode = #tpu.pipeline_mode<synchronous>, transform_indices = @transform_6, window_bounds = array<i64: 2, 128, 236>}, {pipeline_mode = #tpu.pipeline_mode<synchronous>, transform_indices = @transform_7, window_bounds = array<i64: 3, 104, 88>}, {pipeline_mode = #tpu.pipeline_mode<synchronous>, transform_indices = @transform_8, window_bounds = array<i64: 1, 88>}, {pipeline_mode = #tpu.pipeline_mode<synchronous>, transform_indices = @transform_9, window_bounds = array<i64: 126, 1>}, {pipeline_mode = #tpu.pipeline_mode<synchronous>, transform_indices = @transform_10, window_bounds = array<i64: 3, 88, 176>}, {pipeline_mode = #tpu.pipeline_mode<synchronous>, transform_indices = @transform_11, window_bounds = array<i64: 1, 176>}, {pipeline_mode = #tpu.pipeline_mode<synchronous>, transform_indices = @transform_12, window_bounds = array<i64: 2, 176, 80>}, {pipeline_mode = #tpu.pipeline_mode<synchronous>, transform_indices = @transform_13, window_bounds = array<i64: 2, 40, 124>}, {pipeline_mode = #tpu.pipeline_mode<synchronous>, transform_indices = @transform_14, window_bounds = array<i64: 3, 80, 96>}, {pipeline_mode = #tpu.pipeline_mode<synchronous>, transform_indices = @transform_15, window_bounds = array<i64: 1, 96>}, {pipeline_mode = #tpu.pipeline_mode<synchronous>, transform_indices = @transform_16, window_bounds = array<i64: 3, 96, 10>}, {pipeline_mode = #tpu.pipeline_mode<synchronous>, transform_indices = @transform_17, window_bounds = array<i64: 8, 36>}, {pipeline_mode = #tpu.pipeline_mode<synchronous>, transform_indices = @transform_18, window_bounds = array<i64: 1, 10>}, {transform_indices = @transform_19, window_bounds = array<i64: 8, 10>}]} {
    %c0 = arith.constant 0 : index
    %c0_0 = arith.constant 0 : index
    %0 = vector.load %arg1[%c0, %c0_0] : memref<240x28xf32, #tpu.memory_space<vmem>>, vector<240x28xf32>
    %1 = vector.extract_strided_slice %0 {offsets = [0, 0], sizes = [238, 28], strides = [1, 1]} : vector<240x28xf32> to vector<238x28xf32>
    %c0_1 = arith.constant 0 : index
    %c0_2 = arith.constant 0 : index
    %c0_3 = arith.constant 0 : index
    %2 = vector.load %arg2[%c0_1, %c0_2, %c0_3] : memref<3x28x112xbf16, #tpu.memory_space<vmem>>, vector<1x28x112xbf16>
    %3 = vector.shape_cast %2 : vector<1x28x112xbf16> to vector<28x112xbf16>
    %4 = arith.truncf %1 : vector<238x28xf32> to vector<238x28xbf16>
    %cst = arith.constant dense<0.000000e+00> : vector<238x112xf32>
    %5 = tpu.matmul %4, %3, %cst {dimension_numbers = #tpu.dot_dimension_numbers<[1], [0], [0], [1], [0, 0, 1, 1], [], []>} : vector<238x28xbf16>, vector<28x112xbf16>, vector<238x112xf32> -> vector<238x112xf32>
    %6 = vector.extract_strided_slice %0 {offsets = [1, 0], sizes = [238, 28], strides = [1, 1]} : vector<240x28xf32> to vector<238x28xf32>
    %c1 = arith.constant 1 : index
    %c0_4 = arith.constant 0 : index
    %c0_5 = arith.constant 0 : index
    %7 = vector.load %arg2[%c1, %c0_4, %c0_5] : memref<3x28x112xbf16, #tpu.memory_space<vmem>>, vector<1x28x112xbf16>
    %8 = vector.shape_cast %7 : vector<1x28x112xbf16> to vector<28x112xbf16>
    %9 = arith.truncf %6 : vector<238x28xf32> to vector<238x28xbf16>
    %cst_6 = arith.constant dense<0.000000e+00> : vector<238x112xf32>
    %10 = tpu.matmul %9, %8, %cst_6 {dimension_numbers = #tpu.dot_dimension_numbers<[1], [0], [0], [1], [0, 0, 1, 1], [], []>} : vector<238x28xbf16>, vector<28x112xbf16>, vector<238x112xf32> -> vector<238x112xf32>
    %11 = arith.addf %5, %10 : vector<238x112xf32>
    %12 = vector.extract_strided_slice %0 {offsets = [2, 0], sizes = [238, 28], strides = [1, 1]} : vector<240x28xf32> to vector<238x28xf32>
    %c2 = arith.constant 2 : index
    %c0_7 = arith.constant 0 : index
    %c0_8 = arith.constant 0 : index
    %13 = vector.load %arg2[%c2, %c0_7, %c0_8] : memref<3x28x112xbf16, #tpu.memory_space<vmem>>, vector<1x28x112xbf16>
    %14 = vector.shape_cast %13 : vector<1x28x112xbf16> to vector<28x112xbf16>
    %15 = arith.truncf %12 : vector<238x28xf32> to vector<238x28xbf16>
    %cst_9 = arith.constant dense<0.000000e+00> : vector<238x112xf32>
    %16 = tpu.matmul %15, %14, %cst_9 {dimension_numbers = #tpu.dot_dimension_numbers<[1], [0], [0], [1], [0, 0, 1, 1], [], []>} : vector<238x28xbf16>, vector<28x112xbf16>, vector<238x112xf32> -> vector<238x112xf32>
    %17 = arith.addf %11, %16 : vector<238x112xf32>
    %cst_10 = arith.constant 0.000000e+00 : f32
    %18 = vector.broadcast %cst_10 : f32 to vector<238x112xf32>
    %19 = arith.maximumf %17, %18 : vector<238x112xf32>
    %c0_11 = arith.constant 0 : index
    %c0_12 = arith.constant 0 : index
    %20 = vector.load %arg3[%c0_11, %c0_12] : memref<1x112xf32, #tpu.memory_space<vmem>>, vector<1x112xf32>
    %21 = vector.broadcast %20 : vector<1x112xf32> to vector<238x112xf32>
    %22 = arith.addf %19, %21 : vector<238x112xf32>
    %23 = vector.extract_strided_slice %22 {offsets = [0, 0], sizes = [236, 112], strides = [1, 1]} : vector<238x112xf32> to vector<236x112xf32>
    %c0_13 = arith.constant 0 : index
    %c0_14 = arith.constant 0 : index
    %c0_15 = arith.constant 0 : index
    %24 = vector.load %arg4[%c0_13, %c0_14, %c0_15] : memref<3x112x208xbf16, #tpu.memory_space<vmem>>, vector<1x112x208xbf16>
    %25 = vector.shape_cast %24 : vector<1x112x208xbf16> to vector<112x208xbf16>
    %26 = arith.truncf %23 : vector<236x112xf32> to vector<236x112xbf16>
    %cst_16 = arith.constant dense<0.000000e+00> : vector<236x208xf32>
    %27 = tpu.matmul %26, %25, %cst_16 {dimension_numbers = #tpu.dot_dimension_numbers<[1], [0], [0], [1], [0, 0, 1, 1], [], []>} : vector<236x112xbf16>, vector<112x208xbf16>, vector<236x208xf32> -> vector<236x208xf32>
    %28 = vector.extract_strided_slice %22 {offsets = [1, 0], sizes = [236, 112], strides = [1, 1]} : vector<238x112xf32> to vector<236x112xf32>
    %c1_17 = arith.constant 1 : index
    %c0_18 = arith.constant 0 : index
    %c0_19 = arith.constant 0 : index
    %29 = vector.load %arg4[%c1_17, %c0_18, %c0_19] : memref<3x112x208xbf16, #tpu.memory_space<vmem>>, vector<1x112x208xbf16>
    %30 = vector.shape_cast %29 : vector<1x112x208xbf16> to vector<112x208xbf16>
    %31 = arith.truncf %28 : vector<236x112xf32> to vector<236x112xbf16>
    %cst_20 = arith.constant dense<0.000000e+00> : vector<236x208xf32>
    %32 = tpu.matmul %31, %30, %cst_20 {dimension_numbers = #tpu.dot_dimension_numbers<[1], [0], [0], [1], [0, 0, 1, 1], [], []>} : vector<236x112xbf16>, vector<112x208xbf16>, vector<236x208xf32> -> vector<236x208xf32>
    %33 = arith.addf %27, %32 : vector<236x208xf32>
    %34 = vector.extract_strided_slice %22 {offsets = [2, 0], sizes = [236, 112], strides = [1, 1]} : vector<238x112xf32> to vector<236x112xf32>
    %c2_21 = arith.constant 2 : index
    %c0_22 = arith.constant 0 : index
    %c0_23 = arith.constant 0 : index
    %35 = vector.load %arg4[%c2_21, %c0_22, %c0_23] : memref<3x112x208xbf16, #tpu.memory_space<vmem>>, vector<1x112x208xbf16>
    %36 = vector.shape_cast %35 : vector<1x112x208xbf16> to vector<112x208xbf16>
    %37 = arith.truncf %34 : vector<236x112xf32> to vector<236x112xbf16>
    %cst_24 = arith.constant dense<0.000000e+00> : vector<236x208xf32>
    %38 = tpu.matmul %37, %36, %cst_24 {dimension_numbers = #tpu.dot_dimension_numbers<[1], [0], [0], [1], [0, 0, 1, 1], [], []>} : vector<236x112xbf16>, vector<112x208xbf16>, vector<236x208xf32> -> vector<236x208xf32>
    %39 = arith.addf %33, %38 : vector<236x208xf32>
    %cst_25 = arith.constant 0.000000e+00 : f32
    %40 = vector.broadcast %cst_25 : f32 to vector<236x208xf32>
    %41 = arith.maximumf %39, %40 : vector<236x208xf32>
    %c0_26 = arith.constant 0 : index
    %c0_27 = arith.constant 0 : index
    %42 = vector.load %arg5[%c0_26, %c0_27] : memref<1x208xf32, #tpu.memory_space<vmem>>, vector<1x208xf32>
    %43 = vector.broadcast %42 : vector<1x208xf32> to vector<236x208xf32>
    %44 = arith.addf %41, %43 : vector<236x208xf32>
    %c0_28 = arith.constant 0 : index
    %c0_29 = arith.constant 0 : index
    %c0_30 = arith.constant 0 : index
    %45 = vector.load %arg6[%c0_28, %c0_29, %c0_30] : memref<2x208x104xbf16, #tpu.memory_space<vmem>>, vector<1x208x104xbf16>
    %46 = vector.shape_cast %45 : vector<1x208x104xbf16> to vector<208x104xbf16>
    %47 = arith.truncf %44 : vector<236x208xf32> to vector<236x208xbf16>
    %cst_31 = arith.constant dense<0.000000e+00> : vector<236x104xf32>
    %48 = tpu.matmul %47, %46, %cst_31 {dimension_numbers = #tpu.dot_dimension_numbers<[1], [0], [0], [1], [0, 0, 1, 1], [], []>} : vector<236x208xbf16>, vector<208x104xbf16>, vector<236x104xf32> -> vector<236x104xf32>
    %c1_32 = arith.constant 1 : index
    %c0_33 = arith.constant 0 : index
    %c0_34 = arith.constant 0 : index
    %49 = vector.load %arg6[%c1_32, %c0_33, %c0_34] : memref<2x208x104xbf16, #tpu.memory_space<vmem>>, vector<1x208x104xbf16>
    %50 = vector.shape_cast %49 : vector<1x208x104xbf16> to vector<208x104xbf16>
    %51 = arith.truncf %44 : vector<236x208xf32> to vector<236x208xbf16>
    %cst_35 = arith.constant dense<0.000000e+00> : vector<236x104xf32>
    %52 = tpu.matmul %51, %50, %cst_35 {dimension_numbers = #tpu.dot_dimension_numbers<[1], [0], [0], [1], [0, 0, 1, 1], [], []>} : vector<236x208xbf16>, vector<208x104xbf16>, vector<236x104xf32> -> vector<236x104xf32>
    %53 = arith.maximumf %48, %52 : vector<236x104xf32>
    %54 = arith.truncf %53 : vector<236x104xf32> to vector<236x104xbf16>
    %c0_36 = arith.constant 0 : index
    %c0_37 = arith.constant 0 : index
    %c0_38 = arith.constant 0 : index
    %55 = vector.load %arg7[%c0_36, %c0_37, %c0_38] : memref<2x128x236xbf16, #tpu.memory_space<vmem>>, vector<1x128x236xbf16>
    %56 = vector.shape_cast %55 : vector<1x128x236xbf16> to vector<128x236xbf16>
    %cst_39 = arith.constant dense<0.000000e+00> : vector<128x104xf32>
    %57 = tpu.matmul %56, %54, %cst_39 {dimension_numbers = #tpu.dot_dimension_numbers<[1], [0], [0], [1], [0, 0, 1, 1], [], []>} : vector<128x236xbf16>, vector<236x104xbf16>, vector<128x104xf32> -> vector<128x104xf32>
    %c1_40 = arith.constant 1 : index
    %c0_41 = arith.constant 0 : index
    %c0_42 = arith.constant 0 : index
    %58 = vector.load %arg7[%c1_40, %c0_41, %c0_42] : memref<2x128x236xbf16, #tpu.memory_space<vmem>>, vector<1x128x236xbf16>
    %59 = vector.shape_cast %58 : vector<1x128x236xbf16> to vector<128x236xbf16>
    %cst_43 = arith.constant dense<0.000000e+00> : vector<128x104xf32>
    %60 = tpu.matmul %59, %54, %cst_43 {dimension_numbers = #tpu.dot_dimension_numbers<[1], [0], [0], [1], [0, 0, 1, 1], [], []>} : vector<128x236xbf16>, vector<236x104xbf16>, vector<128x104xf32> -> vector<128x104xf32>
    %61 = arith.maximumf %57, %60 : vector<128x104xf32>
    %62 = vector.extract_strided_slice %61 {offsets = [0, 0], sizes = [126, 104], strides = [1, 1]} : vector<128x104xf32> to vector<126x104xf32>
    %c0_44 = arith.constant 0 : index
    %c0_45 = arith.constant 0 : index
    %c0_46 = arith.constant 0 : index
    %63 = vector.load %arg8[%c0_44, %c0_45, %c0_46] : memref<3x104x88xbf16, #tpu.memory_space<vmem>>, vector<1x104x88xbf16>
    %64 = vector.shape_cast %63 : vector<1x104x88xbf16> to vector<104x88xbf16>
    %65 = arith.truncf %62 : vector<126x104xf32> to vector<126x104xbf16>
    %cst_47 = arith.constant dense<0.000000e+00> : vector<126x88xf32>
    %66 = tpu.matmul %65, %64, %cst_47 {dimension_numbers = #tpu.dot_dimension_numbers<[1], [0], [0], [1], [0, 0, 1, 1], [], []>} : vector<126x104xbf16>, vector<104x88xbf16>, vector<126x88xf32> -> vector<126x88xf32>
    %67 = vector.extract_strided_slice %61 {offsets = [1, 0], sizes = [126, 104], strides = [1, 1]} : vector<128x104xf32> to vector<126x104xf32>
    %c1_48 = arith.constant 1 : index
    %c0_49 = arith.constant 0 : index
    %c0_50 = arith.constant 0 : index
    %68 = vector.load %arg8[%c1_48, %c0_49, %c0_50] : memref<3x104x88xbf16, #tpu.memory_space<vmem>>, vector<1x104x88xbf16>
    %69 = vector.shape_cast %68 : vector<1x104x88xbf16> to vector<104x88xbf16>
    %70 = arith.truncf %67 : vector<126x104xf32> to vector<126x104xbf16>
    %cst_51 = arith.constant dense<0.000000e+00> : vector<126x88xf32>
    %71 = tpu.matmul %70, %69, %cst_51 {dimension_numbers = #tpu.dot_dimension_numbers<[1], [0], [0], [1], [0, 0, 1, 1], [], []>} : vector<126x104xbf16>, vector<104x88xbf16>, vector<126x88xf32> -> vector<126x88xf32>
    %72 = arith.addf %66, %71 : vector<126x88xf32>
    %73 = vector.extract_strided_slice %61 {offsets = [2, 0], sizes = [126, 104], strides = [1, 1]} : vector<128x104xf32> to vector<126x104xf32>
    %c2_52 = arith.constant 2 : index
    %c0_53 = arith.constant 0 : index
    %c0_54 = arith.constant 0 : index
    %74 = vector.load %arg8[%c2_52, %c0_53, %c0_54] : memref<3x104x88xbf16, #tpu.memory_space<vmem>>, vector<1x104x88xbf16>
    %75 = vector.shape_cast %74 : vector<1x104x88xbf16> to vector<104x88xbf16>
    %76 = arith.truncf %73 : vector<126x104xf32> to vector<126x104xbf16>
    %cst_55 = arith.constant dense<0.000000e+00> : vector<126x88xf32>
    %77 = tpu.matmul %76, %75, %cst_55 {dimension_numbers = #tpu.dot_dimension_numbers<[1], [0], [0], [1], [0, 0, 1, 1], [], []>} : vector<126x104xbf16>, vector<104x88xbf16>, vector<126x88xf32> -> vector<126x88xf32>
    %78 = arith.addf %72, %77 : vector<126x88xf32>
    %cst_56 = arith.constant 0.000000e+00 : f32
    %79 = vector.broadcast %cst_56 : f32 to vector<126x88xf32>
    %80 = arith.maximumf %78, %79 : vector<126x88xf32>
    %c0_57 = arith.constant 0 : index
    %c0_58 = arith.constant 0 : index
    %81 = vector.load %arg9[%c0_57, %c0_58] : memref<1x88xf32, #tpu.memory_space<vmem>>, vector<1x88xf32>
    %82 = vector.broadcast %81 : vector<1x88xf32> to vector<126x88xf32>
    %83 = arith.addf %80, %82 : vector<126x88xf32>
    %c0_59 = arith.constant 0 : index
    %c0_60 = arith.constant 0 : index
    %84 = vector.load %arg10[%c0_59, %c0_60] : memref<126x1xf32, #tpu.memory_space<vmem>>, vector<126x1xf32>
    %85 = vector.broadcast %84 : vector<126x1xf32> to vector<126x88xf32>
    %86 = arith.mulf %83, %85 : vector<126x88xf32>
    %87 = vector.extract_strided_slice %86 {offsets = [0, 0], sizes = [124, 88], strides = [1, 1]} : vector<126x88xf32> to vector<124x88xf32>
    %c0_61 = arith.constant 0 : index
    %c0_62 = arith.constant 0 : index
    %c0_63 = arith.constant 0 : index
    %88 = vector.load %arg11[%c0_61, %c0_62, %c0_63] : memref<3x88x176xbf16, #tpu.memory_space<vmem>>, vector<1x88x176xbf16>
    %89 = vector.shape_cast %88 : vector<1x88x176xbf16> to vector<88x176xbf16>
    %90 = arith.truncf %87 : vector<124x88xf32> to vector<124x88xbf16>
    %cst_64 = arith.constant dense<0.000000e+00> : vector<124x176xf32>
    %91 = tpu.matmul %90, %89, %cst_64 {dimension_numbers = #tpu.dot_dimension_numbers<[1], [0], [0], [1], [0, 0, 1, 1], [], []>} : vector<124x88xbf16>, vector<88x176xbf16>, vector<124x176xf32> -> vector<124x176xf32>
    %92 = vector.extract_strided_slice %86 {offsets = [1, 0], sizes = [124, 88], strides = [1, 1]} : vector<126x88xf32> to vector<124x88xf32>
    %c1_65 = arith.constant 1 : index
    %c0_66 = arith.constant 0 : index
    %c0_67 = arith.constant 0 : index
    %93 = vector.load %arg11[%c1_65, %c0_66, %c0_67] : memref<3x88x176xbf16, #tpu.memory_space<vmem>>, vector<1x88x176xbf16>
    %94 = vector.shape_cast %93 : vector<1x88x176xbf16> to vector<88x176xbf16>
    %95 = arith.truncf %92 : vector<124x88xf32> to vector<124x88xbf16>
    %cst_68 = arith.constant dense<0.000000e+00> : vector<124x176xf32>
    %96 = tpu.matmul %95, %94, %cst_68 {dimension_numbers = #tpu.dot_dimension_numbers<[1], [0], [0], [1], [0, 0, 1, 1], [], []>} : vector<124x88xbf16>, vector<88x176xbf16>, vector<124x176xf32> -> vector<124x176xf32>
    %97 = arith.addf %91, %96 : vector<124x176xf32>
    %98 = vector.extract_strided_slice %86 {offsets = [2, 0], sizes = [124, 88], strides = [1, 1]} : vector<126x88xf32> to vector<124x88xf32>
    %c2_69 = arith.constant 2 : index
    %c0_70 = arith.constant 0 : index
    %c0_71 = arith.constant 0 : index
    %99 = vector.load %arg11[%c2_69, %c0_70, %c0_71] : memref<3x88x176xbf16, #tpu.memory_space<vmem>>, vector<1x88x176xbf16>
    %100 = vector.shape_cast %99 : vector<1x88x176xbf16> to vector<88x176xbf16>
    %101 = arith.truncf %98 : vector<124x88xf32> to vector<124x88xbf16>
    %cst_72 = arith.constant dense<0.000000e+00> : vector<124x176xf32>
    %102 = tpu.matmul %101, %100, %cst_72 {dimension_numbers = #tpu.dot_dimension_numbers<[1], [0], [0], [1], [0, 0, 1, 1], [], []>} : vector<124x88xbf16>, vector<88x176xbf16>, vector<124x176xf32> -> vector<124x176xf32>
    %103 = arith.addf %97, %102 : vector<124x176xf32>
    %cst_73 = arith.constant 0.000000e+00 : f32
    %104 = vector.broadcast %cst_73 : f32 to vector<124x176xf32>
    %105 = arith.maximumf %103, %104 : vector<124x176xf32>
    %c0_74 = arith.constant 0 : index
    %c0_75 = arith.constant 0 : index
    %106 = vector.load %arg12[%c0_74, %c0_75] : memref<1x176xf32, #tpu.memory_space<vmem>>, vector<1x176xf32>
    %107 = vector.broadcast %106 : vector<1x176xf32> to vector<124x176xf32>
    %108 = arith.addf %105, %107 : vector<124x176xf32>
    %c0_76 = arith.constant 0 : index
    %c0_77 = arith.constant 0 : index
    %c0_78 = arith.constant 0 : index
    %109 = vector.load %arg13[%c0_76, %c0_77, %c0_78] : memref<2x176x80xbf16, #tpu.memory_space<vmem>>, vector<1x176x80xbf16>
    %110 = vector.shape_cast %109 : vector<1x176x80xbf16> to vector<176x80xbf16>
    %111 = arith.truncf %108 : vector<124x176xf32> to vector<124x176xbf16>
    %cst_79 = arith.constant dense<0.000000e+00> : vector<124x80xf32>
    %112 = tpu.matmul %111, %110, %cst_79 {dimension_numbers = #tpu.dot_dimension_numbers<[1], [0], [0], [1], [0, 0, 1, 1], [], []>} : vector<124x176xbf16>, vector<176x80xbf16>, vector<124x80xf32> -> vector<124x80xf32>
    %c1_80 = arith.constant 1 : index
    %c0_81 = arith.constant 0 : index
    %c0_82 = arith.constant 0 : index
    %113 = vector.load %arg13[%c1_80, %c0_81, %c0_82] : memref<2x176x80xbf16, #tpu.memory_space<vmem>>, vector<1x176x80xbf16>
    %114 = vector.shape_cast %113 : vector<1x176x80xbf16> to vector<176x80xbf16>
    %115 = arith.truncf %108 : vector<124x176xf32> to vector<124x176xbf16>
    %cst_83 = arith.constant dense<0.000000e+00> : vector<124x80xf32>
    %116 = tpu.matmul %115, %114, %cst_83 {dimension_numbers = #tpu.dot_dimension_numbers<[1], [0], [0], [1], [0, 0, 1, 1], [], []>} : vector<124x176xbf16>, vector<176x80xbf16>, vector<124x80xf32> -> vector<124x80xf32>
    %117 = arith.maximumf %112, %116 : vector<124x80xf32>
    %118 = arith.truncf %117 : vector<124x80xf32> to vector<124x80xbf16>
    %c0_84 = arith.constant 0 : index
    %c0_85 = arith.constant 0 : index
    %c0_86 = arith.constant 0 : index
    %119 = vector.load %arg14[%c0_84, %c0_85, %c0_86] : memref<2x40x124xbf16, #tpu.memory_space<vmem>>, vector<1x40x124xbf16>
    %120 = vector.shape_cast %119 : vector<1x40x124xbf16> to vector<40x124xbf16>
    %cst_87 = arith.constant dense<0.000000e+00> : vector<40x80xf32>
    %121 = tpu.matmul %120, %118, %cst_87 {dimension_numbers = #tpu.dot_dimension_numbers<[1], [0], [0], [1], [0, 0, 1, 1], [], []>} : vector<40x124xbf16>, vector<124x80xbf16>, vector<40x80xf32> -> vector<40x80xf32>
    %c1_88 = arith.constant 1 : index
    %c0_89 = arith.constant 0 : index
    %c0_90 = arith.constant 0 : index
    %122 = vector.load %arg14[%c1_88, %c0_89, %c0_90] : memref<2x40x124xbf16, #tpu.memory_space<vmem>>, vector<1x40x124xbf16>
    %123 = vector.shape_cast %122 : vector<1x40x124xbf16> to vector<40x124xbf16>
    %cst_91 = arith.constant dense<0.000000e+00> : vector<40x80xf32>
    %124 = tpu.matmul %123, %118, %cst_91 {dimension_numbers = #tpu.dot_dimension_numbers<[1], [0], [0], [1], [0, 0, 1, 1], [], []>} : vector<40x124xbf16>, vector<124x80xbf16>, vector<40x80xf32> -> vector<40x80xf32>
    %125 = arith.maximumf %121, %124 : vector<40x80xf32>
    %126 = vector.extract_strided_slice %125 {offsets = [0, 0], sizes = [38, 80], strides = [1, 1]} : vector<40x80xf32> to vector<38x80xf32>
    %c0_92 = arith.constant 0 : index
    %c0_93 = arith.constant 0 : index
    %c0_94 = arith.constant 0 : index
    %127 = vector.load %arg15[%c0_92, %c0_93, %c0_94] : memref<3x80x96xbf16, #tpu.memory_space<vmem>>, vector<1x80x96xbf16>
    %128 = vector.shape_cast %127 : vector<1x80x96xbf16> to vector<80x96xbf16>
    %129 = arith.truncf %126 : vector<38x80xf32> to vector<38x80xbf16>
    %cst_95 = arith.constant dense<0.000000e+00> : vector<38x96xf32>
    %130 = tpu.matmul %129, %128, %cst_95 {dimension_numbers = #tpu.dot_dimension_numbers<[1], [0], [0], [1], [0, 0, 1, 1], [], []>} : vector<38x80xbf16>, vector<80x96xbf16>, vector<38x96xf32> -> vector<38x96xf32>
    %131 = vector.extract_strided_slice %125 {offsets = [1, 0], sizes = [38, 80], strides = [1, 1]} : vector<40x80xf32> to vector<38x80xf32>
    %c1_96 = arith.constant 1 : index
    %c0_97 = arith.constant 0 : index
    %c0_98 = arith.constant 0 : index
    %132 = vector.load %arg15[%c1_96, %c0_97, %c0_98] : memref<3x80x96xbf16, #tpu.memory_space<vmem>>, vector<1x80x96xbf16>
    %133 = vector.shape_cast %132 : vector<1x80x96xbf16> to vector<80x96xbf16>
    %134 = arith.truncf %131 : vector<38x80xf32> to vector<38x80xbf16>
    %cst_99 = arith.constant dense<0.000000e+00> : vector<38x96xf32>
    %135 = tpu.matmul %134, %133, %cst_99 {dimension_numbers = #tpu.dot_dimension_numbers<[1], [0], [0], [1], [0, 0, 1, 1], [], []>} : vector<38x80xbf16>, vector<80x96xbf16>, vector<38x96xf32> -> vector<38x96xf32>
    %136 = arith.addf %130, %135 : vector<38x96xf32>
    %137 = vector.extract_strided_slice %125 {offsets = [2, 0], sizes = [38, 80], strides = [1, 1]} : vector<40x80xf32> to vector<38x80xf32>
    %c2_100 = arith.constant 2 : index
    %c0_101 = arith.constant 0 : index
    %c0_102 = arith.constant 0 : index
    %138 = vector.load %arg15[%c2_100, %c0_101, %c0_102] : memref<3x80x96xbf16, #tpu.memory_space<vmem>>, vector<1x80x96xbf16>
    %139 = vector.shape_cast %138 : vector<1x80x96xbf16> to vector<80x96xbf16>
    %140 = arith.truncf %137 : vector<38x80xf32> to vector<38x80xbf16>
    %cst_103 = arith.constant dense<0.000000e+00> : vector<38x96xf32>
    %141 = tpu.matmul %140, %139, %cst_103 {dimension_numbers = #tpu.dot_dimension_numbers<[1], [0], [0], [1], [0, 0, 1, 1], [], []>} : vector<38x80xbf16>, vector<80x96xbf16>, vector<38x96xf32> -> vector<38x96xf32>
    %142 = arith.addf %136, %141 : vector<38x96xf32>
    %cst_104 = arith.constant 0.000000e+00 : f32
    %143 = vector.broadcast %cst_104 : f32 to vector<38x96xf32>
    %144 = arith.maximumf %142, %143 : vector<38x96xf32>
    %c0_105 = arith.constant 0 : index
    %c0_106 = arith.constant 0 : index
    %145 = vector.load %arg16[%c0_105, %c0_106] : memref<1x96xf32, #tpu.memory_space<vmem>>, vector<1x96xf32>
    %146 = vector.broadcast %145 : vector<1x96xf32> to vector<38x96xf32>
    %147 = arith.addf %144, %146 : vector<38x96xf32>
    %148 = vector.extract_strided_slice %147 {offsets = [0, 0], sizes = [36, 96], strides = [1, 1]} : vector<38x96xf32> to vector<36x96xf32>
    %c0_107 = arith.constant 0 : index
    %c0_108 = arith.constant 0 : index
    %c0_109 = arith.constant 0 : index
    %149 = vector.load %arg17[%c0_107, %c0_108, %c0_109] : memref<3x96x10xbf16, #tpu.memory_space<vmem>>, vector<1x96x10xbf16>
    %150 = vector.shape_cast %149 : vector<1x96x10xbf16> to vector<96x10xbf16>
    %151 = arith.truncf %148 : vector<36x96xf32> to vector<36x96xbf16>
    %cst_110 = arith.constant dense<0.000000e+00> : vector<36x10xf32>
    %152 = tpu.matmul %151, %150, %cst_110 {dimension_numbers = #tpu.dot_dimension_numbers<[1], [0], [0], [1], [0, 0, 1, 1], [], []>} : vector<36x96xbf16>, vector<96x10xbf16>, vector<36x10xf32> -> vector<36x10xf32>
    %153 = vector.extract_strided_slice %147 {offsets = [1, 0], sizes = [36, 96], strides = [1, 1]} : vector<38x96xf32> to vector<36x96xf32>
    %c1_111 = arith.constant 1 : index
    %c0_112 = arith.constant 0 : index
    %c0_113 = arith.constant 0 : index
    %154 = vector.load %arg17[%c1_111, %c0_112, %c0_113] : memref<3x96x10xbf16, #tpu.memory_space<vmem>>, vector<1x96x10xbf16>
    %155 = vector.shape_cast %154 : vector<1x96x10xbf16> to vector<96x10xbf16>
    %156 = arith.truncf %153 : vector<36x96xf32> to vector<36x96xbf16>
    %cst_114 = arith.constant dense<0.000000e+00> : vector<36x10xf32>
    %157 = tpu.matmul %156, %155, %cst_114 {dimension_numbers = #tpu.dot_dimension_numbers<[1], [0], [0], [1], [0, 0, 1, 1], [], []>} : vector<36x96xbf16>, vector<96x10xbf16>, vector<36x10xf32> -> vector<36x10xf32>
    %158 = arith.addf %152, %157 : vector<36x10xf32>
    %159 = vector.extract_strided_slice %147 {offsets = [2, 0], sizes = [36, 96], strides = [1, 1]} : vector<38x96xf32> to vector<36x96xf32>
    %c2_115 = arith.constant 2 : index
    %c0_116 = arith.constant 0 : index
    %c0_117 = arith.constant 0 : index
    %160 = vector.load %arg17[%c2_115, %c0_116, %c0_117] : memref<3x96x10xbf16, #tpu.memory_space<vmem>>, vector<1x96x10xbf16>
    %161 = vector.shape_cast %160 : vector<1x96x10xbf16> to vector<96x10xbf16>
    %162 = arith.truncf %159 : vector<36x96xf32> to vector<36x96xbf16>
    %cst_118 = arith.constant dense<0.000000e+00> : vector<36x10xf32>
    %163 = tpu.matmul %162, %161, %cst_118 {dimension_numbers = #tpu.dot_dimension_numbers<[1], [0], [0], [1], [0, 0, 1, 1], [], []>} : vector<36x96xbf16>, vector<96x10xbf16>, vector<36x10xf32> -> vector<36x10xf32>
    %164 = arith.addf %158, %163 : vector<36x10xf32>
    %c0_119 = arith.constant 0 : index
    %c0_120 = arith.constant 0 : index
    %165 = vector.load %arg18[%c0_119, %c0_120] : memref<8x36xf32, #tpu.memory_space<vmem>>, vector<8x36xf32>
    %cst_121 = arith.constant dense<0.000000e+00> : vector<8x10xf32>
    %166 = tpu.matmul %165, %164, %cst_121 {dimension_numbers = #tpu.dot_dimension_numbers<[1], [0], [0], [1], [0, 0, 1, 1], [], []>} : vector<8x36xf32>, vector<36x10xf32>, vector<8x10xf32> -> vector<8x10xf32>
    %c0_122 = arith.constant 0 : index
    %c0_123 = arith.constant 0 : index
    %167 = vector.load %arg19[%c0_122, %c0_123] : memref<1x10xf32, #tpu.memory_space<vmem>>, vector<1x10xf32>
    %168 = vector.broadcast %167 : vector<1x10xf32> to vector<8x10xf32>
    %169 = arith.addf %166, %168 : vector<8x10xf32>
    %cst_124 = arith.constant dense<0xFF800000> : vector<8xf32>
    %170 = vector.multi_reduction <maximumf>, %169, %cst_124 [1] : vector<8x10xf32> to vector<8xf32>
    %171 = vector.shape_cast %170 : vector<8xf32> to vector<8x1xf32>
    %172 = vector.broadcast %171 : vector<8x1xf32> to vector<8x10xf32>
    %173 = arith.subf %169, %172 : vector<8x10xf32>
    %174 = math.exp %173 : vector<8x10xf32>
    %175 = vector.broadcast %171 : vector<8x1xf32> to vector<8x10xf32>
    %176 = arith.subf %169, %175 : vector<8x10xf32>
    %cst_125 = arith.constant dense<0.000000e+00> : vector<8xf32>
    %177 = vector.multi_reduction <add>, %174, %cst_125 [1] : vector<8x10xf32> to vector<8xf32>
    %178 = vector.shape_cast %177 : vector<8xf32> to vector<8x1xf32>
    %179 = math.log %178 : vector<8x1xf32>
    %180 = vector.broadcast %179 : vector<8x1xf32> to vector<8x10xf32>
    %181 = arith.subf %176, %180 : vector<8x10xf32>
    %c0_126 = arith.constant 0 : index
    %c0_127 = arith.constant 0 : index
    %182 = vector.load %arg20[%c0_126, %c0_127] : memref<8x10xf32, #tpu.memory_space<vmem>>, vector<8x10xf32>
    tpu.vector_store %arg20[%c0_126, %c0_127], %181 {strides = array<i32>} : memref<8x10xf32, #tpu.memory_space<vmem>>, vector<8x10xf32>,
    return
  }
  func.func @transform_0(%arg0: i32) -> (i32, i32) {
    %c0_i32 = arith.constant 0 : i32
    %c0_i32_0 = arith.constant 0 : i32
    return %arg0, %c0_i32 : i32, i32
  }
  func.func @transform_1(%arg0: i32) -> (i32, i32, i32) {
    %c0_i32 = arith.constant 0 : i32
    %c0_i32_0 = arith.constant 0 : i32
    %c0_i32_1 = arith.constant 0 : i32
    %c0_i32_2 = arith.constant 0 : i32
    return %c0_i32, %c0_i32_0, %c0_i32_1 : i32, i32, i32
  }
  func.func @transform_2(%arg0: i32) -> (i32, i32) {
    %c0_i32 = arith.constant 0 : i32
    %c0_i32_0 = arith.constant 0 : i32
    %c0_i32_1 = arith.constant 0 : i32
    return %c0_i32, %c0_i32_0 : i32, i32
  }
  func.func @transform_3(%arg0: i32) -> (i32, i32, i32) {
    %c0_i32 = arith.constant 0 : i32
    %c0_i32_0 = arith.constant 0 : i32
    %c0_i32_1 = arith.constant 0 : i32
    %c0_i32_2 = arith.constant 0 : i32
    return %c0_i32, %c0_i32_0, %c0_i32_1 : i32, i32, i32
  }
  func.func @transform_4(%arg0: i32) -> (i32, i32) {
    %c0_i32 = arith.constant 0 : i32
    %c0_i32_0 = arith.constant 0 : i32
    %c0_i32_1 = arith.constant 0 : i32
    return %c0_i32, %c0_i32_0 : i32, i32
  }
  func.func @transform_5(%arg0: i32) -> (i32, i32, i32) {
    %c0_i32 = arith.constant 0 : i32
    %c0_i32_0 = arith.constant 0 : i32
    %c0_i32_1 = arith.constant 0 : i32
    %c0_i32_2 = arith.constant 0 : i32
    return %c0_i32, %c0_i32_0, %c0_i32_1 : i32, i32, i32
  }
  func.func @transform_6(%arg0: i32) -> (i32, i32, i32) {
    %c0_i32 = arith.constant 0 : i32
    %c0_i32_0 = arith.constant 0 : i32
    %c0_i32_1 = arith.constant 0 : i32
    %c0_i32_2 = arith.constant 0 : i32
    return %c0_i32, %c0_i32_0, %c0_i32_1 : i32, i32, i32
  }
  func.func @transform_7(%arg0: i32) -> (i32, i32, i32) {
    %c0_i32 = arith.constant 0 : i32
    %c0_i32_0 = arith.constant 0 : i32
    %c0_i32_1 = arith.constant 0 : i32
    %c0_i32_2 = arith.constant 0 : i32
    return %c0_i32, %c0_i32_0, %c0_i32_1 : i32, i32, i32
  }
  func.func @transform_8(%arg0: i32) -> (i32, i32) {
    %c0_i32 = arith.constant 0 : i32
    %c0_i32_0 = arith.constant 0 : i32
    %c0_i32_1 = arith.constant 0 : i32
    return %c0_i32, %c0_i32_0 : i32, i32
  }
  func.func @transform_9(%arg0: i32) -> (i32, i32) {
    %c0_i32 = arith.constant 0 : i32
    %c0_i32_0 = arith.constant 0 : i32
    %c0_i32_1 = arith.constant 0 : i32
    return %c0_i32, %c0_i32_0 : i32, i32
  }
  func.func @transform_10(%arg0: i32) -> (i32, i32, i32) {
    %c0_i32 = arith.constant 0 : i32
    %c0_i32_0 = arith.constant 0 : i32
    %c0_i32_1 = arith.constant 0 : i32
    %c0_i32_2 = arith.constant 0 : i32
    return %c0_i32, %c0_i32_0, %c0_i32_1 : i32, i32, i32
  }
  func.func @transform_11(%arg0: i32) -> (i32, i32) {
    %c0_i32 = arith.constant 0 : i32
    %c0_i32_0 = arith.constant 0 : i32
    %c0_i32_1 = arith.constant 0 : i32
    return %c0_i32, %c0_i32_0 : i32, i32
  }
  func.func @transform_12(%arg0: i32) -> (i32, i32, i32) {
    %c0_i32 = arith.constant 0 : i32
    %c0_i32_0 = arith.constant 0 : i32
    %c0_i32_1 = arith.constant 0 : i32
    %c0_i32_2 = arith.constant 0 : i32
    return %c0_i32, %c0_i32_0, %c0_i32_1 : i32, i32, i32
  }
  func.func @transform_13(%arg0: i32) -> (i32, i32, i32) {
    %c0_i32 = arith.constant 0 : i32
    %c0_i32_0 = arith.constant 0 : i32
    %c0_i32_1 = arith.constant 0 : i32
    %c0_i32_2 = arith.constant 0 : i32
    return %c0_i32, %c0_i32_0, %c0_i32_1 : i32, i32, i32
  }
  func.func @transform_14(%arg0: i32) -> (i32, i32, i32) {
    %c0_i32 = arith.constant 0 : i32
    %c0_i32_0 = arith.constant 0 : i32
    %c0_i32_1 = arith.constant 0 : i32
    %c0_i32_2 = arith.constant 0 : i32
    return %c0_i32, %c0_i32_0, %c0_i32_1 : i32, i32, i32
  }
  func.func @transform_15(%arg0: i32) -> (i32, i32) {
    %c0_i32 = arith.constant 0 : i32
    %c0_i32_0 = arith.constant 0 : i32
    %c0_i32_1 = arith.constant 0 : i32
    return %c0_i32, %c0_i32_0 : i32, i32
  }
  func.func @transform_16(%arg0: i32) -> (i32, i32, i32) {
    %c0_i32 = arith.constant 0 : i32
    %c0_i32_0 = arith.constant 0 : i32
    %c0_i32_1 = arith.constant 0 : i32
    %c0_i32_2 = arith.constant 0 : i32
    return %c0_i32, %c0_i32_0, %c0_i32_1 : i32, i32, i32
  }
  func.func @transform_17(%arg0: i32) -> (i32, i32) {
    %c0_i32 = arith.constant 0 : i32
    %c0_i32_0 = arith.constant 0 : i32
    %c0_i32_1 = arith.constant 0 : i32
    return %c0_i32, %c0_i32_0 : i32, i32
  }
  func.func @transform_18(%arg0: i32) -> (i32, i32) {
    %c0_i32 = arith.constant 0 : i32
    %c0_i32_0 = arith.constant 0 : i32
    %c0_i32_1 = arith.constant 0 : i32
    return %c0_i32, %c0_i32_0 : i32, i32
  }
  func.func @transform_19(%arg0: i32) -> (i32, i32) {
    %c0_i32 = arith.constant 0 : i32
    %c0_i32_0 = arith.constant 0 : i32
    return %arg0, %c0_i32 : i32, i32
  }
}

</mosaic_0001>

<bundles_post_ra>
// kernel: model1_forward.1
= control target key start
LH: loop header
LB: loop body
LE: loop exit
PB: predicated region body
PF: predicated region fallthrough
CT: control target
= control target key end

     0   :  { %s11002_s0 = inlined_call_operand.vmem [shape: f32[480,28], index: 0, kind: input, shape index: {}]   ;;  %s11003_s1 = inlined_call_operand.vmem [shape: bf16[3,28,112], index: 1, kind: input, shape index: {}]   ;;  %s11004_s2 = inlined_call_operand.vmem [shape: f32[1,112], index: 2, kind: input, shape index: {}]   ;;  %s11005_s3 = inlined_call_operand.vmem [shape: bf16[3,112,208], index: 3, kind: input, shape index: {}]   ;;  %s11006_s4 = inlined_call_operand.vmem [shape: f32[1,208], index: 4, kind: input, shape index: {}]   ;;  %s11007_s5 = inlined_call_operand.vmem [shape: bf16[2,208,104], index: 5, kind: input, shape index: {}]   ;;  %s11008_s6 = inlined_call_operand.vmem [shape: bf16[2,128,236], index: 6, kind: input, shape index: {}]   ;;  %s11009_s7 = inlined_call_operand.vmem [shape: bf16[3,104,88], index: 7, kind: input, shape index: {}]   ;;  %s11010_s8 = inlined_call_operand.vmem [shape: f32[1,88], index: 8, kind: input, shape index: {}]   ;;  %s11011_s9 = inlined_call_operand.vmem [shape: f32[126,1], index: 9, kind: input, shape index: {}]   ;;  %s11012_s10 = inlined_call_operand.vmem [shape: bf16[3,88,176], index: 10, kind: input, shape index: {}]   ;;  %s11013_s11 = inlined_call_operand.vmem [shape: f32[1,176], index: 11, kind: input, shape index: {}]   ;;  %s11014_s12 = inlined_call_operand.vmem [shape: bf16[2,176,80], index: 12, kind: input, shape index: {}]   ;;  %s11015_s13 = inlined_call_operand.vmem [shape: bf16[2,40,124], index: 13, kind: input, shape index: {}]   ;;  %s11016_s14 = inlined_call_operand.vmem [shape: bf16[3,80,96], index: 14, kind: input, shape index: {}]   ;;  %s11017_s15 = inlined_call_operand.vmem [shape: f32[1,96], index: 15, kind: input, shape index: {}]   ;;  %s11018_s16 = inlined_call_operand.vmem [shape: bf16[3,96,10], index: 16, kind: input, shape index: {}]   ;;  %s11019_s17 = inlined_call_operand.vmem [shape: f32[8,36], index: 17, kind: input, shape index: {}]   ;;  %s11020_s18 = inlined_call_operand.vmem [shape: f32[1,10], index: 18, kind: input, shape index: {}]   ;;  %s11021_s19 = inlined_call_operand.hbm [shape: f32[16,10], index: 19, kind: output, shape index: {}]  }
   0x1   :  { %11032 = sst [smem:[#allocation44_spill]] %s11002_s0 }
   0x2   :  { %11033 = sst [smem:[#allocation45_spill]] %s11003_s1 }
   0x3   :  { %11034 = sst [smem:[#allocation46_spill]] %s11004_s2 }
   0x4   :  { %11035 = sst [smem:[#allocation47_spill]] %s11005_s3 }
   0x5   :  { %11036 = sst [smem:[#allocation48_spill]] %s11006_s4 }
   0x6   :  { %24 = vsyncpa [#allocation3], 0 }
   0x7   :  { %26 = vsyncpa [#allocation3 + $0x1], 0  ;;  %s8111_s0 = smov 0   ;;  %s8113_s30 = smov 0  }
   0x8   :  { %s8115_s20 = smov 0   ;;  %s8117_s21 = smov 0  }
   0x9 LB: > { %11037 = sst [smem:[#allocation5_spill]] %s7996_s0  ;;  %s8132_s1 = sadd.s32 4294967295, %s8008_s21   ;;  %s8008_s21 = sphi %s8117_s21, %s11125_s21   ;;  %s8004_s20 = sphi %s8115_s20, %s11127_s20   ;;  %s8000_s30 = sphi %s8113_s30, %s11129_s30   ;;  %s7996_s0 = sphi %s8111_s0, %s11128_s0  }
   0xa   : > { %11038 = sst [smem:[#allocation6_spill]] %s8004_s20  ;;  %s6315_s22 = sadd.s32 4294967294, %s8008_s21  }
   0xb   : > { %11039 = sst [smem:[#allocation7_spill]] %s8008_s21  ;;  %s8136_s2 = sadd.s32 1, %s8008_s21  }
   0xc   : > { %11040 = sst [smem:[#allocation8_spill]] %s8136_s2  ;;  %s443_s23 = sadd.s32 1, %s8004_s20 }
   0xd   : > { %s440_s24 = ssub.s32 %s8008_s21, %s8136_s2  ;;  %p453_p0 = scmp.ne.s32.totalorder %s8004_s20, %s8000_s30 }
   0xe   : > { %p441_p1 = scmp.eq.s32.totalorder %s440_s24, 0  ;;  %p454_p2 = scmp.eq.s32.totalorder %s8132_s1, 1 }
   0xf   : > { %p459_p3 = scmp.ne.s32.totalorder %s8000_s30, %s7996_s0  ;;  %p460_p4 = scmp.eq.s32.totalorder %s6315_s22, 1 }
  0x10   : > { %s8147_s25 = scalar_select %p441_p1, %s8004_s20, %s443_s23  }
  0x11   : > { %p8149_p5 = por %p454_p2, %p453_p0  ;;  %p8153_p6 = por %p460_p4, %p459_p3 }
  0x12   : > { %11041 = sst [smem:[#allocation9_spill]] %s8147_s25  ;;  %p6318_p7 = scmp.ge.s32.totalorder %s8008_s21, 1 }
  0x13   : > { %s11043_s26 = scalar_select %p8153_p6, 1, 0 }
  0x14   : > { %p541_p8 = scmp.lt.s32.totalorder %s8008_s21, 3 }
  0x15   : > { %11044 = sst [smem:[#allocation10_spill]] %s11043_s26 }
  0x16   : > { %p542_p9 = pnand %p6318_p7, %p541_p8 }
  0x18   : > { %545 = sbr.rel (%p542_p9) target bundleno = 3056 (0xbf0), region = 96 }
  0x1d   : > { %s11045_s29 = sld [smem:[#allocation45_spill]]  ;;  %vm835_vm0 = vcmask 1045504   ;;  %s597_s22 = smul.u32 30, %s8132_s1  ;;  %vm789_vm1 = vcmask 228352   ;;  %vm1071_vm2 = vcmask 1046528   ;;  %vm1571_vm4 = vcmask 916480  }
  0x1e   : > { %s11046_s27 = sld [smem:[#allocation44_spill]]  ;;  %vm658_vm3 = vsmask.f32 7424  ;;  %vm2715_vm5 = vcmask 654336   ;;  %vm3335_vm6 = vcmask 883712   ;;  %vm3850_vm7 = vcmask 1043456  }
  0x1f   : > { %p598_p10 = scmp.lt.s32.totalorder %s597_s22, 59  ;;  %s11047_s0 = sld [smem:[#allocation47_spill]]  ;;  %vm3825_vm8 = vcmask 850944   ;;  %vm4475_vm9 = vcmask 719872   ;;  %vm5203_vm10 = vcmask 392192   ;;  %vm5555_vm11 = vcmask 1014784  }
  0x20   : > { %s11049_s25 = sld [smem:[#allocation46_spill]]  ;;  %vm6002_vm12 = vcmask 785408   ;;  %vm6199_vm13 = vcmask 293888   ;;  %vm6226_vm14 = vcmask 80896   ;;  %s7666_s24 = sshll.u32 %s8132_s1, 3 }
  0x21   : > { %s11131_s22 = smov (!%p598_p10, %s597_s22), 59  ;;  %s11075_s4 = sld [smem:[#allocation48_spill]] }
  0x22   : > { %s6320_s21 = sshll.u32 %s11131_s22, 3 }
  0x23   : > { %v6354_v0 = vld [vmem:[%s11045_s29 + $0x8] sm:$0xf]  ;;  %v7670_v1 = vld [vmem:[%s11045_s29 + $0x8] sm:$0x30]  ;;  %v6331_v5 = vld [vmem:[%s11045_s29 + $0x18] sm:$0xf] }
  0x24   : > { %v6355_v2 = vor.u32 %v7670_v1, %v6354_v0  ;;  %v6381_v3 = vld [vmem:[%s11045_s29 + $0x28] sm:$0xf]  ;;  %v7674_v4 = vld [vmem:[%s11045_s29 + $0x28] sm:$0x30]  ;;  %v7672_v7 = vld [vmem:[%s11045_s29 + $0x18] sm:$0x30]  ;;  %s8193_s28 = scalar_lea.vmem %s11046_s27, %s6320_s21 }
  0x25   : > { %v6382_v6 = vor.u32 %v7674_v4, %v6381_v3  ;;  %v7669_v9 = vld [vmem:[%s11045_s29] sm:$0xff]  ;;  %v6332_v10 = vor.u32 %v7672_v7, %v6331_v5  ;;  %v7671_v14 = vld [vmem:[%s11045_s29 + $0x10] sm:$0xff]  ;;  %v605_v16 = vld [vmem:[%s8193_s28 + $0x8] sm:$0xff]  ;;  %s11048_s2 = smov %s11047_s0  ;;  %s594_s21 = sand.u32 1, %s8000_s30  }
  0x26   : > { %v965_v8 = vsel %vm835_vm0, %v6355_v2, 0  ;;  %v7673_v13 = vld [vmem:[%s11045_s29 + $0x20] sm:$0xff]  ;;  %v606_v17 = vld [vmem:[%s8193_s28 + $0x10] sm:$0xff]  ;;  %v607_v19 = vld [vmem:[%s8193_s28 + $0x18] sm:$0xff]  ;;  %s6319_s26 = sshll.u32 %s594_s21, 3  ;;  %s6241_s20 = scalar_lea.sflag [#allocation3], %s594_s21 }
  0x27   : > { %973 = vmatpush.bf16.msra.mxu1 %v965_v8  ;;  %v1158_v11 = vsel %vm835_vm0, %v6382_v6, 0  ;;  %v837_v12 = vsel %vm835_vm0, %v6332_v10, 0  ;;  %v604_v15 = vld [vmem:[%s8193_s28] sm:$0xff]  ;;  %v639_v20 = vpack.c.bf16 %v607_v19, %v606_v17  ;;  %v609_v32 = vld [vmem:[%s8193_s28 + $0x28] sm:$0xff]  ;;  %v610_v41 = vld [vmem:[%s8193_s28 + $0x30] sm:$0xff]  ;;  %s596_s29 = scalar_lea.vmem [#allocation2], %s6319_s26 }
  0x28   : > { %1166 = vmatpush.bf16.msra.mxu2 %v1158_v11  ;;  %845 = vmatpush.bf16.msra.mxu0 %v837_v12  ;;  %v638_v18 = vpack.c.bf16 %v605_v16, %v604_v15  ;;  %v608_v31 = vld [vmem:[%s8193_s28 + $0x20] sm:$0xff]  ;;  %v611_v42 = vld [vmem:[%s8193_s28 + $0x38] sm:$0xff]  ;;  %v613_v52 = vld [vmem:[%s8193_s28 + $0x48] sm:$0xff]  ;;  %s6253_s23 = sshll.u32 %s596_s29, 4  ;;  %s7966_s26 = scalar_lea.hbm %s11021_s19, 16  ;;  %s6254_s23 = int_to_ptr.vmem [resolvable:$true] %s6253_s23 }
  0x29   : > { %v1073_v24 = vrot.slane %v639_v20, 1  ;;  %v667_v25 = vshll.u32 %v639_v20, 16  ;;  %v640_v33 = vpack.c.bf16 %v609_v32, %v608_v31  ;;  %v671_v34 = vshrl.u32 %v639_v20, 16  ;;  %v612_v51 = vld [vmem:[%s8193_s28 + $0x40] sm:$0xff]  ;;  %v614_v61 = vld [vmem:[%s8193_s28 + $0x50] sm:$0xff]  ;;  %v615_v62 = vld [vmem:[%s8193_s28 + $0x58] sm:$0xff] }
  0x2a   : > { %v1072_v21 = vrot.slane %v638_v18, 1  ;;  %v660_v22 = vshrl.u32 %v638_v18, 16  ;;  %v662_v23 = vshll.u32 %v638_v18, 16  ;;  %v641_v43 = vpack.c.bf16 %v611_v42, %v610_v41  ;;  %v616_v7 = vld [vmem:[%s8193_s28 + $0x60] sm:$0xff]  ;;  %v617_v8 = vld [vmem:[%s8193_s28 + $0x68] sm:$0xff]  ;;  %v618_v17 = vld [vmem:[%s8193_s28 + $0x70] sm:$0xff] }
  0x2b   : > { %974 = vmatpush.bf16.msra.mxu1 %v7669_v9  ;;  %v669_v28 = vrot.slane %v667_v25, 1  ;;  %v675_v35 = vshll.u32 %v640_v33, 16  ;;  %v1075_v36 = vrot.slane %v640_v33, 1  ;;  %v679_v44 = vshrl.u32 %v640_v33, 16 }
  0x2c   : > { %1167 = vmatpush.bf16.msra.mxu2 %v7673_v13  ;;  %846 = vmatpush.bf16.msra.mxu0 %v7671_v14  ;;  %v664_v26 = vrot.slane %v662_v23, 1  ;;  %v1074_v27 = vsel %vm1071_vm2, %v1072_v21, %v1073_v24  ;;  %v683_v45 = vshll.u32 %v641_v43, 16  ;;  %v1077_v46 = vrot.slane %v641_v43, 1 }
  0x2d   : > { %v673_v37 = vor.u32 %v671_v34, %v669_v28  ;;  %v677_v38 = vrot.slane %v675_v35, 1  ;;  %v1076_v39 = vsel %vm1071_vm2, %v1073_v24, %v1075_v36  ;;  %v642_v53 = vpack.c.bf16 %v613_v52, %v612_v51  ;;  %v7702_v34 = vld [vmem:[%s11048_s2 + $0xd4] sm:$0xf0] }
  0x2e   : > { %6356 = vmatmul.msk.bf16.vlgmr.msra.gmra.mxu1 %vm789_vm1, %v638_v18  ;;  %v665_v29 = vor.u32 %v664_v26, %v660_v22  ;;  %v685_v48 = vrot.slane %v683_v45, 1  ;;  %v1078_v49 = vsel %vm1071_vm2, %v1075_v36, %v1077_v46  ;;  %v687_v54 = vshrl.u32 %v641_v43, 16  ;;  %v619_v18 = vld [vmem:[%s8193_s28 + $0x78] sm:$0xff]  ;;  %v6446_v45 = vld [vmem:[%s11048_s2 + $0xb0] sm:$0xf] }
  0x2f   : > { %6383 = vmatmul.msk.bf16.vlgmr.msra.gmra.mxu2 %vm789_vm1, %v1074_v27  ;;  %v678_v40 = vsel %vm658_vm3, %v673_v37, %v677_v38  ;;  %v681_v47 = vor.u32 %v679_v44, %v677_v38  ;;  %v691_v55 = vshll.u32 %v642_v53, 16  ;;  %v1079_v56 = vrot.slane %v642_v53, 1  ;;  %v620_v27 = vld [vmem:[%s8193_s28 + $0x80] sm:$0xff]  ;;  %v623_v44 = vld [vmem:[%s8193_s28 + $0x98] sm:$0xff] }
  0x30   : > { %v670_v30 = vsel %vm658_vm3, %v665_v29, %v669_v28  ;;  %v689_v57 = vor.u32 %v687_v54, %v685_v48  ;;  %v643_v63 = vpack.c.bf16 %v615_v62, %v614_v61  ;;  %v695_v0 = vshrl.u32 %v642_v53, 16  ;;  %v621_v28 = vld [vmem:[%s8193_s28 + $0x88] sm:$0xff]  ;;  %v6422_v62 = vld [vmem:[%s11048_s2 + $0x80] sm:$0xf] }
  0x31   : > { %6333 = vmatmul.msk.bf16.vlgmr.msra.gmra.mxu0 %vm789_vm1, %v670_v30  ;;  %v686_v50 = vsel %vm658_vm3, %v681_v47, %v685_v48  ;;  %v693_v58 = vrot.slane %v691_v55, 1  ;;  %v1080_v59 = vsel %vm1071_vm2, %v1077_v46, %v1079_v56  ;;  %v644_v9 = vpack.c.bf16 %v617_v8, %v616_v7  ;;  %v7698_v46 = vld [vmem:[%s11048_s2 + $0xb4] sm:$0xf0]  ;;  %v6414_v7 = vld [vmem:[%s11048_s2 + $0x70] sm:$0xf] }
  0x32   : > { %v699_v1 = vshll.u32 %v643_v63, 16  ;;  %v1081_v2 = vrot.slane %v643_v63, 1  ;;  %v703_v10 = vshrl.u32 %v643_v63, 16  ;;  %v645_v19 = vpack.c.bf16 %v619_v18, %v618_v17  ;;  %v7690_v8 = vld [vmem:[%s11048_s2 + $0x74] sm:$0xf0] }
  0x33   : > { %v694_v60 = vsel %vm658_vm3, %v689_v57, %v693_v58  ;;  %v697_v3 = vor.u32 %v695_v0, %v693_v58  ;;  %v707_v11 = vshll.u32 %v644_v9, 16  ;;  %v1083_v12 = vrot.slane %v644_v9, 1  ;;  %v7694_v57 = vld [vmem:[%s11048_s2 + $0x94] sm:$0xf0] }
  0x34   : > { %v701_v4 = vrot.slane %v699_v1, 1  ;;  %v1082_v5 = vsel %vm1071_vm2, %v1079_v56, %v1081_v2  ;;  %v715_v21 = vshll.u32 %v645_v19, 16  ;;  %v1085_v22 = vrot.slane %v645_v19, 1  ;;  %v6430_v56 = vld [vmem:[%s11048_s2 + $0x90] sm:$0xf] }
  0x35   : > { %v709_v14 = vrot.slane %v707_v11, 1  ;;  %v1084_v15 = vsel %vm1071_vm2, %v1081_v2, %v1083_v12  ;;  %v646_v29 = vpack.c.bf16 %v621_v28, %v620_v27  ;;  %v719_v30 = vshrl.u32 %v645_v19, 16  ;;  %v626_v28 = vld [vmem:[%s8193_s28 + $0xb0] sm:$0xff] }
  0x36   : > { %v702_v6 = vsel %vm658_vm3, %v697_v3, %v701_v4  ;;  %v705_v13 = vor.u32 %v703_v10, %v701_v4  ;;  %v717_v24 = vrot.slane %v715_v21, 1  ;;  %v1086_v25 = vsel %vm1071_vm2, %v1083_v12, %v1085_v22  ;;  %v624_v4 = vld [vmem:[%s8193_s28 + $0xa0] sm:$0xff] }
  0x37   : > { %v723_v31 = vshll.u32 %v646_v29, 16  ;;  %v1087_v32 = vrot.slane %v646_v29, 1  ;;  %v6447_v47 = vor.u32 %v7698_v46, %v6446_v45  ;;  %v727_v51 = vshrl.u32 %v646_v29, 16 }
  0x38   : > { %v710_v16 = vsel %vm658_vm3, %v705_v13, %v709_v14  ;;  %v721_v35 = vor.u32 %v719_v30, %v717_v24 }
  0x39   : > { %v725_v36 = vrot.slane %v723_v31, 1  ;;  %v1088_v38 = vsel %vm1071_vm2, %v1085_v22, %v1087_v32 }
  0x3b   : > { %v726_v41 = vsel %vm658_vm3, %v721_v35, %v725_v36  ;;  %v729_v58 = vor.u32 %v727_v51, %v725_v36 }
  0x3e   : > { %6357 = vmatmul.msk.bf16.gmra.mxu1 %vm789_vm1, %v639_v20  ;;  %v711_v20 = vshrl.u32 %v644_v9, 16 }
  0x3f   : > { %6384 = vmatmul.msk.bf16.gmra.mxu2 %vm789_vm1, %v1076_v39  ;;  %v6454_v39 = vld [vmem:[%s11048_s2 + $0xc0] sm:$0xf] }
  0x40   : > { %v713_v23 = vor.u32 %v711_v20, %v709_v14 }
  0x41   : > { %6334 = vmatmul.msk.bf16.gmra.mxu0 %vm789_vm1, %v678_v40  ;;  %v7700_v40 = vld [vmem:[%s11048_s2 + $0xc4] sm:$0xf0] }
  0x42   : > { %v718_v26 = vsel %vm658_vm3, %v713_v23, %v717_v24  ;;  %v6455_v42 = vor.u32 %v7700_v40, %v6454_v39 }
  0x4e   : > { %6358 = vmatmul.msk.bf16.gmra.mxu1 %vm789_vm1, %v640_v33  ;;  %v6462_v33 = vld [vmem:[%s11047_s0 + $0xd0] sm:$0xf] }
  0x4f   : > { %6385 = vmatmul.msk.bf16.gmra.mxu2 %vm789_vm1, %v1078_v49  ;;  %v6463_v37 = vor.u32 %v7702_v34, %v6462_v33  ;;  %v6438_v49 = vld [vmem:[%s11048_s2 + $0xa0] sm:$0xf] }
  0x51   : > { %6335 = vmatmul.msk.bf16.gmra.mxu0 %vm789_vm1, %v686_v50  ;;  %1618 = vmatpush.bf16.msra.mxu3 %v6463_v37  ;;  %v7696_v50 = vld [vmem:[%s11048_s2 + $0xa4] sm:$0xf0] }
  0x55   : > { %1619 = vmatpush.bf16.msra.mxu3 %v6455_v42 }
  0x59   : > { %1620 = vmatpush.bf16.msra.mxu3 %v6447_v47 }
  0x5e   : > { %6359 = vmatmul.msk.bf16.gmra.mxu1 %vm789_vm1, %v641_v43  ;;  %v622_v43 = vld [vmem:[%s8193_s28 + $0x90] sm:$0xff] }
  0x5f   : > { %6386 = vmatmul.msk.bf16.gmra.mxu2 %vm789_vm1, %v1080_v59  ;;  %v647_v48 = vpack.c.bf16 %v623_v44, %v622_v43 }
  0x61   : > { %6336 = vmatmul.msk.bf16.gmra.mxu0 %vm789_vm1, %v694_v60  ;;  %v731_v52 = vshll.u32 %v647_v48, 16  ;;  %v1089_v55 = vrot.slane %v647_v48, 1  ;;  %v6431_v60 = vor.u32 %v7694_v57, %v6430_v56  ;;  %v735_v12 = vshrl.u32 %v647_v48, 16 }
  0x63   : > { %v733_v59 = vrot.slane %v731_v52, 1  ;;  %v1090_v61 = vsel %vm1071_vm2, %v1087_v32, %v1089_v55  ;;  %v8314_v32 = vld [vmem:[%s11049_s25] ss:$0 sm:$0xff] }
  0x65   : > { %v734_v1 = vsel %vm658_vm3, %v729_v58, %v733_v59 }
  0x6e   : > { %6360 = vmatmul.msk.bf16.gmra.mxu1 %vm789_vm1, %v642_v53  ;;  %v6439_v53 = vor.u32 %v7696_v50, %v6438_v49 }
  0x6f   : > { %6387 = vmatmul.msk.bf16.gmra.mxu2 %vm789_vm1, %v1082_v5  ;;  %v625_v5 = vld [vmem:[%s8193_s28 + $0xa8] sm:$0xff] }
  0x70   : > { %1621 = vmatpush.bf16.msra.mxu3 %v6439_v53  ;;  %v648_v10 = vpack.c.bf16 %v625_v5, %v624_v4 }
  0x71   : > { %6337 = vmatmul.msk.bf16.gmra.mxu0 %vm789_vm1, %v702_v6 }
  0x72   : > { %v739_v13 = vshll.u32 %v648_v10, 16  ;;  %v743_v39 = vshrl.u32 %v648_v10, 16 }
  0x74   : > { %1622 = vmatpush.bf16.msra.mxu3 %v6431_v60  ;;  %v741_v20 = vrot.slane %v739_v13, 1  ;;  %v628_v60 = vld [vmem:[%s8193_s28 + $0xc0] sm:$0xff] }
  0x7e   : > { %6361 = vmatmul.msk.bf16.gmra.mxu1 %vm789_vm1, %v643_v63  ;;  %v7692_v63 = vld [vmem:[%s11048_s2 + $0x84] sm:$0xf0] }
  0x7f   : > { %6388 = vmatmul.msk.bf16.gmra.mxu2 %vm789_vm1, %v1084_v15  ;;  %v6423_v2 = vor.u32 %v7692_v63, %v6422_v62  ;;  %v1091_v15 = vrot.slane %v648_v10, 1 }
  0x81   : > { %6338 = vmatmul.msk.bf16.gmra.mxu0 %vm789_vm1, %v710_v16  ;;  %1623 = vmatpush.bf16.msra.mxu3 %v6423_v2  ;;  %v1092_v21 = vsel %vm1071_vm2, %v1089_v55, %v1091_v15 }
  0x8e   : > { %6362 = vmatmul.msk.bf16.gmra.mxu1 %vm789_vm1, %v644_v9  ;;  %v6415_v9 = vor.u32 %v7690_v8, %v6414_v7 }
  0x8f   : > { %6389 = vmatmul.msk.bf16.gmra.mxu2 %vm789_vm1, %v1086_v25 }
  0x90   : > { %1624 = vmatpush.bf16.msra.mxu3 %v6415_v9 }
  0x91   : > { %6339 = vmatmul.msk.bf16.gmra.mxu0 %vm789_vm1, %v718_v26 }
  0x9e   : > { %6363 = vmatmul.msk.bf16.gmra.mxu1 %vm789_vm1, %v645_v19  ;;  %v737_v19 = vor.u32 %v735_v12, %v733_v59 }
  0x9f   : > { %6390 = vmatmul.msk.bf16.gmra.mxu2 %vm789_vm1, %v1088_v38 }
  0xa0   : > { %v742_v25 = vsel %vm658_vm3, %v737_v19, %v741_v20 }
  0xa1   : > { %6340 = vmatmul.msk.bf16.gmra.mxu0 %vm789_vm1, %v726_v41 }
  0xab   : > { %v976_v54 = vpop.f32.mrf.mxu1 }
  0xae   : > { %6364 = vmatmul.msk.bf16.gmra.mxu1 %vm789_vm1, %v646_v29  ;;  %v848_v0 = vpop.f32.mrf.mxu0  ;;  %v627_v29 = vld [vmem:[%s8193_s28 + $0xb8] sm:$0xff] }
  0xaf   : > { %6391 = vmatmul.msk.bf16.gmra.mxu2 %vm789_vm1, %v1090_v61  ;;  %v977_v18 = vadd.f32 %v976_v54, %v848_v0  ;;  %v649_v34 = vpack.c.bf16 %v627_v29, %v626_v28  ;;  %v629_v61 = vld [vmem:[%s8193_s28 + $0xc8] sm:$0xff] }
  0xb0   : > { %v8334_v2 = vpack.c.bf16 %v629_v61, %v628_v60 }
  0xb1   : > { %6341 = vmatmul.msk.bf16.gmra.mxu0 %vm789_vm1, %v734_v1  ;;  %v747_v40 = vshll.u32 %v649_v34, 16  ;;  %v1093_v43 = vrot.slane %v649_v34, 1  ;;  %v751_v8 = vshrl.u32 %v649_v34, 16 }
  0xb2   : > { %v1169_v6 = vpop.f32.mrf.mxu2  ;;  %v755_v9 = vshll.u32 %v8334_v2, 16  ;;  %v1095_v12 = vrot.slane %v8334_v2, 1 }
  0xb3   : > { %v978_v3 = vpop.f32.mrf.mxu1  ;;  %v1244_v23 = vadd.f32 %v1169_v6, %v977_v18  ;;  %v749_v49 = vrot.slane %v747_v40, 1  ;;  %v1094_v50 = vsel %vm1071_vm2, %v1091_v15, %v1093_v43 }
  0xb4   : > { %v1096_v18 = vsel %vm1071_vm2, %v1093_v43, %v1095_v12 }
  0xb5   : > { %v1274_v31 = vmax.f32 %v1244_v23, 0.0 }
  0xb6   : > { %v850_v11 = vpop.f32.mrf.mxu0 }
  0xb7   : > { %v979_v16 = vadd.f32 %v978_v3, %v850_v11  ;;  %v1308_v36 = vadd.f32 %v8314_v32, %v1274_v31  ;;  %v7687_v31 = vld [vmem:[%s11048_s2 + $0x64] sm:$0xf] }
  0xba   : > { %v1171_v17 = vpop.f32.mrf.mxu2 }
  0xbb   : > { %v981_v14 = vpop.f32.mrf.mxu1  ;;  %v1245_v22 = vadd.f32 %v1171_v17, %v979_v16  ;;  %v753_v16 = vor.u32 %v751_v8, %v749_v49  ;;  %v757_v17 = vrot.slane %v755_v9, 1  ;;  %v6534_v9 = vld [vmem:[%s11048_s2 + $0x48] sm:$0xf0] }
  0xbd   : > { %v1275_v27 = vmax.f32 %v1245_v22, 0.0 }
  0xbe   : > { %6365 = vmatmul.msk.bf16.gmra.mxu1 %vm789_vm1, %v647_v48  ;;  %v853_v24 = vpop.f32.mrf.mxu0  ;;  %v745_v48 = vor.u32 %v743_v39, %v741_v20  ;;  %v6548_v20 = vld [vmem:[%s11048_s2 + $0x60] sm:$0xf] }
  0xbf   : > { %6392 = vmatmul.msk.bf16.gmra.mxu2 %vm789_vm1, %v1092_v21  ;;  %v982_v33 = vadd.f32 %v981_v14, %v853_v24  ;;  %v1309_v35 = vadd.f32 %v8314_v32, %v1275_v27  ;;  %v7688_v21 = vld [vmem:[%s11048_s2 + $0x64] sm:$0xf0]  ;;  %v631_v27 = vld [vmem:[%s8193_s28 + $0xd8] sm:$0xff] }
  0xc0   : > { %v750_v56 = vsel %vm658_vm3, %v745_v48, %v749_v49  ;;  %v6549_v28 = vor.u32 %v7688_v21, %v6548_v20  ;;  %v7701_v48 = vld [vmem:[%s11048_s2 + $0xd4] sm:$0xf]  ;;  %v6464_v49 = vld [vmem:[%s11048_s2 + $0xd8] sm:$0xf0] }
  0xc1   : > { %6342 = vmatmul.msk.bf16.gmra.mxu0 %vm789_vm1, %v742_v25  ;;  %v8318_v44 = vpack.c.bf16 %v1309_v35, %v1308_v36  ;;  %v758_v25 = vsel %vm658_vm3, %v753_v16, %v757_v17  ;;  %v6448_v20 = vld [vmem:[%s11048_s2 + $0xb8] sm:$0xf0] }
  0xc2   : > { %v1174_v30 = vpop.f32.mrf.mxu2  ;;  %1886 = vmatpush.bf16.msrb.mxu1 %v6549_v28  ;;  %v7680_v28 = vld [vmem:[%s11048_s2 + $0x24] sm:$0xf0] }
  0xc3   : > { %v983_v26 = vpop.f32.mrf.mxu1  ;;  %v1246_v37 = vadd.f32 %v1174_v30, %v982_v33  ;;  %v1385_v52 = vshll.u32 %v8318_v44, 16  ;;  %v1383_v0 = vshrl.u32 %v8318_v44, 16  ;;  %v6550_v33 = vld [vmem:[%s11048_s2 + $0x68] sm:$0xf0] }
  0xc4   : > { %v6553_v36 = vor.u32 %v7687_v31, %v6550_v33  ;;  %v632_v31 = vld [vmem:[%s8193_s28 + $0xe0] sm:$0xff]  ;;  %v633_v33 = vld [vmem:[%s8193_s28 + $0xe8] sm:$0xff] }
  0xc5   : > { %v1276_v46 = vmax.f32 %v1246_v37, 0.0  ;;  %v1387_v59 = vrot.slane %v1385_v52, 1  ;;  %v6540_v37 = vld [vmem:[%s11048_s2 + $0x50] sm:$0xf]  ;;  %v6542_v52 = vld [vmem:[%s11048_s2 + $0x58] sm:$0xf0] }
  0xc6   : > { %v855_v38 = vpop.f32.mrf.mxu0  ;;  %1970 = vmatpush.bf16.msrb.mxu2 %v6553_v36 }
  0xc7   : > { %v984_v41 = vadd.f32 %v983_v26, %v855_v38  ;;  %v1310_v53 = vadd.f32 %v8314_v32, %v1276_v46  ;;  %v1388_v3 = vor.u32 %v1387_v59, %v1383_v0  ;;  %v630_v26 = vld [vmem:[%s8193_s28 + $0xd0] sm:$0xff]  ;;  %v7686_v38 = vld [vmem:[%s11048_s2 + $0x54] sm:$0xf0]  ;;  %v7684_v59 = vld [vmem:[%s11048_s2 + $0x44] sm:$0xf0]  ;;  %s6251_s28 = scalar_lea.hbm %s11021_s19, %s7666_s24 }
  0xc8   : > { %v8368_v35 = vpack.c.bf16 %v631_v27, %v630_v26  ;;  %s6255_s0 = sshll.u32 %s6251_s28, 4  ;;  %s6256_s0 = int_to_ptr.hbm [resolvable:$true] %s6255_s0 }
  0xc9   : > { %s7960_s25 = sshra.s32 %s6256_s0, 4  ;;  %s7961_s25 = int_to_ptr.hbm [resolvable:$true] %s7960_s25 }
  0xca   : > { %v1176_v45 = vpop.f32.mrf.mxu2  ;;  %v763_v43 = vshll.u32 %v8368_v35, 16  ;;  %p7967_p0 = scmp.lt.s32.totalorder %s7961_s25, %s11021_s19 }
  0xcb   : > { %v986_v42 = vpop.f32.mrf.mxu1  ;;  %v1247_v47 = vadd.f32 %v1176_v45, %v984_v41 }
  0xcd   : > { %v1277_v51 = vmax.f32 %v1247_v47, 0.0  ;;  %v759_v47 = vshrl.u32 %v8334_v2, 16 }
  0xce   : > { %6366 = vmatmul.msk.bf16.gmra.mxu1 %vm789_vm1, %v648_v10  ;;  %v858_v55 = vpop.f32.mrf.mxu0 }
  0xcf   : > { %v1311_v54 = vadd.f32 %v8314_v32, %v1277_v51  ;;  %6393 = vmatmul.msk.bf16.gmra.mxu2 %vm789_vm1, %v1094_v50  ;;  %v987_v63 = vadd.f32 %v986_v42, %v858_v55  ;;  %v6541_v42 = vor.u32 %v7686_v38, %v6540_v37  ;;  %v6467_v50 = vor.u32 %v7701_v48, %v6464_v49  ;;  %v7685_v51 = vld [vmem:[%s11048_s2 + $0x54] sm:$0xf]  ;;  %v7695_v37 = vld [vmem:[%s11048_s2 + $0xa4] sm:$0xf]  ;;  %v6440_v38 = vld [vmem:[%s11048_s2 + $0xa8] sm:$0xf0] }
  0xd1   : > { %v8327_v58 = vpack.c.bf16 %v1311_v54, %v1310_v53  ;;  %6343 = vmatmul.msk.bf16.gmra.mxu0 %vm789_vm1, %v750_v56  ;;  %1887 = vmatpush.bf16.msrb.mxu1 %v6541_v42  ;;  %v6532_v53 = vld [vmem:[%s11048_s2 + $0x40] sm:$0xf]  ;;  %v6518_v42 = vld [vmem:[%s11048_s2 + $0x28] sm:$0xf0] }
  0xd2   : > { %v1179_v62 = vpop.f32.mrf.mxu2  ;;  %1702 = vmatpush.bf16.msrb.mxu0 %v6467_v50  ;;  %v6533_v0 = vor.u32 %v7684_v59, %v6532_v53  ;;  %v6432_v59 = vld [vmem:[%s11048_s2 + $0x98] sm:$0xf0] }
  0xd3   : > { %v988_v57 = vpop.f32.mrf.mxu1  ;;  %v1390_v1 = vshll.u32 %v8327_v58, 16  ;;  %v1248_v5 = vadd.f32 %v1179_v62, %v987_v63  ;;  %v1394_v40 = vshrl.u32 %v8327_v58, 16  ;;  %v1097_v62 = vrot.slane %v8368_v35, 1 }
  0xd4   : > { %v8407_v63 = vrot.slane %v763_v43, 1  ;;  %v6508_v43 = vld [vmem:[%s11048_s2 + $0x10] sm:$0xf] }
  0xd5   : > { %v1392_v4 = vrot.slane %v1390_v1, 1  ;;  %v1278_v14 = vmax.f32 %v1248_v5, 0.0  ;;  %v7699_v1 = vld [vmem:[%s11048_s2 + $0xc4] sm:$0xf]  ;;  %1888 = vmatpush.bf16.msrb.mxu1 %v6533_v0  ;;  %v6500_v0 = vld [vmem:[%s11048_s2] sm:$0xf] }
  0xd6   : > { %v860_v6 = vpop.f32.mrf.mxu0 }
  0xd7   : > { %v8337_v7 = vsel %vm658_vm3, %v1388_v3, %v1392_v4  ;;  %v989_v10 = vadd.f32 %v988_v57, %v860_v6  ;;  %v1312_v22 = vadd.f32 %v8314_v32, %v1278_v14  ;;  %v1396_v45 = vor.u32 %v1394_v40, %v1392_v4  ;;  %v6456_v3 = vld [vmem:[%s11048_s2 + $0xc8] sm:$0xf0]  ;;  %v7683_v4 = vld [vmem:[%s11048_s2 + $0x44] sm:$0xf] }
  0xd8   : > { %6468 = vmatmul.msk.bf16.vlgmr.msra.gmra.mxu3 %vm1571_vm4, %v8337_v7  ;;  %v6545_v57 = vor.u32 %v7685_v51, %v6542_v52  ;;  %v761_v6 = vor.u32 %v759_v47, %v757_v17  ;;  %v6459_v8 = vor.u32 %v7699_v1, %v6456_v3  ;;  %v1098_v17 = vsel %vm1071_vm2, %v1095_v12, %v1097_v62  ;;  %v6526_v12 = vld [vmem:[%s11048_s2 + $0x38] sm:$0xf0] }
  0xd9   : > { %v8482_v51 = vpack.c.bf16 %v633_v33, %v632_v31 }
  0xda   : > { %v1181_v13 = vpop.f32.mrf.mxu2  ;;  %1971 = vmatpush.bf16.msrb.mxu2 %v6545_v57  ;;  %1703 = vmatpush.bf16.msrb.mxu0 %v6459_v8  ;;  %v766_v26 = vsel %vm658_vm3, %v761_v6, %v8407_v63  ;;  %v7693_v57 = vld [vmem:[%s11048_s2 + $0x94] sm:$0xf]  ;;  %v7676_v8 = vld [vmem:[%s11048_s2 + $0x4] sm:$0xf0] }
  0xdb   : > { %v991_v11 = vpop.f32.mrf.mxu1  ;;  %v1249_v15 = vadd.f32 %v1181_v13, %v989_v10  ;;  %v6524_v10 = vld [vmem:[%s11048_s2 + $0x30] sm:$0xf] }
  0xdd   : > { %v1279_v19 = vmax.f32 %v1249_v15, 0.0  ;;  %v6537_v15 = vor.u32 %v7683_v4, %v6534_v9 }
  0xde   : > { %6367 = vmatmul.msk.bf16.gmra.mxu1 %vm789_vm1, %v649_v34  ;;  %v863_v24 = vpop.f32.mrf.mxu0 }
  0xdf   : > { %v1313_v23 = vadd.f32 %v8314_v32, %v1279_v19  ;;  %6394 = vmatmul.msk.bf16.gmra.mxu2 %vm789_vm1, %v1096_v18  ;;  %v992_v39 = vadd.f32 %v991_v11, %v863_v24  ;;  %v7682_v11 = vld [vmem:[%s11048_s2 + $0x34] sm:$0xf0]  ;;  %v7697_v19 = vld [vmem:[%s11048_s2 + $0xb4] sm:$0xf] }
  0xe0   : > { %v6525_v16 = vor.u32 %v7682_v11, %v6524_v10  ;;  %1972 = vmatpush.bf16.msrb.mxu2 %v6537_v15  ;;  %v6451_v21 = vor.u32 %v7697_v19, %v6448_v20  ;;  %v1099_v11 = vrot.slane %v8482_v51, 1  ;;  %v6424_v15 = vld [vmem:[%s11048_s2 + $0x88] sm:$0xf0] }
  0xe1   : > { %v8359_v30 = vpack.c.bf16 %v1313_v23, %v1312_v22  ;;  %6344 = vmatmul.msk.bf16.gmra.mxu0 %vm789_vm1, %v758_v25  ;;  %v6516_v22 = vld [vmem:[%s11048_s2 + $0x20] sm:$0xf]  ;;  %v6502_v20 = vld [vmem:[%s11048_s2 + $0x8] sm:$0xf0] }
  0xe2   : > { %v1184_v34 = vpop.f32.mrf.mxu2  ;;  %1889 = vmatpush.bf16.msrb.mxu1 %v6525_v16  ;;  %1704 = vmatpush.bf16.msrb.mxu0 %v6451_v21  ;;  %v7675_v16 = vld [vmem:[%s11048_s2 + $0x4] sm:$0xf] }
  0xe3   : > { %v993_v29 = vpop.f32.mrf.mxu1  ;;  %v1398_v41 = vshll.u32 %v8359_v30, 16  ;;  %v1250_v54 = vadd.f32 %v1184_v34, %v992_v39  ;;  %v6517_v34 = vor.u32 %v7680_v28, %v6516_v22  ;;  %v7679_v39 = vld [vmem:[%s11048_s2 + $0x24] sm:$0xf]  ;;  %v1402_v48 = vshrl.u32 %v8359_v30, 16 }
  0xe4   : > { %v6521_v50 = vor.u32 %v7679_v39, %v6518_v42  ;;  %v6505_v22 = vor.u32 %v7675_v16, %v6502_v20 }
  0xe5   : > { %v8379_v46 = vrot.slane %v1398_v41, 1  ;;  %v1280_v13 = vmax.f32 %v1250_v54, 0.0  ;;  %v6443_v41 = vor.u32 %v7695_v37, %v6440_v38 }
  0xe6   : > { %v865_v55 = vpop.f32.mrf.mxu0  ;;  %1890 = vmatpush.bf16.msrb.mxu1 %v6517_v34 }
  0xe7   : > { %v8399_v56 = vsel %vm658_vm3, %v1396_v45, %v8379_v46  ;;  %v994_v60 = vadd.f32 %v993_v29, %v865_v55  ;;  %v1314_v23 = vadd.f32 %v8314_v32, %v1280_v13  ;;  %v7678_v45 = vld [vmem:[%s11048_s2 + $0x14] sm:$0xf0]  ;;  %1705 = vmatpush.bf16.msrb.mxu0 %v6443_v41  ;;  %v1404_v53 = vor.u32 %v1402_v48, %v8379_v46  ;;  %v6510_v46 = vld [vmem:[%s11048_s2 + $0x18] sm:$0xf0] }
  0xe8   : > { %6469 = vmatmul.msk.bf16.gmra.mxu3 %vm1571_vm4, %v8399_v56  ;;  %v6509_v52 = vor.u32 %v7678_v45, %v6508_v43  ;;  %v767_v55 = vshrl.u32 %v8368_v35, 16  ;;  %v6501_v13 = vor.u32 %v7676_v8, %v6500_v0 }
  0xea   : > { %v1186_v5 = vpop.f32.mrf.mxu2  ;;  %1891 = vmatpush.bf16.msrb.mxu1 %v6509_v52 }
  0xeb   : > { %v996_v61 = vpop.f32.mrf.mxu1  ;;  %v1251_v14 = vadd.f32 %v1186_v5, %v994_v60  ;;  %v6435_v60 = vor.u32 %v7693_v57, %v6432_v59  ;;  %v771_v5 = vshll.u32 %v8482_v51, 16 }
  0xed   : > { %v1281_v18 = vmax.f32 %v1251_v14, 0.0  ;;  %1706 = vmatpush.bf16.msrb.mxu0 %v6435_v60  ;;  %v7691_v14 = vld [vmem:[%s11048_s2 + $0x84] sm:$0xf] }
  0xee   : > { %6368 = vmatmul.msk.bf16.gmra.mxu1 %vm789_vm1, %v8334_v2  ;;  %v7681_v2 = vld [vmem:[%s11048_s2 + $0x34] sm:$0xf]  ;;  %v868_v25 = vpop.f32.mrf.mxu0  ;;  %v6427_v19 = vor.u32 %v7691_v14, %v6424_v15 }
  0xef   : > { %v1315_v24 = vadd.f32 %v8314_v32, %v1281_v18  ;;  %6395 = vmatmul.msk.bf16.gmra.mxu2 %vm789_vm1, %v1098_v17  ;;  %v6529_v27 = vor.u32 %v7681_v2, %v6526_v12  ;;  %v997_v47 = vadd.f32 %v996_v61, %v868_v25  ;;  %v7677_v61 = vld [vmem:[%s11048_s2 + $0x14] sm:$0xf]  ;;  %v769_v18 = vor.u32 %v767_v55, %v8407_v63  ;;  %v6416_v25 = vld [vmem:[%s11048_s2 + $0x78] sm:$0xf0] }
  0xf0   : > { %v6513_v6 = vor.u32 %v7677_v61, %v6510_v46  ;;  %1892 = vmatpush.bf16.msrb.mxu1 %v6501_v13  ;;  %v773_v12 = vrot.slane %v771_v5, 1  ;;  %v7689_v63 = vld [vmem:[%s11048_s2 + $0x74] sm:$0xf] }
  0xf1   : > { %v8459_v36 = vpack.c.bf16 %v1315_v24, %v1314_v23  ;;  %1973 = vmatpush.bf16.msrb.mxu2 %v6529_v27  ;;  %6345 = vmatmul.msk.bf16.gmra.mxu0 %vm789_vm1, %v766_v26  ;;  %v1100_v23 = vsel %vm1071_vm2, %v1097_v62, %v1099_v11  ;;  %v6419_v26 = vor.u32 %v7689_v63, %v6416_v25 }
  0xf2   : > { %v1189_v40 = vpop.f32.mrf.mxu2  ;;  %1707 = vmatpush.bf16.msrb.mxu0 %v6427_v19  ;;  %v774_v62 = vsel %vm658_vm3, %v769_v18, %v773_v12 }
  0xf3   : > { %v998_v29 = vpop.f32.mrf.mxu1  ;;  %v1406_v49 = vshll.u32 %v8459_v36, 16  ;;  %v1252_v1 = vadd.f32 %v1189_v40, %v997_v47  ;;  %v1410_v37 = vshrl.u32 %v8459_v36, 16 }
  0xf5   : > { %v1408_v54 = vrot.slane %v1406_v49, 1  ;;  %1974 = vmatpush.bf16.msrb.mxu2 %v6521_v50  ;;  %v1282_v21 = vmax.f32 %v1252_v1, 0.0  ;;  %v775_v49 = vshrl.u32 %v8482_v51, 16 }
  0xf6   : > { %v870_v3 = vpop.f32.mrf.mxu0  ;;  %1708 = vmatpush.bf16.msrb.mxu0 %v6419_v26 }
  0xf7   : > { %v8502_v4 = vsel %vm658_vm3, %v1404_v53, %v1408_v54  ;;  %v999_v9 = vadd.f32 %v998_v29, %v870_v3  ;;  %v1316_v27 = vadd.f32 %v8314_v32, %v1282_v21  ;;  %v1412_v39 = vor.u32 %v1410_v37, %v1408_v54 }
  0xf8   : > { %6470 = vmatmul.msk.bf16.gmra.mxu3 %vm1571_vm4, %v8502_v4  ;;  %v777_v54 = vor.u32 %v775_v49, %v773_v12 }
  0xf9   : > { %1975 = vmatpush.bf16.msrb.mxu2 %v6513_v6 }
  0xfa   : > { %v1191_v17 = vpop.f32.mrf.mxu2 }
  0xfb   : > { %v1001_v10 = vpop.f32.mrf.mxu1  ;;  %v1253_v2 = vadd.f32 %v1191_v17, %v999_v9 }
  0xfd   : > { %v1283_v24 = vmax.f32 %v1253_v2, 0.0  ;;  %1976 = vmatpush.bf16.msrb.mxu2 %v6505_v22 }
  0xfe   : > { %6369 = vmatmul.msk.bf16.gmra.mxu1 %vm789_vm1, %v8368_v35  ;;  %v873_v35 = vpop.f32.mrf.mxu0 }
  0xff   : > { %v1317_v28 = vadd.f32 %v8314_v32, %v1283_v24  ;;  %6396 = vmatmul.msk.bf16.gmra.mxu2 %vm789_vm1, %v1100_v23  ;;  %v1002_v34 = vadd.f32 %v1001_v10, %v873_v35 }
 0x101   : > { %v8539_v31 = vpack.c.bf16 %v1317_v28, %v1316_v27  ;;  %6346 = vmatmul.msk.bf16.gmra.mxu0 %vm789_vm1, %v774_v62 }
 0x102   : > { %v1194_v33 = vpop.f32.mrf.mxu2 }
 0x103   : > { %v1003_v29 = vpop.f32.mrf.mxu1  ;;  %v1414_v38 = vshll.u32 %v8539_v31, 16  ;;  %v1254_v41 = vadd.f32 %v1194_v33, %v1002_v34  ;;  %v1418_v1 = vshrl.u32 %v8539_v31, 16 }
 0x105   : > { %v1416_v40 = vrot.slane %v1414_v38, 1  ;;  %v1284_v50 = vmax.f32 %v1254_v41, 0.0 }
 0x106   : > { %v875_v42 = vpop.f32.mrf.mxu0 }
 0x107   : > { %v8545_v43 = vsel %vm658_vm3, %v1412_v39, %v1416_v40  ;;  %v1004_v45 = vadd.f32 %v1003_v29, %v875_v42  ;;  %v1318_v55 = vadd.f32 %v8314_v32, %v1284_v50  ;;  %v1420_v3 = vor.u32 %v1418_v1, %v1416_v40 }
 0x108   : > { %6471 = vmatmul.msk.bf16.gmra.mxu3 %vm1571_vm4, %v8545_v43 }
 0x10a   : > { %v1196_v48 = vpop.f32.mrf.mxu2 }
 0x10b   : > { %v1006_v47 = vpop.f32.mrf.mxu1  ;;  %v1255_v52 = vadd.f32 %v1196_v48, %v1004_v45 }
 0x10d   : > { %v1285_v53 = vmax.f32 %v1255_v52, 0.0 }
 0x10e   : > { %6370 = vmatmul.msk.bf16.gmra.mxu1 %vm789_vm1, %v8482_v51  ;;  %v878_v59 = vpop.f32.mrf.mxu0 }
 0x10f   : > { %v1319_v57 = vadd.f32 %v8314_v32, %v1285_v53  ;;  %6397 = vmatmul.msk.bf16.gmra.mxu2 %vm789_vm1, %v1099_v11  ;;  %v1007_v0 = vadd.f32 %v1006_v47, %v878_v59 }
 0x111   : > { %v8555_v61 = vpack.c.bf16 %v1319_v57, %v1318_v55  ;;  %6347 = vmatmul.msk.bf16.gmra.mxu0 %vm789_vm1, %v777_v54 }
 0x112   : > { %v1199_v46 = vpop.f32.mrf.mxu2 }
 0x113   : > { %v1008_v60 = vpop.f32.mrf.mxu1  ;;  %v1422_v51 = vshll.u32 %v8555_v61, 16  ;;  %v1256_v6 = vadd.f32 %v1199_v46, %v1007_v0  ;;  %v1426_v22 = vshrl.u32 %v8555_v61, 16 }
 0x115   : > { %v1424_v5 = vrot.slane %v1422_v51, 1  ;;  %v1286_v14 = vmax.f32 %v1256_v6, 0.0 }
 0x116   : > { %v880_v8 = vpop.f32.mrf.mxu0 }
 0x117   : > { %v8561_v9 = vsel %vm658_vm3, %v1420_v3, %v1424_v5  ;;  %v1009_v10 = vadd.f32 %v1008_v60, %v880_v8  ;;  %v1320_v17 = vadd.f32 %v8314_v32, %v1286_v14  ;;  %v1428_v24 = vor.u32 %v1426_v22, %v1424_v5 }
 0x118   : > { %6472 = vmatmul.msk.bf16.gmra.mxu3 %vm1571_vm4, %v8561_v9 }
 0x11a   : > { %v1201_v13 = vpop.f32.mrf.mxu2 }
 0x11b   : > { %v1011_v11 = vpop.f32.mrf.mxu1  ;;  %v1257_v15 = vadd.f32 %v1201_v13, %v1009_v10 }
 0x11d   : > { %v1287_v16 = vmax.f32 %v1257_v15, 0.0 }
 0x11e   : > { %6554 = vmatmul.msk.bf16.vlgmr.msrb.gmra.mxu1 %vm1571_vm4, %v8318_v44  ;;  %v883_v19 = vpop.f32.mrf.mxu0 }
 0x11f   : > { %v1321_v18 = vadd.f32 %v8314_v32, %v1287_v16  ;;  %6569 = vmatmul.msk.bf16.vlgmr.msrb.gmra.mxu2 %vm1571_vm4, %v8318_v44  ;;  %v1012_v12 = vadd.f32 %v1011_v11, %v883_v19 }
 0x121   : > { %v8571_v21 = vpack.c.bf16 %v1321_v18, %v1320_v17  ;;  %6483 = vmatmul.msk.bf16.vlgmr.msrb.gmra.mxu0 %vm1571_vm4, %v8337_v7 }
 0x122   : > { %v1204_v2 = vpop.f32.mrf.mxu2 }
 0x123   : > { %v1013_v20 = vpop.f32.mrf.mxu1  ;;  %v1430_v23 = vshll.u32 %v8571_v21, 16  ;;  %v1258_v25 = vadd.f32 %v1204_v2, %v1012_v12  ;;  %v1434_v45 = vshrl.u32 %v8571_v21, 16 }
 0x125   : > { %v1432_v63 = vrot.slane %v1430_v23, 1  ;;  %v1288_v29 = vmax.f32 %v1258_v25, 0.0 }
 0x126   : > { %v885_v26 = vpop.f32.mrf.mxu0 }
 0x127   : > { %v8578_v27 = vsel %vm658_vm3, %v1428_v24, %v1432_v63  ;;  %v1014_v28 = vadd.f32 %v1013_v20, %v885_v26  ;;  %v1322_v34 = vadd.f32 %v8314_v32, %v1288_v29  ;;  %v1436_v48 = vor.u32 %v1434_v45, %v1432_v63 }
 0x128   : > { %6473 = vmatmul.msk.bf16.gmra.mxu3 %vm1571_vm4, %v8578_v27 }
 0x12a   : > { %v1206_v62 = vpop.f32.mrf.mxu2 }
 0x12b   : > { %v1016_v35 = vpop.f32.mrf.mxu1  ;;  %v1259_v7 = vadd.f32 %v1206_v62, %v1014_v28 }
 0x12d   : > { %v1289_v33 = vmax.f32 %v1259_v7, 0.0 }
 0x12e   : > { %6555 = vmatmul.msk.bf16.gmra.mxu1 %vm1571_vm4, %v8327_v58  ;;  %v888_v38 = vpop.f32.mrf.mxu0 }
 0x12f   : > { %v1323_v37 = vadd.f32 %v8314_v32, %v1289_v33  ;;  %6570 = vmatmul.msk.bf16.gmra.mxu2 %vm1571_vm4, %v8327_v58  ;;  %v1017_v42 = vadd.f32 %v1016_v35, %v888_v38 }
 0x131   : > { %v8588_v40 = vpack.c.bf16 %v1323_v37, %v1322_v34  ;;  %6484 = vmatmul.msk.bf16.gmra.mxu0 %vm1571_vm4, %v8399_v56 }
 0x132   : > { %v1209_v41 = vpop.f32.mrf.mxu2 }
 0x133   : > { %v1018_v39 = vpop.f32.mrf.mxu1  ;;  %v1438_v47 = vshll.u32 %v8588_v40, 16  ;;  %v1260_v50 = vadd.f32 %v1209_v41, %v1017_v42  ;;  %v1442_v8 = vshrl.u32 %v8588_v40, 16 }
 0x135   : > { %v1440_v49 = vrot.slane %v1438_v47, 1  ;;  %v1290_v59 = vmax.f32 %v1260_v50, 0.0 }
 0x136   : > { %v890_v52 = vpop.f32.mrf.mxu0 }
 0x137   : > { %v8595_v53 = vsel %vm658_vm3, %v1436_v48, %v1440_v49  ;;  %v1019_v54 = vadd.f32 %v1018_v39, %v890_v52  ;;  %v1324_v46 = vadd.f32 %v8314_v32, %v1290_v59  ;;  %v1444_v11 = vor.u32 %v1442_v8, %v1440_v49 }
 0x138   : > { %6474 = vmatmul.msk.bf16.gmra.mxu3 %vm1571_vm4, %v8595_v53 }
 0x13a   : > { %v1211_v57 = vpop.f32.mrf.mxu2 }
 0x13b   : > { %v1021_v55 = vpop.f32.mrf.mxu1  ;;  %v1261_v56 = vadd.f32 %v1211_v57, %v1019_v54 }
 0x13d   : > { %v1291_v60 = vmax.f32 %v1261_v56, 0.0 }
 0x13e   : > { %6556 = vmatmul.msk.bf16.gmra.mxu1 %vm1571_vm4, %v8359_v30  ;;  %v893_v1 = vpop.f32.mrf.mxu0 }
 0x13f   : > { %v1325_v0 = vadd.f32 %v8314_v32, %v1291_v60  ;;  %6571 = vmatmul.msk.bf16.gmra.mxu2 %vm1571_vm4, %v8359_v30  ;;  %v1022_v6 = vadd.f32 %v1021_v55, %v893_v1 }
 0x141   : > { %v8605_v3 = vpack.c.bf16 %v1325_v0, %v1324_v46  ;;  %6485 = vmatmul.msk.bf16.gmra.mxu0 %vm1571_vm4, %v8502_v4 }
 0x142   : > { %v1214_v5 = vpop.f32.mrf.mxu2 }
 0x143   : > { %v1023_v51 = vpop.f32.mrf.mxu1  ;;  %v1446_v10 = vshll.u32 %v8605_v3, 16  ;;  %v1262_v14 = vadd.f32 %v1214_v5, %v1022_v6  ;;  %v1450_v28 = vshrl.u32 %v8605_v3, 16 }
 0x145   : > { %v1448_v13 = vrot.slane %v1446_v10, 1  ;;  %v1292_v20 = vmax.f32 %v1262_v14, 0.0 }
 0x146   : > { %v895_v15 = vpop.f32.mrf.mxu0 }
 0x147   : > { %v8612_v16 = vsel %vm658_vm3, %v1444_v11, %v1448_v13  ;;  %v1024_v17 = vadd.f32 %v1023_v51, %v895_v15  ;;  %v1326_v12 = vadd.f32 %v8314_v32, %v1292_v20  ;;  %v1452_v62 = vor.u32 %v1450_v28, %v1448_v13 }
 0x148   : > { %6475 = vmatmul.msk.bf16.gmra.mxu3 %vm1571_vm4, %v8612_v16 }
 0x14a   : > { %v1216_v19 = vpop.f32.mrf.mxu2 }
 0x14b   : > { %v1026_v18 = vpop.f32.mrf.mxu1  ;;  %v1263_v4 = vadd.f32 %v1216_v19, %v1024_v17 }
 0x14d   : > { %v1293_v2 = vmax.f32 %v1263_v4, 0.0 }
 0x14e   : > { %6557 = vmatmul.msk.bf16.gmra.mxu1 %vm1571_vm4, %v8459_v36  ;;  %v898_v23 = vpop.f32.mrf.mxu0 }
 0x14f   : > { %v1327_v22 = vadd.f32 %v8314_v32, %v1293_v2  ;;  %6572 = vmatmul.msk.bf16.gmra.mxu2 %vm1571_vm4, %v8459_v36  ;;  %v1027_v26 = vadd.f32 %v1026_v18, %v898_v23 }
 0x151   : > { %v8622_v63 = vpack.c.bf16 %v1327_v22, %v1326_v12  ;;  %6486 = vmatmul.msk.bf16.gmra.mxu0 %vm1571_vm4, %v8545_v43 }
 0x152   : > { %v1219_v25 = vpop.f32.mrf.mxu2 }
 0x153   : > { %v1028_v24 = vpop.f32.mrf.mxu1  ;;  %v1454_v35 = vshll.u32 %v8622_v63, 16  ;;  %v1264_v7 = vadd.f32 %v1219_v25, %v1027_v26  ;;  %v1458_v59 = vshrl.u32 %v8622_v63, 16 }
 0x155   : > { %v1456_v29 = vrot.slane %v1454_v35, 1  ;;  %v1294_v41 = vmax.f32 %v1264_v7, 0.0 }
 0x156   : > { %v900_v33 = vpop.f32.mrf.mxu0 }
 0x157   : > { %v8629_v34 = vsel %vm658_vm3, %v1452_v62, %v1456_v29  ;;  %v1029_v37 = vadd.f32 %v1028_v24, %v900_v33  ;;  %v1328_v47 = vadd.f32 %v8314_v32, %v1294_v41  ;;  %v1460_v60 = vor.u32 %v1458_v59, %v1456_v29 }
 0x158   : > { %6476 = vmatmul.msk.bf16.gmra.mxu3 %vm1571_vm4, %v8629_v34 }
 0x15a   : > { %v1221_v39 = vpop.f32.mrf.mxu2 }
 0x15b   : > { %v1031_v38 = vpop.f32.mrf.mxu1  ;;  %v1265_v43 = vadd.f32 %v1221_v39, %v1029_v37  ;;  %v8633_v42 = vpop.f32.mrf.mxu3 }
 0x15d   : > { %v1295_v45 = vmax.f32 %v1265_v43, 0.0 }
 0x15e   : > { %6558 = vmatmul.msk.bf16.gmra.mxu1 %vm1571_vm4, %v8539_v31  ;;  %v903_v49 = vpop.f32.mrf.mxu0 }
 0x15f   : > { %v1329_v48 = vadd.f32 %v8314_v32, %v1295_v45  ;;  %6573 = vmatmul.msk.bf16.gmra.mxu2 %vm1571_vm4, %v8539_v31  ;;  %v1032_v55 = vadd.f32 %v1031_v38, %v903_v49 }
 0x161   : > { %v8641_v52 = vpack.c.bf16 %v1329_v48, %v1328_v47  ;;  %6487 = vmatmul.msk.bf16.gmra.mxu0 %vm1571_vm4, %v8561_v9 }
 0x162   : > { %v1224_v54 = vpop.f32.mrf.mxu2 }
 0x163   : > { %v1033_v50 = vpop.f32.mrf.mxu1  ;;  %v8645_v57 = vpop.f32.mrf.mxu3  ;;  %v1462_v56 = vshll.u32 %v8641_v52, 16  ;;  %v1266_v0 = vadd.f32 %v1224_v54, %v1032_v55  ;;  %v1466_v12 = vshrl.u32 %v8641_v52, 16 }
 0x165   : > { %v1464_v46 = vrot.slane %v1462_v56, 1  ;;  %v1296_v8 = vmax.f32 %v1266_v0, 0.0 }
 0x166   : > { %v905_v1 = vpop.f32.mrf.mxu0 }
 0x167   : > { %v8650_v51 = vsel %vm658_vm3, %v1460_v60, %v1464_v46  ;;  %v1034_v5 = vadd.f32 %v1033_v50, %v905_v1  ;;  %v1330_v14 = vadd.f32 %v8314_v32, %v1296_v8  ;;  %v1468_v23 = vor.u32 %v1466_v12, %v1464_v46 }
 0x168   : > { %6477 = vmatmul.msk.bf16.gmra.mxu3 %vm1571_vm4, %v8650_v51 }
 0x16a   : > { %v1226_v9 = vpop.f32.mrf.mxu2 }
 0x16b   : > { %v1036_v6 = vpop.f32.mrf.mxu1  ;;  %v1267_v10 = vadd.f32 %v1226_v9, %v1034_v5  ;;  %v8654_v11 = vpop.f32.mrf.mxu3  ;;  %v6648_v5 = vld [vmem:[%s11048_s2 + $0x140] sm:$0xf] }
 0x16d   : > { %v1297_v13 = vmax.f32 %v1267_v10, 0.0 }
 0x16e   : > { %6559 = vmatmul.msk.bf16.gmra.mxu1 %vm1571_vm4, %v8555_v61  ;;  %v908_v17 = vpop.f32.mrf.mxu0 }
 0x16f   : > { %v1331_v15 = vadd.f32 %v8314_v32, %v1297_v13  ;;  %6574 = vmatmul.msk.bf16.gmra.mxu2 %vm1571_vm4, %v8555_v61  ;;  %v1037_v4 = vadd.f32 %v1036_v6, %v908_v17  ;;  %v7716_v6 = vld [vmem:[%s11048_s2 + $0x144] sm:$0xf0]  ;;  %v7714_v17 = vld [vmem:[%s11048_s2 + $0x134] sm:$0xf0] }
 0x170   : > { %v6649_v13 = vor.u32 %v7716_v6, %v6648_v5  ;;  %v6608_v6 = vld [vmem:[%s11048_s2 + $0xf0] sm:$0xf] }
 0x171   : > { %v8662_v19 = vpack.c.bf16 %v1331_v15, %v1330_v14  ;;  %6488 = vmatmul.msk.bf16.gmra.mxu0 %vm1571_vm4, %v8578_v27  ;;  %v6640_v15 = vld [vmem:[%s11048_s2 + $0x130] sm:$0xf] }
 0x172   : > { %v1229_v20 = vpop.f32.mrf.mxu2  ;;  %2228 = vmatpush.bf16.msrb.mxu3 %v6649_v13  ;;  %v6641_v12 = vor.u32 %v7714_v17, %v6640_v15 }
 0x173   : > { %v1038_v18 = vpop.f32.mrf.mxu1  ;;  %v8666_v2 = vpop.f32.mrf.mxu3  ;;  %v1470_v22 = vshll.u32 %v8662_v19, 16  ;;  %v1268_v25 = vadd.f32 %v1229_v20, %v1037_v4  ;;  %v1474_v50 = vshrl.u32 %v8662_v19, 16 }
 0x175   : > { %v1472_v24 = vrot.slane %v1470_v22, 1  ;;  %v1298_v29 = vmax.f32 %v1268_v25, 0.0  ;;  %v6632_v25 = vld [vmem:[%s11048_s2 + $0x120] sm:$0xf] }
 0x176   : > { %v910_v26 = vpop.f32.mrf.mxu0  ;;  %2229 = vmatpush.bf16.msrb.mxu3 %v6641_v12  ;;  %v7704_v12 = vld [vmem:[%s11048_s2 + $0xe4] sm:$0xf0] }
 0x177   : > { %v8671_v28 = vsel %vm658_vm3, %v1468_v23, %v1472_v24  ;;  %v1039_v35 = vadd.f32 %v1038_v18, %v910_v26  ;;  %v1332_v38 = vadd.f32 %v8314_v32, %v1298_v29  ;;  %v1476_v55 = vor.u32 %v1474_v50, %v1472_v24  ;;  %v7712_v26 = vld [vmem:[%s11048_s2 + $0x124] sm:$0xf0] }
 0x178   : > { %6478 = vmatmul.msk.bf16.gmra.mxu3 %vm1571_vm4, %v8671_v28 }
 0x17a   : > { %v1231_v27 = vpop.f32.mrf.mxu2 }
 0x17b   : > { %v1041_v62 = vpop.f32.mrf.mxu1  ;;  %v1269_v7 = vadd.f32 %v1231_v27, %v1039_v35  ;;  %v8675_v33 = vpop.f32.mrf.mxu3 }
 0x17d   : > { %v1299_v37 = vmax.f32 %v1269_v7, 0.0  ;;  %v6633_v7 = vor.u32 %v7712_v26, %v6632_v25 }
 0x17e   : > { %6560 = vmatmul.msk.bf16.gmra.mxu1 %vm1571_vm4, %v8571_v21  ;;  %v913_v41 = vpop.f32.mrf.mxu0 }
 0x17f   : > { %v1333_v39 = vadd.f32 %v8314_v32, %v1299_v37  ;;  %6575 = vmatmul.msk.bf16.gmra.mxu2 %vm1571_vm4, %v8571_v21  ;;  %v1042_v48 = vadd.f32 %v1041_v62, %v913_v41  ;;  %2230 = vmatpush.bf16.msrb.mxu3 %v6633_v7 }
 0x181   : > { %v8683_v45 = vpack.c.bf16 %v1333_v39, %v1332_v38  ;;  %6489 = vmatmul.msk.bf16.gmra.mxu0 %vm1571_vm4, %v8595_v53  ;;  %v7710_v39 = vld [vmem:[%s11048_s2 + $0x114] sm:$0xf0] }
 0x182   : > { %v1234_v47 = vpop.f32.mrf.mxu2 }
 0x183   : > { %v1043_v43 = vpop.f32.mrf.mxu1  ;;  %v8687_v49 = vpop.f32.mrf.mxu3  ;;  %v1478_v54 = vshll.u32 %v8683_v45, 16  ;;  %v1270_v56 = vadd.f32 %v1234_v47, %v1042_v48  ;;  %v1482_v27 = vshrl.u32 %v8683_v45, 16 }
 0x185   : > { %v1480_v59 = vrot.slane %v1478_v54, 1  ;;  %v1300_v9 = vmax.f32 %v1270_v56, 0.0  ;;  %v6616_v56 = vld [vmem:[%s11048_s2 + $0x100] sm:$0xf] }
 0x186   : > { %v915_v60 = vpop.f32.mrf.mxu0 }
 0x187   : > { %v8692_v46 = vsel %vm658_vm3, %v1476_v55, %v1480_v59  ;;  %v1044_v0 = vadd.f32 %v1043_v43, %v915_v60  ;;  %v1334_v18 = vadd.f32 %v8314_v32, %v1300_v9  ;;  %v1484_v37 = vor.u32 %v1482_v27, %v1480_v59  ;;  %v7708_v60 = vld [vmem:[%s11048_s2 + $0x104] sm:$0xf0]  ;;  %v7706_v9 = vld [vmem:[%s11048_s2 + $0xf4] sm:$0xf0] }
 0x188   : > { %6479 = vmatmul.msk.bf16.gmra.mxu3 %vm1571_vm4, %v8692_v46  ;;  %v6617_v5 = vor.u32 %v7708_v60, %v6616_v56  ;;  %v6609_v15 = vor.u32 %v7706_v9, %v6608_v6 }
 0x18a   : > { %v1236_v53 = vpop.f32.mrf.mxu2 }
 0x18b   : > { %v1046_v1 = vpop.f32.mrf.mxu1  ;;  %v1271_v8 = vadd.f32 %v1236_v53, %v1044_v0  ;;  %v8702_v10 = vpop.f32.mrf.mxu3 }
 0x18d   : > { %v1301_v14 = vmax.f32 %v1271_v8, 0.0 }
 0x18e   : > { %6561 = vmatmul.msk.bf16.gmra.mxu1 %vm1571_vm4, %v8588_v40  ;;  %v918_v4 = vpop.f32.mrf.mxu0 }
 0x18f   : > { %v1335_v20 = vadd.f32 %v8314_v32, %v1301_v14  ;;  %6576 = vmatmul.msk.bf16.gmra.mxu2 %vm1571_vm4, %v8588_v40  ;;  %v1047_v35 = vadd.f32 %v1046_v1, %v918_v4 }
 0x191   : > { %v8716_v23 = vpack.c.bf16 %v1335_v20, %v1334_v18  ;;  %6490 = vmatmul.msk.bf16.gmra.mxu0 %vm1571_vm4, %v8612_v16  ;;  %v6624_v16 = vld [vmem:[%s11048_s2 + $0x110] sm:$0xf] }
 0x192   : > { %v1239_v24 = vpop.f32.mrf.mxu2  ;;  %v6625_v48 = vor.u32 %v7710_v39, %v6624_v16 }
 0x193   : > { %v1048_v22 = vpop.f32.mrf.mxu1  ;;  %v8726_v62 = vpop.f32.mrf.mxu3  ;;  %v1486_v29 = vshll.u32 %v8716_v23, 16  ;;  %v1272_v41 = vadd.f32 %v1239_v24, %v1047_v35 }
 0x194   : > { %2231 = vmatpush.bf16.msrb.mxu3 %v6625_v48 }
 0x195   : > { %v1488_v38 = vrot.slane %v1486_v29, 1  ;;  %v1302_v0 = vmax.f32 %v1272_v41, 0.0 }
 0x196   : > { %v920_v43 = vpop.f32.mrf.mxu0 }
 0x197   : > { %v8737_v47 = vsel %vm658_vm3, %v1484_v37, %v1488_v38  ;;  %v1049_v50 = vadd.f32 %v1048_v22, %v920_v43  ;;  %v1336_v8 = vadd.f32 %v8314_v32, %v1302_v0 }
 0x198   : > { %6480 = vmatmul.msk.bf16.gmra.mxu3 %vm1571_vm4, %v8737_v47 }
 0x199   : > { %2232 = vmatpush.bf16.msrb.mxu3 %v6617_v5 }
 0x19a   : > { %v1241_v59 = vpop.f32.mrf.mxu2 }
 0x19b   : > { %v1894_v54 = vpop.f32.mrf.mxu1  ;;  %v1273_v1 = vadd.f32 %v1241_v59, %v1049_v50  ;;  %v8750_v53 = vpop.f32.mrf.mxu3 }
 0x19c   : > { %v8742_v55 = vadd.f32 %v1894_v54, %v8633_v42 }
 0x19d   : > { %v1303_v42 = vmax.f32 %v1273_v1, 0.0  ;;  %2233 = vmatpush.bf16.msrb.mxu3 %v6609_v15  ;;  %v2083_v15 = vrot.slane %v8318_v44, 1 }
 0x19e   : > { %6562 = vmatmul.msk.bf16.gmra.mxu1 %vm1571_vm4, %v8605_v3  ;;  %v1710_v14 = vpop.f32.mrf.mxu0 }
 0x19f   : > { %v1337_v13 = vadd.f32 %v8314_v32, %v1303_v42  ;;  %6577 = vmatmul.msk.bf16.gmra.mxu2 %vm1571_vm4, %v8605_v3  ;;  %v6600_v32 = vld [vmem:[%s11048_s2 + $0xe0] sm:$0xf] }
 0x1a0   : > { %v6601_v26 = vor.u32 %v7704_v12, %v6600_v32 }
 0x1a1   : > { %v8764_v18 = vpack.c.bf16 %v1337_v13, %v1336_v8  ;;  %6491 = vmatmul.msk.bf16.gmra.mxu0 %vm1571_vm4, %v8629_v34 }
 0x1a2   : > { %v1978_v4 = vpop.f32.mrf.mxu2  ;;  %2234 = vmatpush.bf16.msrb.mxu3 %v6601_v26 }
 0x1a3   : > { %v1896_v17 = vpop.f32.mrf.mxu1  ;;  %v8777_v22 = vadd.f32 %v1978_v4, %v1710_v14  ;;  %v8779_v24 = vpop.f32.mrf.mxu3  ;;  %v1494_v25 = vshll.u32 %v8764_v18, 16  ;;  %v1498_v59 = vshrl.u32 %v8764_v18, 16  ;;  %v2084_v14 = vrot.slane %v8327_v58, 1 }
 0x1a4   : > { %v8767_v20 = vadd.f32 %v1896_v17, %v8645_v57  ;;  %v1490_v57 = vshrl.u32 %v8716_v23, 16 }
 0x1a5   : > { %v1496_v27 = vrot.slane %v1494_v25, 1  ;;  %v8836_v4 = vsel %vm1071_vm2, %v2083_v15, %v2084_v14  ;;  %v6650_v25 = vld [vmem:[%s11048_s2 + $0x148] sm:$0xf0] }
 0x1a6   : > { %v1492_v35 = vor.u32 %v1490_v57, %v1488_v38  ;;  %v1712_v29 = vpop.f32.mrf.mxu0  ;;  %v7715_v57 = vld [vmem:[%s11048_s2 + $0x144] sm:$0xf] }
 0x1a7   : > { %v8809_v56 = vor.u32 %v1498_v59, %v1496_v27  ;;  %v6653_v26 = vor.u32 %v7715_v57, %v6650_v25  ;;  %v7709_v59 = vld [vmem:[%s11048_s2 + $0x114] sm:$0xf]  ;;  %v7703_v57 = vld [vmem:[%s11048_s2 + $0xe4] sm:$0xf]  ;;  %v6602_v25 = vld [vmem:[%s11048_s2 + $0xe8] sm:$0xf0] }
 0x1a8   : > { %v8784_v34 = vsel %vm658_vm3, %v1492_v35, %v1496_v27 }
 0x1a9   : > { %6481 = vmatmul.msk.bf16.gmra.mxu3 %vm1571_vm4, %v8784_v34  ;;  %2312 = vmatpush.bf16.msra.mxu0 %v6653_v26 }
 0x1aa   : > { %v1980_v16 = vpop.f32.mrf.mxu2 }
 0x1ab   : > { %v1899_v7 = vpop.f32.mrf.mxu1  ;;  %v8791_v39 = vadd.f32 %v1980_v16, %v1712_v29  ;;  %v8793_v41 = vpop.f32.mrf.mxu3  ;;  %v7711_v16 = vld [vmem:[%s11048_s2 + $0x124] sm:$0xf] }
 0x1ac   : > { %v8789_v37 = vadd.f32 %v1899_v7, %v8654_v11 }
 0x1ae   : > { %6563 = vmatmul.msk.bf16.gmra.mxu1 %vm1571_vm4, %v8622_v63  ;;  %v1715_v38 = vpop.f32.mrf.mxu0 }
 0x1af   : > { %6578 = vmatmul.msk.bf16.gmra.mxu2 %vm1571_vm4, %v8622_v63 }
 0x1b1   : > { %6492 = vmatmul.msk.bf16.gmra.mxu0 %vm1571_vm4, %v8650_v51 }
 0x1b2   : > { %v1983_v50 = vpop.f32.mrf.mxu2 }
 0x1b3   : > { %v1901_v43 = vpop.f32.mrf.mxu1  ;;  %v8804_v11 = vadd.f32 %v1983_v50, %v1715_v38  ;;  %v8806_v54 = vpop.f32.mrf.mxu3  ;;  %v6634_v38 = vld [vmem:[%s11048_s2 + $0x128] sm:$0xf0] }
 0x1b4   : > { %v8800_v48 = vadd.f32 %v1901_v43, %v8666_v2  ;;  %v6637_v50 = vor.u32 %v7711_v16, %v6634_v38 }
 0x1b6   : > { %v1717_v60 = vpop.f32.mrf.mxu0 }
 0x1b9   : > { %6482 = vmatmul.msk.bf16.gmra.mxu3 %vm1571_vm4, %v8809_v56 }
 0x1ba   : > { %v1985_v1 = vpop.f32.mrf.mxu2 }
 0x1bb   : > { %v1904_v0 = vpop.f32.mrf.mxu1  ;;  %v8816_v5 = vadd.f32 %v1985_v1, %v1717_v60  ;;  %v8818_v51 = vpop.f32.mrf.mxu3  ;;  %v6626_v60 = vld [vmem:[%s11048_s2 + $0x118] sm:$0xf0]  ;;  %v2088_v1 = vrot.slane %v8459_v36, 1  ;;  %v7705_v36 = vld [vmem:[%s11048_s2 + $0xf4] sm:$0xf] }
 0x1bc   : > { %v8814_v2 = vadd.f32 %v1904_v0, %v8675_v33 }
 0x1be   : > { %6564 = vmatmul.msk.bf16.gmra.mxu1 %vm1571_vm4, %v8641_v52  ;;  %v1720_v42 = vpop.f32.mrf.mxu0 }
 0x1bf   : > { %6579 = vmatmul.msk.bf16.gmra.mxu2 %vm1571_vm4, %v8641_v52 }
 0x1c1   : > { %6493 = vmatmul.msk.bf16.gmra.mxu0 %vm1571_vm4, %v8671_v28  ;;  %v2086_v28 = vrot.slane %v8359_v30, 1  ;;  %v7713_v30 = vld [vmem:[%s11048_s2 + $0x134] sm:$0xf] }
 0x1c2   : > { %v1988_v8 = vpop.f32.mrf.mxu2 }
 0x1c3   : > { %v1906_v6 = vpop.f32.mrf.mxu1  ;;  %v8829_v33 = vadd.f32 %v1988_v8, %v1720_v42  ;;  %v8831_v13 = vpop.f32.mrf.mxu3  ;;  %v8864_v27 = vsel %vm1071_vm2, %v2084_v14, %v2086_v28  ;;  %v6629_v42 = vor.u32 %v7709_v59, %v6626_v60  ;;  %v8908_v14 = vsel %vm1071_vm2, %v2086_v28, %v2088_v1 }
 0x1c4   : > { %v8825_v9 = vadd.f32 %v1906_v6, %v8687_v49  ;;  %v7707_v6 = vld [vmem:[%s11048_s2 + $0x104] sm:$0xf] }
 0x1c6   : > { %v1722_v17 = vpop.f32.mrf.mxu0 }
 0x1c9   : > { %6654 = vmatmul.msk.bf16.vlgmr.msrb.gmra.mxu3 %vm1571_vm4, %v8836_v4 }
 0x1ca   : > { %v1990_v49 = vpop.f32.mrf.mxu2 }
 0x1cb   : > { %v8840_v32 = vadd.f32 %v1990_v49, %v1722_v17  ;;  %v8842_v12 = vpop.f32.mrf.mxu3  ;;  %v6610_v17 = vld [vmem:[%s11048_s2 + $0xf8] sm:$0xf0] }
 0x1cc   : > { %v6613_v28 = vor.u32 %v7705_v36, %v6610_v17 }
 0x1ce   : > { %6565 = vmatmul.msk.bf16.gmra.mxu1 %vm1571_vm4, %v8662_v19  ;;  %v8848_v58 = vpop.f32.mrf.mxu0 }
 0x1cf   : > { %6580 = vmatmul.msk.bf16.gmra.mxu2 %vm1571_vm4, %v8662_v19 }
 0x1d1   : > { %6494 = vmatmul.msk.bf16.gmra.mxu0 %vm1571_vm4, %v8692_v46  ;;  %v6642_v46 = vld [vmem:[%s11048_s2 + $0x138] sm:$0xf0] }
 0x1d2   : > { %v6645_v7 = vor.u32 %v7713_v30, %v6642_v46  ;;  %v6605_v30 = vor.u32 %v7703_v57, %v6602_v25  ;;  %v7724_v57 = vld [vmem:[%s11007_s5 + $0x38] sm:$0xff] }
 0x1d3   : > { %v8852_v44 = vpop.f32.mrf.mxu3  ;;  %2761 = vmatpush.bf16.msra.mxu1 %v7724_v57 }
 0x1d4   : > { %2313 = vmatpush.bf16.msra.mxu0 %v6645_v7  ;;  %v2090_v7 = vrot.slane %v8539_v31, 1 }
 0x1d6   : > { %v8861_v35 = vpop.f32.mrf.mxu0  ;;  %v2091_v38 = vsel %vm1071_vm2, %v2088_v1, %v2090_v7 }
 0x1d8   : > { %2314 = vmatpush.bf16.msra.mxu0 %v6637_v50 }
 0x1d9   : > { %6655 = vmatmul.msk.bf16.gmra.mxu3 %vm1571_vm4, %v8864_v27 }
 0x1db   : > { %v8874_v29 = vpop.f32.mrf.mxu3 }
 0x1dc   : > { %2315 = vmatpush.bf16.msra.mxu0 %v6629_v42  ;;  %v8959_v42 = vpop.f32.mrf.mxu1 }
 0x1de   : > { %6566 = vmatmul.msk.bf16.gmra.mxu1 %vm1571_vm4, %v8683_v45  ;;  %v8886_v43 = vpop.f32.mrf.mxu0 }
 0x1df   : > { %6581 = vmatmul.msk.bf16.gmra.mxu2 %vm1571_vm4, %v8683_v45 }
 0x1e1   : > { %6495 = vmatmul.msk.bf16.gmra.mxu0 %vm1571_vm4, %v8737_v47  ;;  %v6618_v47 = vld [vmem:[%s11048_s2 + $0x108] sm:$0xf0]  ;;  %s7962_s2 = scalar_lea.hbm %s7961_s25, 8 }
 0x1e2   : > { %v6621_v15 = vor.u32 %v7707_v6, %v6618_v47  ;;  %p7963_p11 = scmp.ne.s32.totalorder %s7961_s25, %s7962_s2  ;;  %p7968_p1 = scmp.lt.s32.totalorder %s7966_s26, %s7962_s2 }
 0x1e3   : > { %v8896_v0 = vpop.f32.mrf.mxu3 }
 0x1e4   : > { %2316 = vmatpush.bf16.msra.mxu0 %v6621_v15  ;;  %v8967_v15 = vpop.f32.mrf.mxu1  ;;  %p7964_p12 = pnand %p7963_p11, %p8149_p5  ;;  %p7969_p2 = por %p7968_p1, %p7967_p0 }
 0x1e6   : > { %v8905_v8 = vpop.f32.mrf.mxu0  ;;  %p7965_p13 = pneg %p7964_p12 }
 0x1e8   : > { %2317 = vmatpush.bf16.msra.mxu0 %v6613_v28  ;;  %p7970_p3 = pnand %p7969_p2, %p7965_p13 }
 0x1e9   : > { %6656 = vmatmul.msk.bf16.gmra.mxu3 %vm1571_vm4, %v8908_v14 }
 0x1eb   : > { %v8918_v49 = vpop.f32.mrf.mxu3 }
 0x1ec   : > { %11050 = vst [vmem:[#allocation11_spill] sm:$0xff] %v8918_v49  ;;  %2318 = vmatpush.bf16.msra.mxu0 %v6605_v30  ;;  %v8986_v25 = vpop.f32.mrf.mxu1 }
 0x1ee   : > { %6567 = vmatmul.msk.bf16.gmra.mxu1 %vm1571_vm4, %v8716_v23  ;;  %v8930_v26 = vpop.f32.mrf.mxu0 }
 0x1ef   : > { %6582 = vmatmul.msk.bf16.gmra.mxu2 %vm1571_vm4, %v8716_v23  ;;  %11051 = vst [vmem:[#allocation12_spill] sm:$0xff] %v8930_v26 }
 0x1f1   : > { %6496 = vmatmul.msk.bf16.gmra.mxu0 %vm1571_vm4, %v8784_v34  ;;  %v2092_v34 = vrot.slane %v8555_v61, 1 }
 0x1f3   : > { %v8934_v46 = vpop.f32.mrf.mxu3  ;;  %v8957_v1 = vsel %vm1071_vm2, %v2090_v7, %v2092_v34  ;;  %v2096_v7 = vrot.slane %v8588_v40, 1 }
 0x1f4   : > { %11052 = vst [vmem:[#allocation13_spill] sm:$0xff] %v8934_v46 }
 0x1f6   : > { %v8937_v16 = vpop.f32.mrf.mxu0 }
 0x1f7   : > { %11053 = vst [vmem:[#allocation14_spill] sm:$0xff] %v8937_v16 }
 0x1f9   : > { %6657 = vmatmul.msk.bf16.gmra.mxu3 %vm1571_vm4, %v2091_v38 }
 0x1fb   : > { %v8941_v50 = vpop.f32.mrf.mxu3 }
 0x1fc   : > { %11054 = vst [vmem:[#allocation15_spill] sm:$0xff] %v8941_v50 }
 0x1fe   : > { %6568 = vmatmul.msk.bf16.gmra.mxu1 %vm1571_vm4, %v8764_v18  ;;  %v8947_v59 = vpop.f32.mrf.mxu0 }
 0x1ff   : > { %6583 = vmatmul.msk.bf16.gmra.mxu2 %vm1571_vm4, %v8764_v18  ;;  %11055 = vst [vmem:[#allocation16_spill] sm:$0xff] %v8947_v59 }
 0x201   : > { %6497 = vmatmul.msk.bf16.gmra.mxu0 %vm1571_vm4, %v8809_v56  ;;  %v2094_v56 = vrot.slane %v8571_v21, 1  ;;  %v7723_v21 = vld [vmem:[%s11007_s5 + $0x30] sm:$0xff] }
 0x202   : > { %2762 = vmatpush.bf16.msra.mxu1 %v7723_v21  ;;  %v7720_v21 = vld [vmem:[%s11007_s5 + $0x18] sm:$0xff] }
 0x203   : > { %v8951_v31 = vpop.f32.mrf.mxu3  ;;  %v8977_v17 = vsel %vm1071_vm2, %v2092_v34, %v2094_v56  ;;  %v7722_v34 = vld [vmem:[%s11007_s5 + $0x28] sm:$0xff] }
 0x204   : > { %11056 = vst [vmem:[#allocation17_spill] sm:$0xff] %v8951_v31 }
 0x206   : > { %v8954_v60 = vpop.f32.mrf.mxu0  ;;  %2763 = vmatpush.bf16.msra.mxu1 %v7722_v34 }
 0x207   : > { %11057 = vst [vmem:[#allocation18_spill] sm:$0xff] %v8954_v60  ;;  %v2102_v60 = vrot.slane %v8641_v52, 1 }
 0x209   : > { %6658 = vmatmul.msk.bf16.gmra.mxu3 %vm1571_vm4, %v8957_v1 }
 0x20b   : > { %v8963_v6 = vpop.f32.mrf.mxu3 }
 0x20c   : > { %11058 = vst [vmem:[#allocation19_spill] sm:$0xff] %v8963_v6 }
 0x20e   : > { %v8965_v47 = vpop.f32.mrf.mxu0 }
 0x20f   : > { %11059 = vst [vmem:[#allocation20_spill] sm:$0xff] %v8965_v47 }
 0x211   : > { %6669 = vmatmul.msk.bf16.vlgmr.msra.gmra.mxu0 %vm1571_vm4, %v8836_v4 }
 0x213   : > { %v8971_v61 = vpop.f32.mrf.mxu3 }
 0x214   : > { %11060 = vst [vmem:[#allocation21_spill] sm:$0xff] %v8971_v61 }
 0x216   : > { %v8974_v36 = vpop.f32.mrf.mxu0 }
 0x217   : > { %11061 = vst [vmem:[#allocation22_spill] sm:$0xff] %v8974_v36 }
 0x219   : > { %6659 = vmatmul.msk.bf16.gmra.mxu3 %vm1571_vm4, %v8977_v17 }
 0x21b   : > { %v8981_v28 = vpop.f32.mrf.mxu3 }
 0x21c   : > { %11062 = vst [vmem:[#allocation23_spill] sm:$0xff] %v8981_v28  ;;  %v9001_v28 = vpop.f32.mrf.mxu1 }
 0x21e   : > { %v8988_v4 = vpop.f32.mrf.mxu0 }
 0x21f   : > { %11063 = vst [vmem:[#allocation24_spill] sm:$0xff] %v8988_v4  ;;  %v9006_v4 = vsel %vm1071_vm2, %v2094_v56, %v2096_v7  ;;  %v7719_v56 = vld [vmem:[%s11007_s5 + $0x10] sm:$0xff] }
 0x221   : > { %6670 = vmatmul.msk.bf16.gmra.mxu0 %vm1571_vm4, %v8864_v27  ;;  %v7721_v27 = vld [vmem:[%s11007_s5 + $0x20] sm:$0xff] }
 0x222   : > { %2764 = vmatpush.bf16.msra.mxu1 %v7721_v27 }
 0x223   : > { %v8995_v30 = vpop.f32.mrf.mxu3 }
 0x224   : > { %11064 = vst [vmem:[#allocation25_spill] sm:$0xff] %v8995_v30  ;;  %v9033_v30 = vpop.f32.mrf.mxu2 }
 0x226   : > { %v9003_v57 = vpop.f32.mrf.mxu0  ;;  %2765 = vmatpush.bf16.msra.mxu1 %v7720_v21  ;;  %v7718_v21 = vld [vmem:[%s11007_s5 + $0x8] sm:$0xff] }
 0x227   : > { %11065 = vst [vmem:[#allocation26_spill] sm:$0xff] %v9003_v57  ;;  %v9020_v57 = vpop.f32.mrf.mxu1 }
 0x229   : > { %6660 = vmatmul.msk.bf16.gmra.mxu3 %vm1571_vm4, %v9006_v4 }
 0x22a   : > { %2766 = vmatpush.bf16.msra.mxu1 %v7719_v56 }
 0x22c   : > { %v9013_v40 = vpop.f32.mrf.mxu3 }
 0x22d   : > { %11066 = vst [vmem:[#allocation27_spill] sm:$0xff] %v9013_v40  ;;  %v2098_v40 = vrot.slane %v8605_v3, 1 }
 0x22e   : > { %v9018_v34 = vpop.f32.mrf.mxu0  ;;  %2767 = vmatpush.bf16.msra.mxu1 %v7718_v21 }
 0x22f   : > { %11067 = vst [vmem:[#allocation28_spill] sm:$0xff] %v9018_v34  ;;  %v9038_v36 = vsel %vm1071_vm2, %v2096_v7, %v2098_v40  ;;  %v9045_v3 = vpop.f32.mrf.mxu1 }
 0x231   : > { %6671 = vmatmul.msk.bf16.gmra.mxu0 %vm1571_vm4, %v8908_v14  ;;  %v7717_v14 = vld [vmem:[%s11007_s5] sm:$0xff] }
 0x232   : > { %2768 = vmatpush.bf16.msra.mxu1 %v7717_v14 }
 0x234   : > { %v9027_v27 = vpop.f32.mrf.mxu3 }
 0x235   : > { %11068 = vst [vmem:[#allocation29_spill] sm:$0xff] %v9027_v27  ;;  %v9049_v27 = vpop.f32.mrf.mxu2 }
 0x236   : > { %v9035_v34 = vpop.f32.mrf.mxu0 }
 0x237   : > { %11069 = vst [vmem:[#allocation30_spill] sm:$0xff] %v9035_v34  ;;  %v2100_v34 = vrot.slane %v8622_v63, 1  ;;  %v9057_v61 = vpop.f32.mrf.mxu1  ;;  %v9076_v63 = vld [vmem:[%s11075_s4] sm:$0x3] }
 0x238   : > { %v9084_v59 = vperm.slane %v9076_v63, 0 }
 0x239   : > { %6661 = vmatmul.msk.bf16.gmra.mxu3 %vm1571_vm4, %v9038_v36  ;;  %v9062_v6 = vsel %vm1071_vm2, %v2098_v40, %v2100_v34  ;;  %v9090_v50 = vsel %vm1071_vm2, %v2100_v34, %v2102_v60 }
 0x23c   : > { %v9047_v56 = vpop.f32.mrf.mxu3 }
 0x23d   : > { %11070 = vst [vmem:[#allocation31_spill] sm:$0xff] %v9047_v56  ;;  %v9066_v14 = vpop.f32.mrf.mxu2 }
 0x23e   : > { %v9051_v21 = vpop.f32.mrf.mxu0 }
 0x23f   : > { %11071 = vst [vmem:[#allocation32_spill] sm:$0xff] %v9051_v21  ;;  %v9068_v21 = vpop.f32.mrf.mxu1 }
 0x241   : > { %6672 = vmatmul.msk.bf16.gmra.mxu0 %vm1571_vm4, %v2091_v38 }
 0x244   : > { %v9054_v7 = vpop.f32.mrf.mxu3 }
 0x245   : > { %11072 = vst [vmem:[#allocation33_spill] sm:$0xff] %v9054_v7  ;;  %v9080_v40 = vpop.f32.mrf.mxu2 }
 0x246   : > { %v9059_v47 = vpop.f32.mrf.mxu0 }
 0x247   : > { %11073 = vst [vmem:[#allocation34_spill] sm:$0xff] %v9059_v47  ;;  %v9092_v16 = vpop.f32.mrf.mxu1 }
 0x249   : > { %6662 = vmatmul.msk.bf16.gmra.mxu3 %vm1571_vm4, %v9062_v6 }
 0x24c   : > { %v2236_v56 = vpop.f32.mrf.mxu3 }
 0x24d   : > { %v2395_v7 = vadd.f32 %v2236_v56, %v8742_v55 }
 0x24e   : > { %v9070_v38 = vpop.f32.mrf.mxu0 }
 0x24f   : > { %11074 = vst [vmem:[#allocation35_spill] sm:$0xff] %v9070_v38  ;;  %v2455_v31 = vmax.f32 %v2395_v7, 0.0 }
 0x251   : > { %6673 = vmatmul.msk.bf16.gmra.mxu0 %vm1571_vm4, %v8957_v1  ;;  %v2521_v1 = vadd.f32 %v9084_v59, %v2455_v31 }
 0x254   : > { %v2238_v47 = vpop.f32.mrf.mxu3 }
 0x255   : > { %v2397_v38 = vadd.f32 %v2238_v47, %v8767_v20  ;;  %v9101_v20 = vpop.f32.mrf.mxu2 }
 0x256   : > { %v9087_v56 = vpop.f32.mrf.mxu0 }
 0x257   : > { %v2457_v55 = vmax.f32 %v2397_v38, 0.0  ;;  %11076 = vst [vmem:[#allocation36_spill] sm:$0xff] %v9087_v56  ;;  %v9106_v38 = vpop.f32.mrf.mxu1 }
 0x259   : > { %v2523_v46 = vadd.f32 %v9084_v59, %v2457_v55  ;;  %6663 = vmatmul.msk.bf16.gmra.mxu3 %vm1571_vm4, %v9090_v50  ;;  %v2104_v55 = vrot.slane %v8662_v19, 1 }
 0x25b   : > { %v9098_v52 = vpack.c.bf16 %v2523_v46, %v2521_v1 }
 0x25c   : > { %v2241_v7 = vpop.f32.mrf.mxu3 }
 0x25d   : > { %2769 = vmatmul.bf16.vlgmr.msra.gmra.mxu1 %v9098_v52  ;;  %v2399_v34 = vadd.f32 %v2241_v7, %v8789_v37  ;;  %v9112_v26 = vpop.f32.mrf.mxu2 }
 0x25e   : > { %v9103_v47 = vpop.f32.mrf.mxu0 }
 0x25f   : > { %11077 = vst [vmem:[#allocation37_spill] sm:$0xff] %v9103_v47  ;;  %v2459_v56 = vmax.f32 %v2399_v34, 0.0  ;;  %v9117_v47 = vsel %vm1071_vm2, %v2102_v60, %v2104_v55  ;;  %v9125_v34 = vpop.f32.mrf.mxu1 }
 0x261   : > { %6674 = vmatmul.msk.bf16.gmra.mxu0 %vm1571_vm4, %v8977_v17  ;;  %v2525_v37 = vadd.f32 %v9084_v59, %v2459_v56 }
 0x264   : > { %v2243_v31 = vpop.f32.mrf.mxu3 }
 0x265   : > { %v2401_v46 = vadd.f32 %v2243_v31, %v8800_v48  ;;  %v7729_v48 = vld [vmem:[%s11007_s5 + $0x60] sm:$0xff]  ;;  %v9134_v31 = vpop.f32.mrf.mxu2 }
 0x266   : > { %v9114_v49 = vpop.f32.mrf.mxu0  ;;  %2848 = vmatpush.bf16.msra.mxu2 %v7729_v48  ;;  %11080 = vst [vmem:[#allocation40_spill] sm:$0xff] %v9134_v31 }
 0x267   : > { %v2461_v1 = vmax.f32 %v2401_v46, 0.0  ;;  %11078 = vst [vmem:[#allocation38_spill] sm:$0xff] %v9114_v49  ;;  %v7728_v46 = vld [vmem:[%s11007_s5 + $0x58] sm:$0xff] }
 0x269   : > { %v2527_v7 = vadd.f32 %v9084_v59, %v2461_v1  ;;  %6664 = vmatmul.msk.bf16.gmra.mxu3 %vm1571_vm4, %v9117_v47 }
 0x26a   : > { %2849 = vmatpush.bf16.msra.mxu2 %v7728_v46 }
 0x26b   : > { %v9123_v17 = vpack.c.bf16 %v2527_v7, %v2525_v37  ;;  %v2106_v37 = vrot.slane %v8683_v45, 1 }
 0x26c   : > { %v2246_v19 = vpop.f32.mrf.mxu3 }
 0x26d   : > { %2774 = vmatmul.bf16.gmra.mxu1 %v9123_v17  ;;  %v2403_v56 = vadd.f32 %v2246_v19, %v8814_v2  ;;  %v7727_v2 = vld [vmem:[%s11007_s5 + $0x50] sm:$0xff]  ;;  %v9146_v19 = vpop.f32.mrf.mxu1  ;;  %v9151_v31 = vsel %vm1071_vm2, %v2104_v55, %v2106_v37  ;;  %v9165_v55 = vpop.f32.mrf.mxu2 }
 0x26e   : > { %v9131_v60 = vpop.f32.mrf.mxu0  ;;  %2850 = vmatpush.bf16.msra.mxu2 %v7727_v2  ;;  %v1910_v2 = vadd.f32 %v8959_v42, %v8702_v10  ;;  %v2108_v10 = vrot.slane %v8716_v23, 1  ;;  %v7733_v23 = vld [vmem:[%s11007_s5 + $0x80] sm:$0xff] }
 0x26f   : > { %11079 = vst [vmem:[#allocation39_spill] sm:$0xff] %v9131_v60  ;;  %v2463_v7 = vmax.f32 %v2403_v56, 0.0 }
 0x271   : > { %6675 = vmatmul.msk.bf16.gmra.mxu0 %vm1571_vm4, %v9006_v4  ;;  %v2529_v4 = vadd.f32 %v9084_v59, %v2463_v7  ;;  %v7725_v7 = vld [vmem:[%s11007_s5 + $0x40] sm:$0xff] }
 0x274   : > { %v2248_v1 = vpop.f32.mrf.mxu3 }
 0x275   : > { %v2405_v49 = vadd.f32 %v2248_v1, %v8825_v9  ;;  %v7737_v9 = vld [vmem:[%s11007_s5 + $0xa0] sm:$0xff]  ;;  %v7736_v1 = vld [vmem:[%s11007_s5 + $0x98] sm:$0xff] }
 0x276   : > { %v9148_v60 = vpop.f32.mrf.mxu0  ;;  %3034 = vmatpush.bf16.msra.mxu3 %v7737_v9  ;;  %v7735_v9 = vld [vmem:[%s11007_s5 + $0x90] sm:$0xff] }
 0x277   : > { %v2465_v48 = vmax.f32 %v2405_v49, 0.0  ;;  %11081 = vst [vmem:[#allocation41_spill] sm:$0xff] %v9148_v60  ;;  %v7726_v49 = vld [vmem:[%s11007_s5 + $0x48] sm:$0xff] }
 0x278   : > { %2851 = vmatpush.bf16.msra.mxu2 %v7726_v49  ;;  %v1912_v49 = vadd.f32 %v8967_v15, %v8726_v62  ;;  %v9196_v62 = vsel %vm1071_vm2, %v2106_v37, %v2108_v10  ;;  %v7732_v37 = vld [vmem:[%s11007_s5 + $0x78] sm:$0xff] }
 0x279   : > { %v2531_v45 = vadd.f32 %v9084_v59, %v2465_v48  ;;  %6665 = vmatmul.msk.bf16.gmra.mxu3 %vm1571_vm4, %v9151_v31 }
 0x27a   : > { %3035 = vmatpush.bf16.msra.mxu3 %v7736_v1 }
 0x27b   : > { %v9163_v56 = vpack.c.bf16 %v2531_v45, %v2529_v4  ;;  %v9178_v4 = vpop.f32.mrf.mxu1 }
 0x27c   : > { %v2251_v46 = vpop.f32.mrf.mxu3  ;;  %2852 = vmatpush.bf16.msra.mxu2 %v7725_v7  ;;  %v9191_v7 = vpop.f32.mrf.mxu2 }
 0x27d   : > { %2779 = vmatmul.bf16.gmra.mxu1 %v9163_v56  ;;  %v2407_v45 = vadd.f32 %v2251_v46, %v1910_v2  ;;  %v7734_v46 = vld [vmem:[%s11007_s5 + $0x88] sm:$0xff] }
 0x27e   : > { %v9176_v48 = vpop.f32.mrf.mxu0  ;;  %3036 = vmatpush.bf16.msra.mxu3 %v7735_v9 }
 0x27f   : > { %11082 = vst [vmem:[#allocation42_spill] sm:$0xff] %v9176_v48  ;;  %v2467_v42 = vmax.f32 %v2407_v45, 0.0 }
 0x281   : > { %6676 = vmatmul.msk.bf16.gmra.mxu0 %vm1571_vm4, %v9038_v36  ;;  %v2533_v15 = vadd.f32 %v9084_v59, %v2467_v42 }
 0x282   : > { %3037 = vmatpush.bf16.msra.mxu3 %v7734_v46 }
 0x284   : > { %v2253_v60 = vpop.f32.mrf.mxu3  ;;  %v9215_v42 = vpop.f32.mrf.mxu2 }
 0x285   : > { %v2409_v1 = vadd.f32 %v2253_v60, %v1912_v49  ;;  %v9205_v60 = vpop.f32.mrf.mxu1  ;;  %v1915_v49 = vadd.f32 %v8986_v25, %v8750_v53 }
 0x286   : > { %v9193_v48 = vpop.f32.mrf.mxu0  ;;  %3038 = vmatpush.bf16.msra.mxu3 %v7733_v23  ;;  %v9225_v23 = vrot.slane %v8764_v18, 1 }
 0x287   : > { %v2469_v2 = vmax.f32 %v2409_v1, 0.0  ;;  %11083 = vst [vmem:[#allocation43_spill] sm:$0xff] %v9193_v48 }
 0x289   : > { %v2535_v36 = vadd.f32 %v9084_v59, %v2469_v2  ;;  %6666 = vmatmul.msk.bf16.gmra.mxu3 %vm1571_vm4, %v9196_v62  ;;  %v7731_v2 = vld [vmem:[%s11007_s5 + $0x70] sm:$0xff] }
 0x28a   : > { %3039 = vmatpush.bf16.msra.mxu3 %v7732_v37 }
 0x28b   : > { %v9207_v45 = vpack.c.bf16 %v2535_v36, %v2533_v15  ;;  %v1917_v15 = vadd.f32 %v9001_v28, %v8779_v24  ;;  %v9234_v24 = vperm.slane %v9076_v63, 1 }
 0x28c   : > { %v2256_v9 = vpop.f32.mrf.mxu3 }
 0x28d   : > { %2784 = vmatmul.bf16.gmra.mxu1 %v9207_v45  ;;  %v2411_v46 = vadd.f32 %v2256_v9, %v1915_v49  ;;  %v9227_v53 = vpop.f32.mrf.mxu1  ;;  %v7730_v49 = vld [vmem:[%s11007_s5 + $0x68] sm:$0xff] }
 0x28e   : > { %v2320_v1 = vpop.f32.mrf.mxu0  ;;  %3040 = vmatpush.bf16.msra.mxu3 %v7731_v2  ;;  %v9245_v2 = vpop.f32.mrf.mxu2 }
 0x28f   : > { %v2471_v25 = vmax.f32 %v2411_v46, 0.0  ;;  %v2396_v9 = vadd.f32 %v2320_v1, %v8777_v22 }
 0x291   : > { %6677 = vmatmul.msk.bf16.gmra.mxu0 %vm1571_vm4, %v9062_v6  ;;  %v9238_v6 = vsel %vm1071_vm2, %v2108_v10, %v9225_v23  ;;  %v2537_v28 = vadd.f32 %v9084_v59, %v2471_v25  ;;  %v2456_v46 = vmax.f32 %v2396_v9, 0.0 }
 0x292   : > { %3041 = vmatpush.bf16.msra.mxu3 %v7730_v49 }
 0x293   : > { %v2522_v10 = vadd.f32 %v9234_v24, %v2456_v46 }
 0x294   : > { %v2258_v36 = vpop.f32.mrf.mxu3 }
 0x295   : > { %v2413_v37 = vadd.f32 %v2258_v36, %v1917_v15  ;;  %v9254_v25 = vpop.f32.mrf.mxu1 }
 0x296   : > { %v2322_v18 = vpop.f32.mrf.mxu0 }
 0x297   : > { %v2473_v48 = vmax.f32 %v2413_v37, 0.0  ;;  %v2398_v1 = vadd.f32 %v2322_v18, %v8791_v39  ;;  %v1922_v18 = vadd.f32 %v9045_v3, %v8806_v54 }
 0x299   : > { %v2539_v22 = vadd.f32 %v9084_v59, %v2473_v48  ;;  %6667 = vmatmul.msk.bf16.gmra.mxu3 %vm1571_vm4, %v9238_v6  ;;  %v2458_v15 = vmax.f32 %v2398_v1, 0.0  ;;  %v1920_v48 = vadd.f32 %v9020_v57, %v8793_v41 }
 0x29b   : > { %v9247_v63 = vpack.c.bf16 %v2539_v22, %v2537_v28  ;;  %v2524_v37 = vadd.f32 %v9234_v24, %v2458_v15  ;;  %v9264_v28 = vpop.f32.mrf.mxu2 }
 0x29c   : > { %v2261_v36 = vpop.f32.mrf.mxu3 }
 0x29d   : > { %2789 = vmatmul.bf16.gmra.mxu1 %v9247_v63  ;;  %v9256_v9 = vpack.c.bf16 %v2524_v37, %v2522_v10  ;;  %v2415_v49 = vadd.f32 %v2261_v36, %v1920_v48  ;;  %v9267_v10 = vpop.f32.mrf.mxu1 }
 0x29e   : > { %v2325_v39 = vpop.f32.mrf.mxu0 }
 0x29f   : > { %6736 = vmatmul.msk.bf16.vlgmr.msra.gmra.mxu2 %vm2715_vm5, %v9256_v9  ;;  %v2475_v22 = vmax.f32 %v2415_v49, 0.0  ;;  %v2400_v41 = vadd.f32 %v2325_v39, %v8804_v11 }
 0x2a1   : > { %6678 = vmatmul.msk.bf16.gmra.mxu0 %vm1571_vm4, %v9090_v50  ;;  %v2541_v36 = vadd.f32 %v9084_v59, %v2475_v22  ;;  %v2460_v37 = vmax.f32 %v2400_v41, 0.0 }
 0x2a3   : > { %v2526_v11 = vadd.f32 %v9234_v24, %v2460_v37 }
 0x2a4   : > { %v2263_v46 = vpop.f32.mrf.mxu3 }
 0x2a5   : > { %v2417_v57 = vadd.f32 %v2263_v46, %v1922_v18  ;;  %v9279_v18 = vpop.f32.mrf.mxu2  ;;  %v1925_v46 = vadd.f32 %v9057_v61, %v8818_v51 }
 0x2a6   : > { %v2327_v15 = vpop.f32.mrf.mxu0 }
 0x2a7   : > { %v2477_v1 = vmax.f32 %v2417_v57, 0.0  ;;  %v2402_v54 = vadd.f32 %v2327_v15, %v8816_v5  ;;  %v1927_v5 = vadd.f32 %v9068_v21, %v8831_v13 }
 0x2a9   : > { %v2543_v48 = vadd.f32 %v9084_v59, %v2477_v1  ;;  %6668 = vmatmul.msk.bf16.gmra.mxu3 %vm1571_vm4, %v9225_v23  ;;  %v2462_v50 = vmax.f32 %v2402_v54, 0.0  ;;  %v9289_v1 = vpop.f32.mrf.mxu1 }
 0x2ab   : > { %v9274_v3 = vpack.c.bf16 %v2543_v48, %v2541_v36  ;;  %v2528_v39 = vadd.f32 %v9234_v24, %v2462_v50 }
 0x2ac   : > { %v2266_v49 = vpop.f32.mrf.mxu3 }
 0x2ad   : > { %2794 = vmatmul.bf16.gmra.mxu1 %v9274_v3  ;;  %v9283_v22 = vpack.c.bf16 %v2528_v39, %v2526_v11  ;;  %v2419_v57 = vadd.f32 %v2266_v49, %v1925_v46  ;;  %v9294_v48 = vpop.f32.mrf.mxu2 }
 0x2ae   : > { %v2330_v41 = vpop.f32.mrf.mxu0 }
 0x2af   : > { %6737 = vmatmul.msk.bf16.gmra.mxu2 %vm2715_vm5, %v9283_v22  ;;  %v2479_v36 = vmax.f32 %v2419_v57, 0.0  ;;  %v2404_v37 = vadd.f32 %v2330_v41, %v8829_v33  ;;  %v1930_v57 = vadd.f32 %v9092_v16, %v8842_v12 }
 0x2b1   : > { %6679 = vmatmul.msk.bf16.gmra.mxu0 %vm1571_vm4, %v9117_v47  ;;  %v2545_v50 = vadd.f32 %v9084_v59, %v2479_v36  ;;  %v2464_v49 = vmax.f32 %v2404_v37, 0.0  ;;  %v9302_v46 = vpop.f32.mrf.mxu1  ;;  %v1994_v36 = vadd.f32 %v9033_v30, %v8848_v58  ;;  %v1932_v37 = vadd.f32 %v9106_v38, %v8852_v44  ;;  %v7742_v38 = vld [vmem:[%s11007_s5 + $0xc8] sm:$0xff] }
 0x2b2   : > { %3121 = vmatpush.bf16.msrb.mxu0 %v7742_v38 }
 0x2b3   : > { %v2530_v33 = vadd.f32 %v9234_v24, %v2464_v49 }
 0x2b4   : > { %v2268_v15 = vpop.f32.mrf.mxu3 }
 0x2b5   : > { %v2421_v51 = vadd.f32 %v2268_v15, %v1927_v5 }
 0x2b6   : > { %v2332_v54 = vpop.f32.mrf.mxu0 }
 0x2b7   : > { %v2481_v61 = vmax.f32 %v2421_v51, 0.0  ;;  %v2406_v13 = vadd.f32 %v2332_v54, %v8840_v32  ;;  %v1996_v54 = vadd.f32 %v9049_v27, %v8861_v35 }
 0x2b9   : > { %v2547_v11 = vadd.f32 %v9084_v59, %v2481_v61  ;;  %3042 = vmatmul.bf16.vlgmr.msra.gmra.mxu3 %v9098_v52  ;;  %v2466_v21 = vmax.f32 %v2406_v13, 0.0  ;;  %v9313_v52 = vpop.f32.mrf.mxu2 }
 0x2bb   : > { %v9300_v47 = vpack.c.bf16 %v2547_v11, %v2545_v50  ;;  %v2532_v41 = vadd.f32 %v9234_v24, %v2466_v21  ;;  %v9323_v50 = vpop.f32.mrf.mxu1 }
 0x2bc   : > { %v2271_v39 = vpop.f32.mrf.mxu3 }
 0x2bd   : > { %2799 = vmatmul.bf16.gmra.mxu1 %v9300_v47  ;;  %v9309_v5 = vpack.c.bf16 %v2532_v41, %v2530_v33  ;;  %v2423_v15 = vadd.f32 %v2271_v39, %v1930_v57 }
 0x2be   : > { %v2335_v32 = vpop.f32.mrf.mxu0 }
 0x2bf   : > { %6738 = vmatmul.msk.bf16.gmra.mxu2 %vm2715_vm5, %v9309_v5  ;;  %v2483_v12 = vmax.f32 %v2423_v15, 0.0  ;;  %v2408_v16 = vadd.f32 %v2335_v32, %v1994_v36  ;;  %v1999_v36 = vadd.f32 %v9066_v14, %v8886_v43  ;;  %v2001_v43 = vadd.f32 %v9080_v40, %v8905_v8  ;;  %v7739_v40 = vld [vmem:[%s11007_s5 + $0xb0] sm:$0xff] }
 0x2c1   : > { %6680 = vmatmul.msk.bf16.gmra.mxu0 %vm1571_vm4, %v9151_v31  ;;  %v2549_v13 = vadd.f32 %v9084_v59, %v2483_v12  ;;  %v2468_v58 = vmax.f32 %v2408_v16, 0.0  ;;  %v9333_v35 = vpop.f32.mrf.mxu2 }
 0x2c3   : > { %v2534_v39 = vadd.f32 %v9234_v24, %v2468_v58  ;;  %v9342_v32 = vpop.f32.mrf.mxu1 }
 0x2c4   : > { %v2273_v51 = vpop.f32.mrf.mxu3 }
 0x2c5   : > { %v2425_v61 = vadd.f32 %v2273_v51, %v1932_v37  ;;  %v1937_v37 = vadd.f32 %v9146_v19, %v8896_v0  ;;  %v7740_v0 = vld [vmem:[%s11007_s5 + $0xb8] sm:$0xff] }
 0x2c6   : > { %v2337_v11 = vpop.f32.mrf.mxu0 }
 0x2c7   : > { %v2485_v49 = vmax.f32 %v2425_v61, 0.0  ;;  %v2410_v44 = vadd.f32 %v2337_v11, %v1996_v54 }
 0x2c9   : > { %v2551_v30 = vadd.f32 %v9084_v59, %v2485_v49  ;;  %3047 = vmatmul.bf16.gmra.mxu3 %v9123_v17  ;;  %v2470_v31 = vmax.f32 %v2410_v44, 0.0  ;;  %v1935_v17 = vadd.f32 %v9125_v34, %v8874_v29  ;;  %v7741_v29 = vld [vmem:[%s11007_s5 + $0xc0] sm:$0xff]  ;;  %v9355_v61 = vpop.f32.mrf.mxu2 }
 0x2ca   : > { %3122 = vmatpush.bf16.msrb.mxu0 %v7741_v29 }
 0x2cb   : > { %v9331_v21 = vpack.c.bf16 %v2551_v30, %v2549_v13  ;;  %v2536_v33 = vadd.f32 %v9234_v24, %v2470_v31  ;;  %v9365_v13 = vpop.f32.mrf.mxu1  ;;  %v11084_v31 = vld [vmem:[#allocation11_spill] sm:$0xff] }
 0x2cc   : > { %v2276_v27 = vpop.f32.mrf.mxu3 }
 0x2cd   : > { %2804 = vmatmul.bf16.gmra.mxu1 %v9331_v21  ;;  %v9340_v41 = vpack.c.bf16 %v2536_v33, %v2534_v39  ;;  %v2427_v15 = vadd.f32 %v2276_v27, %v1935_v17  ;;  %v7738_v17 = vld [vmem:[%s11007_s5 + $0xa8] sm:$0xff] }
 0x2ce   : > { %v2340_v57 = vpop.f32.mrf.mxu0  ;;  %3123 = vmatpush.bf16.msrb.mxu0 %v7740_v0 }
 0x2cf   : > { %6739 = vmatmul.msk.bf16.gmra.mxu2 %vm2715_vm5, %v9340_v41  ;;  %v2487_v34 = vmax.f32 %v2427_v15, 0.0  ;;  %v2412_v12 = vadd.f32 %v2340_v57, %v1999_v36  ;;  %v11085_v15 = vld [vmem:[#allocation12_spill] sm:$0xff] }
 0x2d0   : > { %v2004_v36 = vadd.f32 %v9101_v20, %v11085_v15  ;;  %v11091_v15 = vld [vmem:[#allocation17_spill] sm:$0xff] }
 0x2d1   : > { %6681 = vmatmul.msk.bf16.gmra.mxu0 %vm1571_vm4, %v9196_v62  ;;  %v2553_v19 = vadd.f32 %v9084_v59, %v2487_v34  ;;  %v2472_v62 = vmax.f32 %v2412_v12, 0.0  ;;  %v9379_v39 = vpop.f32.mrf.mxu2 }
 0x2d2   : > { %3124 = vmatpush.bf16.msrb.mxu0 %v7739_v40  ;;  %v11088_v40 = vld [vmem:[#allocation15_spill] sm:$0xff] }
 0x2d3   : > { %v2538_v44 = vadd.f32 %v9234_v24, %v2472_v62  ;;  %v9392_v29 = vpop.f32.mrf.mxu1 }
 0x2d4   : > { %v2278_v51 = vpop.f32.mrf.mxu3 }
 0x2d5   : > { %v2429_v16 = vadd.f32 %v2278_v51, %v1937_v37  ;;  %v11086_v37 = vld [vmem:[#allocation13_spill] sm:$0xff] }
 0x2d6   : > { %v2342_v54 = vpop.f32.mrf.mxu0  ;;  %3125 = vmatpush.bf16.msrb.mxu0 %v7738_v17  ;;  %v11090_v17 = vld [vmem:[#allocation40_spill] sm:$0xff] }
 0x2d7   : > { %v2489_v14 = vmax.f32 %v2429_v16, 0.0  ;;  %v2414_v11 = vadd.f32 %v2342_v54, %v2001_v43  ;;  %v11087_v43 = vld [vmem:[#allocation14_spill] sm:$0xff] }
 0x2d9   : > { %v2555_v49 = vadd.f32 %v9084_v59, %v2489_v14  ;;  %3052 = vmatmul.bf16.gmra.mxu3 %v9163_v56  ;;  %v2474_v58 = vmax.f32 %v2414_v11, 0.0  ;;  %v1940_v56 = vadd.f32 %v9178_v4, %v11084_v31  ;;  %v1942_v4 = vadd.f32 %v9205_v60, %v11086_v37 }
 0x2da   : > { %v2006_v14 = vadd.f32 %v9112_v26, %v11087_v43 }
 0x2db   : > { %v9367_v30 = vpack.c.bf16 %v2555_v49, %v2553_v19  ;;  %v2540_v38 = vadd.f32 %v9234_v24, %v2474_v58 }
 0x2dc   : > { %v2281_v8 = vpop.f32.mrf.mxu3 }
 0x2dd   : > { %2809 = vmatmul.bf16.gmra.mxu1 %v9367_v30  ;;  %v9377_v27 = vpack.c.bf16 %v2540_v38, %v2538_v44  ;;  %v2431_v57 = vadd.f32 %v2281_v8, %v1940_v56  ;;  %v1945_v44 = vadd.f32 %v9227_v53, %v11088_v40  ;;  %v9408_v38 = vpop.f32.mrf.mxu1 }
 0x2de   : > { %v2345_v33 = vpop.f32.mrf.mxu0 }
 0x2df   : > { %6740 = vmatmul.msk.bf16.gmra.mxu2 %vm2715_vm5, %v9377_v27  ;;  %v2491_v34 = vmax.f32 %v2431_v57, 0.0  ;;  %v2416_v12 = vadd.f32 %v2345_v33, %v2004_v36  ;;  %v11089_v33 = vld [vmem:[#allocation16_spill] sm:$0xff]  ;;  %v1947_v36 = vadd.f32 %v9254_v25, %v11091_v15 }
 0x2e0   : > { %v2009_v57 = vadd.f32 %v11090_v17, %v11089_v33  ;;  %v11095_v17 = vld [vmem:[#allocation21_spill] sm:$0xff] }
 0x2e1   : > { %6682 = vmatmul.msk.bf16.gmra.mxu0 %vm1571_vm4, %v9238_v6  ;;  %v2557_v19 = vadd.f32 %v9084_v59, %v2491_v34  ;;  %v2476_v20 = vmax.f32 %v2416_v12, 0.0  ;;  %v9399_v6 = vpop.f32.mrf.mxu2  ;;  %v11092_v12 = vld [vmem:[#allocation18_spill] sm:$0xff] }
 0x2e3   : > { %v2542_v8 = vadd.f32 %v9234_v24, %v2476_v20 }
 0x2e4   : > { %v2283_v51 = vpop.f32.mrf.mxu3 }
 0x2e5   : > { %v2433_v16 = vadd.f32 %v2283_v51, %v1942_v4  ;;  %v9424_v43 = vpop.f32.mrf.mxu1 }
 0x2e6   : > { %v2347_v0 = vpop.f32.mrf.mxu0 }
 0x2e7   : > { %v2493_v54 = vmax.f32 %v2433_v16, 0.0  ;;  %v2418_v60 = vadd.f32 %v2347_v0, %v2006_v14  ;;  %v2011_v16 = vadd.f32 %v9165_v55, %v11092_v12 }
 0x2e9   : > { %v2559_v62 = vadd.f32 %v9084_v59, %v2493_v54  ;;  %3057 = vmatmul.bf16.gmra.mxu3 %v9207_v45  ;;  %v2478_v49 = vmax.f32 %v2418_v60, 0.0  ;;  %v9420_v37 = vpop.f32.mrf.mxu2 }
 0x2eb   : > { %v9401_v11 = vpack.c.bf16 %v2559_v62, %v2557_v19  ;;  %v2544_v26 = vadd.f32 %v9234_v24, %v2478_v49 }
 0x2ec   : > { %v2286_v58 = vpop.f32.mrf.mxu3 }
 0x2ed   : > { %2814 = vmatmul.bf16.gmra.mxu1 %v9401_v11  ;;  %v9410_v31 = vpack.c.bf16 %v2544_v26, %v2542_v8  ;;  %v2435_v56 = vadd.f32 %v2286_v58, %v1945_v44  ;;  %v11093_v8 = vld [vmem:[#allocation19_spill] sm:$0xff] }
 0x2ee   : > { %v2350_v45 = vpop.f32.mrf.mxu0  ;;  %v1950_v26 = vadd.f32 %v9267_v10, %v11093_v8 }
 0x2ef   : > { %6741 = vmatmul.msk.bf16.gmra.mxu2 %vm2715_vm5, %v9410_v31  ;;  %v2495_v4 = vmax.f32 %v2435_v56, 0.0  ;;  %v2420_v51 = vadd.f32 %v2350_v45, %v2009_v57  ;;  %v9440_v45 = vpop.f32.mrf.mxu1  ;;  %v11094_v56 = vld [vmem:[#allocation20_spill] sm:$0xff]  ;;  %v1952_v57 = vadd.f32 %v9289_v1, %v11095_v17 }
 0x2f0   : > { %v2014_v33 = vadd.f32 %v9191_v7, %v11094_v56 }
 0x2f1   : > { %6683 = vmatmul.msk.bf16.gmra.mxu0 %vm1571_vm4, %v9225_v23  ;;  %v2561_v0 = vadd.f32 %v9084_v59, %v2495_v4  ;;  %v2480_v19 = vmax.f32 %v2420_v51, 0.0  ;;  %v9434_v58 = vpop.f32.mrf.mxu2  ;;  %v11096_v4 = vld [vmem:[#allocation22_spill] sm:$0xff] }
 0x2f2   : > { %v2016_v51 = vadd.f32 %v9215_v42, %v11096_v4 }
 0x2f3   : > { %v2546_v49 = vadd.f32 %v9234_v24, %v2480_v19 }
 0x2f4   : > { %v2288_v53 = vpop.f32.mrf.mxu3 }
 0x2f5   : > { %v2437_v34 = vadd.f32 %v2288_v53, %v1947_v36 }
 0x2f6   : > { %v2352_v54 = vpop.f32.mrf.mxu0 }
 0x2f7   : > { %v2497_v14 = vmax.f32 %v2437_v34, 0.0  ;;  %v2422_v20 = vadd.f32 %v2352_v54, %v2011_v16 }
 0x2f9   : > { %v2563_v25 = vadd.f32 %v9084_v59, %v2497_v14  ;;  %3062 = vmatmul.bf16.gmra.mxu3 %v9247_v63  ;;  %v2482_v23 = vmax.f32 %v2422_v20, 0.0  ;;  %v9452_v12 = vpop.f32.mrf.mxu2 }
 0x2fb   : > { %v9429_v62 = vpack.c.bf16 %v2563_v25, %v2561_v0  ;;  %v2548_v55 = vadd.f32 %v9234_v24, %v2482_v23  ;;  %v11097_v23 = vld [vmem:[#allocation23_spill] sm:$0xff] }
 0x2fc   : > { %v2291_v60 = vpop.f32.mrf.mxu3 }
 0x2fd   : > { %2819 = vmatmul.bf16.gmra.mxu1 %v9429_v62  ;;  %v9438_v40 = vpack.c.bf16 %v2548_v55, %v2546_v49  ;;  %v2439_v63 = vadd.f32 %v2291_v60, %v1950_v26  ;;  %v1955_v60 = vadd.f32 %v9302_v46, %v11097_v23  ;;  %v11098_v26 = vld [vmem:[#allocation24_spill] sm:$0xff] }
 0x2fe   : > { %v2355_v44 = vpop.f32.mrf.mxu0  ;;  %v11102_v23 = vld [vmem:[#allocation28_spill] sm:$0xff] }
 0x2ff   : > { %6742 = vmatmul.msk.bf16.gmra.mxu2 %vm2715_vm5, %v9438_v40  ;;  %v2499_v10 = vmax.f32 %v2439_v63, 0.0  ;;  %v2424_v36 = vadd.f32 %v2355_v44, %v2014_v33  ;;  %v2019_v44 = vadd.f32 %v9245_v2, %v11098_v26  ;;  %v11099_v63 = vld [vmem:[#allocation25_spill] sm:$0xff] }
 0x300   : > { %v1957_v56 = vadd.f32 %v9323_v50, %v11099_v63 }
 0x301   : > { %6829 = vmatmul.msk.bf16.vlgmr.msrb.gmra.mxu0 %vm2715_vm5, %v9256_v9  ;;  %v2565_v14 = vadd.f32 %v9084_v59, %v2499_v10  ;;  %v2484_v7 = vmax.f32 %v2424_v36, 0.0  ;;  %v9457_v9 = vpop.f32.mrf.mxu1  ;;  %v11100_v10 = vld [vmem:[#allocation26_spill] sm:$0xff] }
 0x302   : > { %v2021_v36 = vadd.f32 %v9264_v28, %v11100_v10 }
 0x303   : > { %v2550_v42 = vadd.f32 %v9234_v24, %v2484_v7 }
 0x304   : > { %v2293_v15 = vpop.f32.mrf.mxu3 }
 0x305   : > { %v2441_v53 = vadd.f32 %v2293_v15, %v1952_v57 }
 0x306   : > { %v2357_v16 = vpop.f32.mrf.mxu0 }
 0x307   : > { %v2501_v34 = vmax.f32 %v2441_v53, 0.0  ;;  %v2426_v1 = vadd.f32 %v2357_v16, %v2016_v51 }
 0x309   : > { %v2567_v54 = vadd.f32 %v9084_v59, %v2501_v34  ;;  %3067 = vmatmul.bf16.gmra.mxu3 %v9274_v3  ;;  %v2486_v0 = vmax.f32 %v2426_v1, 0.0  ;;  %v9470_v3 = vpop.f32.mrf.mxu2  ;;  %v9478_v46 = vpop.f32.mrf.mxu1  ;;  %v11101_v1 = vld [vmem:[#allocation27_spill] sm:$0xff] }
 0x30b   : > { %v9459_v19 = vpack.c.bf16 %v2567_v54, %v2565_v14  ;;  %v2552_v20 = vadd.f32 %v9234_v24, %v2486_v0  ;;  %v1960_v0 = vadd.f32 %v9342_v32, %v11101_v1 }
 0x30c   : > { %v2296_v25 = vpop.f32.mrf.mxu3 }
 0x30d   : > { %2824 = vmatmul.bf16.gmra.mxu1 %v9459_v19  ;;  %v9466_v49 = vpack.c.bf16 %v2552_v20, %v2550_v42  ;;  %v2443_v8 = vadd.f32 %v2296_v25, %v1955_v60  ;;  %v2024_v60 = vadd.f32 %v9279_v18, %v11102_v23 }
 0x30e   : > { %v2360_v55 = vpop.f32.mrf.mxu0 }
 0x30f   : > { %6743 = vmatmul.msk.bf16.gmra.mxu2 %vm2715_vm5, %v9466_v49  ;;  %v2503_v17 = vmax.f32 %v2443_v8, 0.0  ;;  %v2428_v57 = vadd.f32 %v2360_v55, %v2019_v44  ;;  %v11103_v55 = vld [vmem:[#allocation29_spill] sm:$0xff] }
 0x310   : > { %v1962_v8 = vadd.f32 %v9365_v13, %v11103_v55 }
 0x311   : > { %6830 = vmatmul.msk.bf16.gmra.mxu0 %vm2715_vm5, %v9283_v22  ;;  %v2569_v51 = vadd.f32 %v9084_v59, %v2503_v17  ;;  %v2488_v2 = vmax.f32 %v2428_v57, 0.0  ;;  %v9487_v14 = vpop.f32.mrf.mxu2  ;;  %v9494_v25 = vpop.f32.mrf.mxu1 }
 0x313   : > { %v2554_v54 = vadd.f32 %v9234_v24, %v2488_v2 }
 0x314   : > { %v2298_v33 = vpop.f32.mrf.mxu3 }
 0x315   : > { %v2445_v15 = vadd.f32 %v2298_v33, %v1957_v56  ;;  %v11104_v33 = vld [vmem:[#allocation30_spill] sm:$0xff] }
 0x316   : > { %v2362_v4 = vpop.f32.mrf.mxu0  ;;  %v2026_v17 = vadd.f32 %v9294_v48, %v11104_v33 }
 0x317   : > { %v2505_v53 = vmax.f32 %v2445_v15, 0.0  ;;  %v2430_v50 = vadd.f32 %v2362_v4, %v2021_v36 }
 0x319   : > { %v2571_v34 = vadd.f32 %v9084_v59, %v2505_v53  ;;  %3072 = vmatmul.bf16.gmra.mxu3 %v9300_v47  ;;  %v2490_v22 = vmax.f32 %v2430_v50, 0.0  ;;  %v9510_v10 = vpop.f32.mrf.mxu1  ;;  %v11105_v50 = vld [vmem:[#allocation31_spill] sm:$0xff] }
 0x31b   : > { %v9485_v16 = vpack.c.bf16 %v2571_v34, %v2569_v51  ;;  %v2556_v28 = vadd.f32 %v9234_v24, %v2490_v22  ;;  %v1965_v22 = vadd.f32 %v9392_v29, %v11105_v50 }
 0x31c   : > { %v2301_v7 = vpop.f32.mrf.mxu3 }
 0x31d   : > { %2829 = vmatmul.bf16.gmra.mxu1 %v9485_v16  ;;  %v9496_v42 = vpack.c.bf16 %v2556_v28, %v2554_v54  ;;  %v2447_v20 = vadd.f32 %v2301_v7, %v1960_v0  ;;  %v11107_v0 = vld [vmem:[#allocation33_spill] sm:$0xff] }
 0x31e   : > { %v2365_v47 = vpop.f32.mrf.mxu0 }
 0x31f   : > { %6744 = vmatmul.msk.bf16.gmra.mxu2 %vm2715_vm5, %v9496_v42  ;;  %v2507_v44 = vmax.f32 %v2447_v20, 0.0  ;;  %v2432_v63 = vadd.f32 %v2365_v47, %v2024_v60  ;;  %v1967_v47 = vadd.f32 %v9408_v38, %v11107_v0 }
 0x321   : > { %6831 = vmatmul.msk.bf16.gmra.mxu0 %vm2715_vm5, %v9309_v5  ;;  %v2573_v18 = vadd.f32 %v9084_v59, %v2507_v44  ;;  %v2492_v36 = vmax.f32 %v2432_v63, 0.0  ;;  %v9532_v20 = vpop.f32.mrf.mxu1 }
 0x322   : > { %v9506_v32 = vpop.f32.mrf.mxu2 }
 0x323   : > { %v2558_v48 = vadd.f32 %v9234_v24, %v2492_v36 }
 0x324   : > { %v2303_v26 = vpop.f32.mrf.mxu3 }
 0x325   : > { %v2449_v56 = vadd.f32 %v2303_v26, %v1962_v8  ;;  %v11108_v26 = vld [vmem:[#allocation34_spill] sm:$0xff] }
 0x326   : > { %v2367_v15 = vpop.f32.mrf.mxu0  ;;  %v2031_v44 = vadd.f32 %v9333_v35, %v11108_v26 }
 0x327   : > { %v2509_v57 = vmax.f32 %v2449_v56, 0.0  ;;  %v2434_v53 = vadd.f32 %v2367_v15, %v2026_v17 }
 0x329   : > { %v2575_v13 = vadd.f32 %v9084_v59, %v2509_v57  ;;  %3077 = vmatmul.bf16.gmra.mxu3 %v9331_v21  ;;  %v2494_v5 = vmax.f32 %v2434_v53, 0.0  ;;  %v11106_v21 = vld [vmem:[#allocation32_spill] sm:$0xff]  ;;  %v9550_v35 = vpop.f32.mrf.mxu1 }
 0x32a   : > { %v9517_v2 = vpop.f32.mrf.mxu2  ;;  %v2029_v1 = vadd.f32 %v9313_v52, %v11106_v21 }
 0x32b   : > { %v9515_v4 = vpack.c.bf16 %v2575_v13, %v2573_v18  ;;  %v2560_v34 = vadd.f32 %v9234_v24, %v2494_v5 }
 0x32c   : > { %v2306_v51 = vpop.f32.mrf.mxu3 }
 0x32d   : > { %2834 = vmatmul.bf16.gmra.mxu1 %v9515_v4  ;;  %v9524_v7 = vpack.c.bf16 %v2560_v34, %v2558_v48  ;;  %v2451_v28 = vadd.f32 %v2306_v51, %v1965_v22  ;;  %v11110_v34 = vld [vmem:[#allocation36_spill] sm:$0xff] }
 0x32e   : > { %v2370_v54 = vpop.f32.mrf.mxu0  ;;  %v2036_v50 = vadd.f32 %v9379_v39, %v11110_v34 }
 0x32f   : > { %6745 = vmatmul.msk.bf16.gmra.mxu2 %vm2715_vm5, %v9524_v7  ;;  %v2511_v60 = vmax.f32 %v2451_v28, 0.0  ;;  %v2436_v55 = vadd.f32 %v2370_v54, %v2029_v1 }
 0x331   : > { %6832 = vmatmul.msk.bf16.gmra.mxu0 %vm2715_vm5, %v9340_v41  ;;  %v2577_v52 = vadd.f32 %v9084_v59, %v2511_v60  ;;  %v2496_v33 = vmax.f32 %v2436_v55, 0.0  ;;  %v2790_v22 = vpop.f32.mrf.mxu1  ;;  %v11111_v55 = vld [vmem:[#allocation37_spill] sm:$0xff] }
 0x332   : > { %v9536_v29 = vpop.f32.mrf.mxu2 }
 0x333   : > { %v2562_v18 = vadd.f32 %v9234_v24, %v2496_v33 }
 0x334   : > { %v2308_v23 = vpop.f32.mrf.mxu3 }
 0x335   : > { %v2453_v8 = vadd.f32 %v2308_v23, %v1967_v47 }
 0x336   : > { %v2372_v56 = vpop.f32.mrf.mxu0 }
 0x337   : > { %v2513_v63 = vmax.f32 %v2453_v8, 0.0  ;;  %v2438_v17 = vadd.f32 %v2372_v56, %v2031_v44  ;;  %v11112_v44 = vld [vmem:[#allocation38_spill] sm:$0xff] }
 0x339   : > { %v2579_v38 = vadd.f32 %v9084_v59, %v2513_v63  ;;  %3082 = vmatmul.bf16.gmra.mxu3 %v9367_v30  ;;  %v2498_v41 = vmax.f32 %v2438_v17, 0.0  ;;  %v11109_v59 = vld [vmem:[#allocation35_spill] sm:$0xff]  ;;  %v9577_v39 = vpop.f32.mrf.mxu1  ;;  %v2041_v63 = vadd.f32 %v9420_v37, %v11112_v44 }
 0x33a   : > { %v9545_v15 = vpop.f32.mrf.mxu2  ;;  %v2034_v30 = vadd.f32 %v9355_v61, %v11109_v59  ;;  %v11113_v37 = vld [vmem:[#allocation39_spill] sm:$0xff] }
 0x33b   : > { %v9543_v57 = vpack.c.bf16 %v2579_v38, %v2577_v52  ;;  %v2564_v36 = vadd.f32 %v9234_v24, %v2498_v41 }
 0x33c   : > { %v9562_v48 = vpop.f32.mrf.mxu3 }
 0x33d   : > { %2839 = vmatmul.bf16.gmra.mxu1 %v9543_v57  ;;  %v9552_v13 = vpack.c.bf16 %v2564_v36, %v2562_v18 }
 0x33e   : > { %v2375_v53 = vpop.f32.mrf.mxu0 }
 0x33f   : > { %6746 = vmatmul.msk.bf16.gmra.mxu2 %vm2715_vm5, %v9552_v13  ;;  %v2440_v51 = vadd.f32 %v2375_v53, %v2034_v30 }
 0x341   : > { %6833 = vmatmul.msk.bf16.gmra.mxu0 %vm2715_vm5, %v9377_v27  ;;  %v2500_v28 = vmax.f32 %v2440_v51, 0.0  ;;  %v9590_v41 = vpop.f32.mrf.mxu1 }
 0x342   : > { %v9560_v5 = vpop.f32.mrf.mxu2 }
 0x343   : > { %v2566_v61 = vadd.f32 %v9234_v24, %v2500_v28 }
 0x344   : > { %v9573_v23 = vpop.f32.mrf.mxu3 }
 0x346   : > { %v2377_v54 = vpop.f32.mrf.mxu0 }
 0x347   : > { %v2442_v21 = vadd.f32 %v2377_v54, %v2036_v50  ;;  %v11114_v54 = vld [vmem:[#allocation41_spill] sm:$0xff] }
 0x348   : > { %v2046_v28 = vadd.f32 %v9452_v12, %v11114_v54  ;;  %v11115_v12 = vld [vmem:[#allocation42_spill] sm:$0xff] }
 0x349   : > { %3087 = vmatmul.bf16.gmra.mxu3 %v9401_v11  ;;  %v2502_v1 = vmax.f32 %v2442_v21, 0.0  ;;  %v2039_v11 = vadd.f32 %v9399_v6, %v11111_v55  ;;  %v9608_v50 = vpop.f32.mrf.mxu1  ;;  %v2049_v44 = vadd.f32 %v9470_v3, %v11115_v12 }
 0x34a   : > { %v9567_v0 = vpop.f32.mrf.mxu2 }
 0x34b   : > { %v2568_v27 = vadd.f32 %v9234_v24, %v2502_v1 }
 0x34c   : > { %v9588_v38 = vpop.f32.mrf.mxu3 }
 0x34d   : > { %v9571_v47 = vpack.c.bf16 %v2568_v27, %v2566_v61 }
 0x34e   : > { %v2380_v60 = vpop.f32.mrf.mxu0 }
 0x34f   : > { %6747 = vmatmul.msk.bf16.gmra.mxu2 %vm2715_vm5, %v9571_v47  ;;  %v2444_v26 = vadd.f32 %v2380_v60, %v2039_v11 }
 0x351   : > { %6834 = vmatmul.msk.bf16.gmra.mxu0 %vm2715_vm5, %v9410_v31  ;;  %v2504_v52 = vmax.f32 %v2444_v26, 0.0  ;;  %v9619_v11 = vpop.f32.mrf.mxu1 }
 0x352   : > { %v9583_v8 = vpop.f32.mrf.mxu2 }
 0x353   : > { %v2570_v31 = vadd.f32 %v9234_v24, %v2504_v52 }
 0x354   : > { %v9604_v59 = vpop.f32.mrf.mxu3 }
 0x356   : > { %v2382_v56 = vpop.f32.mrf.mxu0 }
 0x357   : > { %v2446_v33 = vadd.f32 %v2382_v56, %v2041_v63  ;;  %v11116_v56 = vld [vmem:[#allocation43_spill] sm:$0xff] }
 0x358   : > { %v2051_v52 = vadd.f32 %v9487_v14, %v11116_v56  ;;  %v2855_v14 = vadd.f32 %v9506_v32, %v9424_v43 }
 0x359   : > { %3092 = vmatmul.bf16.gmra.mxu3 %v9429_v62  ;;  %v2506_v17 = vmax.f32 %v2446_v33, 0.0  ;;  %v2044_v62 = vadd.f32 %v9434_v58, %v11113_v37 }
 0x35a   : > { %v9592_v6 = vpop.f32.mrf.mxu2 }
 0x35b   : > { %v2572_v18 = vadd.f32 %v9234_v24, %v2506_v17 }
 0x35c   : > { %v3053_v55 = vpop.f32.mrf.mxu3 }
 0x35d   : > { %v9596_v36 = vpack.c.bf16 %v2572_v18, %v2570_v31 }
 0x35e   : > { %v2385_v53 = vpop.f32.mrf.mxu0 }
 0x35f   : > { %6748 = vmatmul.msk.bf16.gmra.mxu2 %vm2715_vm5, %v9596_v36  ;;  %v2448_v51 = vadd.f32 %v2385_v53, %v2044_v62  ;;  %v9632_v53 = vpop.f32.mrf.mxu1 }
 0x361   : > { %6835 = vmatmul.msk.bf16.gmra.mxu0 %vm2715_vm5, %v9438_v40  ;;  %v2508_v1 = vmax.f32 %v2448_v51, 0.0 }
 0x362   : > { %v2874_v30 = vpop.f32.mrf.mxu2 }
 0x363   : > { %v9606_v34 = vadd.f32 %v2874_v30, %v2790_v22  ;;  %v2574_v40 = vadd.f32 %v9234_v24, %v2508_v1 }
 0x364   : > { %v3055_v33 = vpop.f32.mrf.mxu3 }
 0x366   : > { %v2387_v21 = vpop.f32.mrf.mxu0 }
 0x367   : > { %v2450_v61 = vadd.f32 %v2387_v21, %v2046_v28  ;;  %v9647_v21 = vpop.f32.mrf.mxu1 }
 0x369   : > { %3097 = vmatmul.bf16.gmra.mxu3 %v9459_v19  ;;  %v2510_v58 = vmax.f32 %v2450_v61, 0.0  ;;  %v2857_v61 = vadd.f32 %v9517_v2, %v9440_v45 }
 0x36a   : > { %v9613_v27 = vpop.f32.mrf.mxu2 }
 0x36b   : > { %v2576_v60 = vadd.f32 %v9234_v24, %v2510_v58 }
 0x36d   : > { %v9617_v22 = vpack.c.bf16 %v2576_v60, %v2574_v40 }
 0x36e   : > { %v2390_v26 = vpop.f32.mrf.mxu0 }
 0x36f   : > { %6749 = vmatmul.msk.bf16.gmra.mxu2 %vm2715_vm5, %v9617_v22  ;;  %v2452_v63 = vadd.f32 %v2390_v26, %v2049_v44  ;;  %v2860_v26 = vadd.f32 %v9536_v29, %v9457_v9 }
 0x371   : > { %6836 = vmatmul.msk.bf16.gmra.mxu0 %vm2715_vm5, %v9466_v49  ;;  %v2512_v31 = vmax.f32 %v2452_v63, 0.0  ;;  %v2862_v63 = vadd.f32 %v9545_v15, %v9478_v46  ;;  %v2867_v15 = vadd.f32 %v9567_v0, %v9510_v10 }
 0x372   : > { %v9627_v19 = vpop.f32.mrf.mxu2 }
 0x373   : > { %v2578_v3 = vadd.f32 %v9234_v24, %v2512_v31 }
 0x376   : > { %v2392_v17 = vpop.f32.mrf.mxu0 }
 0x377   : > { %v2454_v18 = vadd.f32 %v2392_v17, %v2051_v52  ;;  %v2865_v17 = vadd.f32 %v9560_v5, %v9494_v25 }
 0x379   : > { %3102 = vmatmul.bf16.gmra.mxu3 %v9485_v16  ;;  %v2514_v37 = vmax.f32 %v2454_v18, 0.0  ;;  %v3058_v16 = vpop.f32.mrf.mxu3 }
 0x37a   : > { %v9634_v62 = vpop.f32.mrf.mxu2 }
 0x37b   : > { %v2580_v49 = vadd.f32 %v9234_v24, %v2514_v37 }
 0x37d   : > { %v9638_v30 = vpack.c.bf16 %v2580_v49, %v2578_v3 }
 0x37e   : > { %v3127_v51 = vpop.f32.mrf.mxu0 }
 0x37f   : > { %v3128_v54 = vadd.f32 %v3127_v51, %v9562_v48  ;;  %6750 = vmatmul.msk.bf16.gmra.mxu2 %vm2715_vm5, %v9638_v30 }
 0x381   : > { %v3202_v28 = vmax.f32 %v2855_v14, %v3128_v54  ;;  %6837 = vmatmul.msk.bf16.gmra.mxu0 %vm2715_vm5, %v9496_v42  ;;  %v9655_v48 = vpop.f32.mrf.mxu3  ;;  %v9661_v42 = vpop.f32.mrf.mxu1 }
 0x382   : > { %v9649_v1 = vpop.f32.mrf.mxu2 }
 0x383   : > { %v2885_v54 = vadd.f32 %v9649_v1, %v9619_v11 }
 0x386   : > { %v3129_v24 = vpop.f32.mrf.mxu0 }
 0x387   : > { %v3130_v43 = vadd.f32 %v3129_v24, %v9573_v23 }
 0x389   : > { %3107 = vmatmul.bf16.gmra.mxu3 %v9515_v4  ;;  %v3203_v32 = vmax.f32 %v2857_v61, %v3130_v43  ;;  %v3063_v2 = vpop.f32.mrf.mxu3  ;;  %v9670_v23 = vpop.f32.mrf.mxu1 }
 0x38a   : > { %v9657_v58 = vpop.f32.mrf.mxu2 }
 0x38b   : > { %v9659_v40 = vpack.c.bf16 %v3203_v32, %v3202_v28 }
 0x38e   : > { %v3132_v60 = vpop.f32.mrf.mxu0 }
 0x38f   : > { %v3133_v12 = vadd.f32 %v3132_v60, %v9588_v38 }
 0x391   : > { %v3204_v45 = vmax.f32 %v2860_v26, %v3133_v12  ;;  %6838 = vmatmul.msk.bf16.gmra.mxu0 %vm2715_vm5, %v9524_v7  ;;  %v9678_v52 = vpop.f32.mrf.mxu3  ;;  %v9682_v18 = vpop.f32.mrf.mxu1 }
 0x392   : > { %v9668_v4 = vpop.f32.mrf.mxu2 }
 0x396   : > { %v3134_v44 = vpop.f32.mrf.mxu0 }
 0x397   : > { %v3135_v56 = vadd.f32 %v3134_v44, %v9604_v59 }
 0x399   : > { %3112 = vmatmul.bf16.gmra.mxu3 %v9543_v57  ;;  %v3205_v9 = vmax.f32 %v2862_v63, %v3135_v56  ;;  %v3068_v3 = vpop.f32.mrf.mxu3  ;;  %v9690_v51 = vpop.f32.mrf.mxu1 }
 0x39a   : > { %v2891_v29 = vpop.f32.mrf.mxu2 }
 0x39b   : > { %v9676_v38 = vpack.c.bf16 %v3205_v9, %v3204_v45 }
 0x39e   : > { %v3137_v7 = vpop.f32.mrf.mxu0 }
 0x39f   : > { %v3138_v31 = vadd.f32 %v3137_v7, %v3053_v55  ;;  %v9698_v55 = vadd.f32 %v9583_v8, %v9532_v20 }
 0x3a1   : > { %v3206_v37 = vmax.f32 %v2865_v17, %v3138_v31  ;;  %6839 = vmatmul.msk.bf16.gmra.mxu0 %vm2715_vm5, %v9552_v13  ;;  %v3070_v10 = vpop.f32.mrf.mxu3 }
 0x3a2   : > { %v9686_v46 = vpop.f32.mrf.mxu2 }
 0x3a6   : > { %v3139_v57 = vpop.f32.mrf.mxu0 }
 0x3a7   : > { %v3140_v59 = vadd.f32 %v3139_v57, %v3055_v33  ;;  %v9708_v33 = vpop.f32.mrf.mxu1 }
 0x3a9   : > { %v3207_v49 = vmax.f32 %v2867_v15, %v3140_v59  ;;  %v3073_v61 = vpop.f32.mrf.mxu3  ;;  %v2892_v59 = vadd.f32 %v2891_v29, %v9661_v42  ;;  %v2880_v29 = vadd.f32 %v9627_v19, %v9590_v41 }
 0x3aa   : > { %v9692_v14 = vpop.f32.mrf.mxu2 }
 0x3ab   : > { %11117 = vst [vmem:[#allocation11_spill] sm:$0xff] %v9692_v14  ;;  %v9694_v25 = vpack.c.bf16 %v3207_v49, %v3206_v37 }
 0x3ae   : > { %v3142_v5 = vpop.f32.mrf.mxu0 }
 0x3af   : > { %v9700_v13 = vadd.f32 %v3142_v5, %v3058_v16  ;;  %v9712_v43 = vpop.f32.mrf.mxu1 }
 0x3b1   : > { %6840 = vmatmul.msk.bf16.gmra.mxu0 %vm2715_vm5, %v9571_v47  ;;  %v3075_v32 = vpop.f32.mrf.mxu3 }
 0x3b2   : > { %v9706_v0 = vpop.f32.mrf.mxu2 }
 0x3b6   : > { %v3144_v28 = vpop.f32.mrf.mxu0 }
 0x3b7   : > { %v9722_v26 = vpop.f32.mrf.mxu1  ;;  %v3145_v19 = vadd.f32 %v3144_v28, %v9655_v48  ;;  %v9768_v28 = vadd.f32 %v9706_v0, %v9690_v51  ;;  %v7744_v51 = vld [vmem:[%s11008_s6 + $0x4] sm:$0xf0] }
 0x3b9   : > { %v3078_v44 = vpop.f32.mrf.mxu3 }
 0x3ba   : > { %v9710_v24 = vpop.f32.mrf.mxu2 }
 0x3be   : > { %v3147_v20 = vpop.f32.mrf.mxu0 }
 0x3bf   : > { %v9714_v8 = vadd.f32 %v3147_v20, %v3063_v2  ;;  %v2825_v2 = vpop.f32.mrf.mxu1 }
 0x3c1   : > { %v3210_v16 = vmax.f32 %v9606_v34, %v9714_v8  ;;  %6841 = vmatmul.msk.bf16.gmra.mxu0 %vm2715_vm5, %v9596_v36  ;;  %v3080_v9 = vpop.f32.mrf.mxu3  ;;  %v2887_v8 = vadd.f32 %v9657_v58, %v9632_v53  ;;  %v9747_v53 = vadd.f32 %v9686_v46, %v9670_v23 }
 0x3c2   : > { %v9720_v47 = vpop.f32.mrf.mxu2 }
 0x3c6   : > { %v3149_v60 = vpop.f32.mrf.mxu0 }
 0x3c7   : > { %v3150_v11 = vadd.f32 %v3149_v60, %v9678_v52  ;;  %v2872_v52 = vadd.f32 %v9592_v6, %v9550_v35  ;;  %v6934_v6 = vld [vmem:[%s11008_s6 + $0x80] sm:$0xf] }
 0x3c9   : > { %v3083_v7 = vpop.f32.mrf.mxu3 }
 0x3ca   : > { %v9724_v12 = vpop.f32.mrf.mxu2 }
 0x3ce   : > { %v3152_v45 = vpop.f32.mrf.mxu0 }
 0x3d1   : > { %6842 = vmatmul.msk.bf16.gmra.mxu0 %vm2715_vm5, %v9617_v22  ;;  %v9732_v31 = vpop.f32.mrf.mxu3  ;;  %v2890_v22 = vadd.f32 %v9668_v4, %v9647_v21  ;;  %v2882_v21 = vadd.f32 %v9634_v62, %v9608_v50  ;;  %v3153_v4 = vadd.f32 %v3152_v45, %v3068_v3  ;;  %v2877_v50 = vadd.f32 %v9613_v27, %v9577_v39 }
 0x3d2   : > { %v2909_v63 = vpop.f32.mrf.mxu2  ;;  %v3209_v39 = vmax.f32 %v2872_v52, %v3145_v19  ;;  %v6878_v52 = vld [vmem:[%s11008_s6 + $0x40] sm:$0xf] }
 0x3d3   : > { %v9728_v56 = vadd.f32 %v2909_v63, %v2825_v2  ;;  %v3212_v62 = vmax.f32 %v2880_v29, %v3153_v4  ;;  %v3211_v23 = vmax.f32 %v2877_v50, %v3150_v11  ;;  %v7750_v29 = vld [vmem:[%s11008_s6 + $0x34] sm:$0xf0] }
 0x3d5   : > { %v3236_v27 = vpack.c.bf16 %v3211_v23, %v3210_v16 }
 0x3d6   : > { %v3154_v34 = vpop.f32.mrf.mxu0 }
 0x3d7   : > { %v3155_v14 = vadd.f32 %v3154_v34, %v3070_v10 }
 0x3d9   : > { %v3088_v20 = vpop.f32.mrf.mxu3  ;;  %v3213_v1 = vmax.f32 %v2882_v21, %v3155_v14 }
 0x3db   : > { %v3237_v46 = vpack.c.bf16 %v3213_v1, %v3212_v62 }
 0x3de   : > { %v3157_v36 = vpop.f32.mrf.mxu0 }
 0x3df   : > { %v3158_v2 = vadd.f32 %v3157_v36, %v3073_v61  ;;  %v6854_v36 = vld [vmem:[%s11008_s6 + $0x10] sm:$0xf] }
 0x3e1   : > { %6843 = vmatmul.msk.bf16.gmra.mxu0 %vm2715_vm5, %v9638_v30  ;;  %v3214_v42 = vmax.f32 %v2885_v54, %v3158_v2  ;;  %v9756_v41 = vpop.f32.mrf.mxu3  ;;  %v11118_v54 = vmax.f32 %v9698_v55, %v9700_v13  ;;  %v6846_v55 = vld [vmem:[%s11008_s6] sm:$0xf]  ;;  %v7748_v2 = vld [vmem:[%s11008_s6 + $0x24] sm:$0xf0] }
 0x3e2   : > { %v6847_v16 = vor.u32 %v7744_v51, %v6846_v55 }
 0x3e6   : > { %v3159_v17 = vpop.f32.mrf.mxu0 }
 0x3e7   : > { %v3160_v49 = vadd.f32 %v3159_v17, %v3075_v32  ;;  %v3235_v32 = vpack.c.bf16 %v3209_v39, %v11118_v54  ;;  %v9806_v17 = vpop.f32.mrf.mxu2  ;;  %v7752_v39 = vld [vmem:[%s11008_s6 + $0x44] sm:$0xf0] }
 0x3e8   : > { %v6879_v54 = vor.u32 %v7752_v39, %v6878_v52 }
 0x3e9   : > { %v3093_v60 = vpop.f32.mrf.mxu3 }
 0x3ee   : > { %v3162_v37 = vpop.f32.mrf.mxu0 }
 0x3ef   : > { %v3163_v57 = vadd.f32 %v3162_v37, %v3078_v44  ;;  %v3215_v44 = vmax.f32 %v2887_v8, %v3160_v49  ;;  %v9816_v49 = vpop.f32.mrf.mxu2  ;;  %v6862_v8 = vld [vmem:[%s11008_s6 + $0x20] sm:$0xf] }
 0x3f1   : > { %v3216_v30 = vmax.f32 %v2890_v22, %v3163_v57  ;;  %v3238_v61 = vpack.c.bf16 %v3215_v44, %v3214_v42  ;;  %v9784_v13 = vpop.f32.mrf.mxu3  ;;  %v6870_v42 = vld [vmem:[%s11008_s6 + $0x30] sm:$0xf] }
 0x3f2   : > { %v6871_v50 = vor.u32 %v7750_v29, %v6870_v42 }
 0x3f6   : > { %v3164_v15 = vpop.f32.mrf.mxu0 }
 0x3f7   : > { %v3165_v5 = vadd.f32 %v3164_v15, %v3080_v9  ;;  %v2916_v44 = vpop.f32.mrf.mxu2 }
 0x3f9   : > { %v3217_v63 = vmax.f32 %v2892_v59, %v3165_v5  ;;  %v3098_v34 = vpop.f32.mrf.mxu3 }
 0x3fb   : > { %v3239_v37 = vpack.c.bf16 %v3217_v63, %v3216_v30  ;;  %v6863_v63 = vor.u32 %v7748_v2, %v6862_v8 }
 0x3fd   : > { %3363 = vmatpush.bf16.msrb.mxu1 %v3239_v37  ;;  %3574 = vmatpush.bf16.msrb.mxu3 %v3239_v37 }
 0x3fe   : > { %v3167_v58 = vpop.f32.mrf.mxu0 }
 0x3ff   : > { %v9750_v10 = vadd.f32 %v3167_v58, %v3083_v7  ;;  %v2919_v58 = vpop.f32.mrf.mxu2 }
 0x401   : > { %3364 = vmatpush.bf16.msrb.mxu1 %v3238_v61  ;;  %3575 = vmatpush.bf16.msrb.mxu3 %v3238_v61  ;;  %v9810_v57 = vpop.f32.mrf.mxu3 }
 0x405   : > { %3365 = vmatpush.bf16.msrb.mxu1 %v3237_v46  ;;  %3576 = vmatpush.bf16.msrb.mxu3 %v3237_v46 }
 0x406   : > { %v9761_v14 = vpop.f32.mrf.mxu0 }
 0x407   : > { %v2921_v19 = vpop.f32.mrf.mxu2 }
 0x409   : > { %3366 = vmatpush.bf16.msrb.mxu1 %v3236_v27  ;;  %3577 = vmatpush.bf16.msrb.mxu3 %v3236_v27 }
 0x40d   : > { %3367 = vmatpush.bf16.msrb.mxu1 %v3235_v32  ;;  %3578 = vmatpush.bf16.msrb.mxu3 %v3235_v32 }
 0x40e   : > { %v3172_v48 = vpop.f32.mrf.mxu0 }
 0x40f   : > { %v9770_v35 = vadd.f32 %v3172_v48, %v3088_v20  ;;  %v3103_v20 = vpop.f32.mrf.mxu3  ;;  %v2924_v32 = vpop.f32.mrf.mxu2 }
 0x411   : > { %3368 = vmatpush.bf16.msrb.mxu1 %v9694_v25  ;;  %3579 = vmatpush.bf16.msrb.mxu3 %v9694_v25 }
 0x415   : > { %3369 = vmatpush.bf16.msrb.mxu1 %v9676_v38  ;;  %3580 = vmatpush.bf16.msrb.mxu3 %v9676_v38  ;;  %v9792_v38 = vadd.f32 %v9720_v47, %v9712_v43  ;;  %v9808_v47 = vpop.f32.mrf.mxu1 }
 0x416   : > { %v9786_v0 = vpop.f32.mrf.mxu0 }
 0x417   : > { %v3105_v21 = vpop.f32.mrf.mxu3  ;;  %v2926_v51 = vpop.f32.mrf.mxu2 }
 0x419   : > { %3370 = vmatpush.bf16.msrb.mxu1 %v9659_v40  ;;  %3581 = vmatpush.bf16.msrb.mxu3 %v9659_v40  ;;  %v7746_v40 = vld [vmem:[%s11008_s6 + $0x14] sm:$0xf0] }
 0x41a   : > { %v6855_v43 = vor.u32 %v7746_v40, %v6854_v36  ;;  %v7754_v36 = vld [vmem:[%s11008_s6 + $0x54] sm:$0xf0] }
 0x41c   : > { %3371 = vmatmul.bf16.vlgmr.msrb.gmra.mxu1 %v6847_v16 }
 0x41d   : > { %v9818_v5 = vpop.f32.mrf.mxu1 }
 0x41e   : > { %v3177_v25 = vpop.f32.mrf.mxu0 }
 0x41f   : > { %v9794_v45 = vadd.f32 %v3177_v25, %v3093_v60  ;;  %v3108_v61 = vpop.f32.mrf.mxu3 }
 0x421   : > { %v3222_v9 = vmax.f32 %v9792_v38, %v9794_v45  ;;  %v7743_v45 = vld [vmem:[%s11008_s6 + $0x4] sm:$0xf] }
 0x425   : > { %v2832_v37 = vpop.f32.mrf.mxu1 }
 0x426   : > { %v9804_v7 = vpop.f32.mrf.mxu0 }
 0x427   : > { %v3110_v46 = vpop.f32.mrf.mxu3 }
 0x42c   : > { %3376 = vmatmul.bf16.gmra.mxu1 %v6855_v43 }
 0x42d   : > { %v2835_v1 = vpop.f32.mrf.mxu1 }
 0x42e   : > { %v3182_v15 = vpop.f32.mrf.mxu0 }
 0x42f   : > { %v9812_v22 = vadd.f32 %v3182_v15, %v3098_v34  ;;  %v3113_v48 = vpop.f32.mrf.mxu3  ;;  %v6886_v34 = vld [vmem:[%s11008_s6 + $0x50] sm:$0xf] }
 0x430   : > { %v6887_v42 = vor.u32 %v7754_v36, %v6886_v34  ;;  %v6936_v34 = vld [vmem:[%s11008_s6 + $0x88] sm:$0xf0] }
 0x431   : > { %v3224_v59 = vmax.f32 %v9728_v56, %v9812_v22  ;;  %v6942_v56 = vld [vmem:[%s11008_s6 + $0x90] sm:$0xf] }
 0x435   : > { %v2837_v23 = vpop.f32.mrf.mxu1 }
 0x436   : > { %v3184_v30 = vpop.f32.mrf.mxu0  ;;  %v2922_v52 = vadd.f32 %v2921_v19, %v2837_v23  ;;  %v7745_v23 = vld [vmem:[%s11008_s6 + $0x14] sm:$0xf] }
 0x437   : > { %v3115_v40 = vpop.f32.mrf.mxu3 }
 0x43c   : > { %3381 = vmatmul.bf16.gmra.mxu1 %v6863_v63 }
 0x43d   : > { %v2840_v60 = vpop.f32.mrf.mxu1 }
 0x43e   : > { %v3187_v4 = vpop.f32.mrf.mxu0  ;;  %v2925_v15 = vadd.f32 %v2924_v32, %v2840_v60  ;;  %v7760_v32 = vld [vmem:[%s11008_s6 + $0x84] sm:$0xf0]  ;;  %v2917_v60 = vadd.f32 %v2916_v44, %v2832_v37  ;;  %v6894_v37 = vld [vmem:[%s11008_s6 + $0x60] sm:$0xf] }
 0x445   : > { %v2842_v16 = vpop.f32.mrf.mxu1 }
 0x446   : > { %v3189_v11 = vpop.f32.mrf.mxu0  ;;  %v2927_v8 = vadd.f32 %v2926_v51, %v2842_v16  ;;  %v3188_v51 = vadd.f32 %v3187_v4, %v3103_v20  ;;  %v6856_v16 = vld [vmem:[%s11008_s6 + $0x18] sm:$0xf0] }
 0x447   : > { %v6859_v36 = vor.u32 %v7745_v23, %v6856_v16 }
 0x44c   : > { %3386 = vmatmul.bf16.gmra.mxu1 %v6871_v50 }
 0x44e   : > { %v3192_v62 = vpop.f32.mrf.mxu0 }
 0x44f   : > { %v3193_v39 = vadd.f32 %v3192_v62, %v3108_v61  ;;  %v2912_v61 = vadd.f32 %v9806_v17, %v9808_v47  ;;  %v3175_v17 = vadd.f32 %v9786_v0, %v9756_v41  ;;  %v7762_v41 = vld [vmem:[%s11008_s6 + $0x94] sm:$0xf0]  ;;  %v11120_v0 = vmax.f32 %v9768_v28, %v9770_v35  ;;  %v6902_v28 = vld [vmem:[%s11008_s6 + $0x70] sm:$0xf] }
 0x450   : > { %v7758_v35 = vld [vmem:[%s11008_s6 + $0x74] sm:$0xf0] }
 0x456   : > { %v3194_v27 = vpop.f32.mrf.mxu0 }
 0x457   : > { %v3195_v63 = vadd.f32 %v3194_v27, %v3110_v46  ;;  %v6935_v27 = vor.u32 %v7760_v32, %v6934_v6  ;;  %v3180_v6 = vadd.f32 %v9804_v7, %v9784_v13  ;;  %v7768_v32 = vld [vmem:[%s11008_s6 + $0xc4] sm:$0xf0] }
 0x459   : > { %v3229_v3 = vmax.f32 %v2922_v52, %v3195_v63  ;;  %3582 = vmatmul.bf16.vlgmr.msrb.gmra.mxu3 %v6935_v27  ;;  %v6944_v52 = vld [vmem:[%s11008_s6 + $0x98] sm:$0xf0] }
 0x45c   : > { %3391 = vmatmul.bf16.gmra.mxu1 %v6879_v54 }
 0x45e   : > { %v3197_v55 = vpop.f32.mrf.mxu0 }
 0x45f   : > { %v3198_v25 = vadd.f32 %v3197_v55, %v3113_v48  ;;  %v2920_v48 = vadd.f32 %v2919_v58, %v2835_v1  ;;  %v3190_v55 = vadd.f32 %v3189_v11, %v3105_v21  ;;  %v2915_v21 = vadd.f32 %v9816_v49, %v9818_v5 }
 0x460   : > { %v3185_v58 = vadd.f32 %v3184_v30, %v9810_v57  ;;  %v7756_v57 = vld [vmem:[%s11008_s6 + $0x64] sm:$0xf0]  ;;  %v2902_v49 = vadd.f32 %v9710_v24, %v9708_v33  ;;  %v3170_v5 = vadd.f32 %v9761_v14, %v9732_v31  ;;  %v11119_v33 = vld [vmem:[#allocation11_spill] sm:$0xff]  ;;  %v6943_v31 = vor.u32 %v7762_v41, %v6942_v56  ;;  %v6888_v56 = vld [vmem:[%s11008_s6 + $0x58] sm:$0xf0] }
 0x461   : > { %v3230_v29 = vmax.f32 %v2925_v15, %v3198_v25  ;;  %v3228_v19 = vmax.f32 %v2920_v48, %v3193_v39  ;;  %v3227_v11 = vmax.f32 %v2917_v60, %v3190_v55  ;;  %v3226_v62 = vmax.f32 %v2915_v21, %v3188_v51  ;;  %v7759_v25 = vld [vmem:[%s11008_s6 + $0x84] sm:$0xf]  ;;  %v6958_v15 = vld [vmem:[%s11008_s6 + $0xb0] sm:$0xf]  ;;  %v6966_v55 = vld [vmem:[%s11008_s6 + $0xc0] sm:$0xf] }
 0x462   : > { %v3225_v20 = vmax.f32 %v2912_v61, %v3185_v58  ;;  %v6895_v7 = vor.u32 %v7756_v57, %v6894_v37  ;;  %v2897_v24 = vadd.f32 %v11119_v33, %v9682_v18  ;;  %v11121_v18 = vmax.f32 %v9747_v53, %v9750_v10  ;;  %v6950_v53 = vld [vmem:[%s11008_s6 + $0xa0] sm:$0xf]  ;;  %v7764_v10 = vld [vmem:[%s11008_s6 + $0xa4] sm:$0xf0]  ;;  %v7749_v60 = vld [vmem:[%s11008_s6 + $0x34] sm:$0xf] }
 0x463   : > { %v3245_v1 = vpack.c.bf16 %v3229_v3, %v3228_v19  ;;  %v3244_v44 = vpack.c.bf16 %v3227_v11, %v3226_v62  ;;  %v2907_v3 = vadd.f32 %v9724_v12, %v9722_v26  ;;  %v3221_v26 = vmax.f32 %v2902_v49, %v3175_v17  ;;  %v6872_v51 = vld [vmem:[%s11008_s6 + $0x38] sm:$0xf0]  ;;  %v7763_v19 = vld [vmem:[%s11008_s6 + $0xa4] sm:$0xf]  ;;  %v6952_v21 = vld [vmem:[%s11008_s6 + $0xa8] sm:$0xf0] }
 0x464   : > { %v3243_v13 = vpack.c.bf16 %v3225_v20, %v3224_v59  ;;  %v3219_v14 = vmax.f32 %v2897_v24, %v3170_v5  ;;  %v6903_v30 = vor.u32 %v7758_v35, %v6902_v28  ;;  %v6951_v4 = vor.u32 %v7764_v10, %v6950_v53  ;;  %v6974_v61 = vld [vmem:[%s11008_s6 + $0xd0] sm:$0xf]  ;;  %v7770_v62 = vld [vmem:[%s11008_s6 + $0xd4] sm:$0xf0]  ;;  %v6880_v37 = vld [vmem:[%s11008_s6 + $0x48] sm:$0xf0] }
 0x465   : > { %v3223_v47 = vmax.f32 %v2907_v3, %v3180_v6  ;;  %v3241_v38 = vpack.c.bf16 %v3221_v26, %v11120_v0  ;;  %v6875_v58 = vor.u32 %v7749_v60, %v6872_v51  ;;  %v6955_v11 = vor.u32 %v7763_v19, %v6952_v21  ;;  %v7765_v57 = vld [vmem:[%s11008_s6 + $0xb4] sm:$0xf]  ;;  %v6960_v3 = vld [vmem:[%s11008_s6 + $0xb8] sm:$0xf0]  ;;  %v7772_v49 = vld [vmem:[%s11008_s6 + $0xe4] sm:$0xf0] }
 0x466   : > { %v3199_v43 = vpop.f32.mrf.mxu0  ;;  %v3240_v22 = vpack.c.bf16 %v3219_v14, %v11121_v18  ;;  %v6975_v6 = vor.u32 %v7770_v62, %v6974_v61  ;;  %v7767_v41 = vld [vmem:[%s11008_s6 + $0xc4] sm:$0xf]  ;;  %v6968_v33 = vld [vmem:[%s11008_s6 + $0xc8] sm:$0xf0]  ;;  %v6990_v0 = vld [vmem:[%s11008_s6 + $0xf0] sm:$0xf] }
 0x467   : > { %v3200_v2 = vadd.f32 %v3199_v43, %v3115_v40  ;;  %v3242_v12 = vpack.c.bf16 %v3223_v47, %v3222_v9  ;;  %v6848_v9 = vld [vmem:[%s11008_s6 + $0x8] sm:$0xf0]  ;;  %v6939_v40 = vor.u32 %v7759_v25, %v6936_v34  ;;  %v6963_v47 = vor.u32 %v7765_v57, %v6960_v3  ;;  %v7755_v18 = vld [vmem:[%s11008_s6 + $0x64] sm:$0xf]  ;;  %v7769_v28 = vld [vmem:[%s11008_s6 + $0xd4] sm:$0xf] }
 0x468   : > { %v6851_v59 = vor.u32 %v7743_v45, %v6848_v9  ;;  %v6976_v35 = vld [vmem:[%s11008_s6 + $0xd8] sm:$0xf0]  ;;  %v3700_v10 = vld [vmem:[%s11009_s7 + $0x30] sm:$0xf]  ;;  %v7780_v34 = vld [vmem:[%s11009_s7 + $0x28] sm:$0xff] }
 0x469   : > { %v3231_v50 = vmax.f32 %v2927_v8, %v3200_v2  ;;  %3587 = vmatmul.bf16.gmra.mxu3 %v6943_v31  ;;  %v7766_v8 = vld [vmem:[%s11008_s6 + $0xb4] sm:$0xf0]  ;;  %v6971_v31 = vor.u32 %v7767_v41, %v6968_v33  ;;  %v7792_v62 = vld [vmem:[%s11009_s7 + $0x90] sm:$0xff]  ;;  %v7775_v57 = vld [vmem:[%s11009_s7] sm:$0xff] }
 0x46a   : > { %v6959_v2 = vor.u32 %v7766_v8, %v6958_v15  ;;  %v7779_v15 = vld [vmem:[%s11009_s7 + $0x20] sm:$0xff]  ;;  %v7789_v41 = vld [vmem:[%s11009_s7 + $0x78] sm:$0xff] }
 0x46b   : > { %v3246_v54 = vpack.c.bf16 %v3231_v50, %v3230_v29  ;;  %v6864_v29 = vld [vmem:[%s11008_s6 + $0x28] sm:$0xf0]  ;;  %v7761_v50 = vld [vmem:[%s11008_s6 + $0x94] sm:$0xf]  ;;  %v7771_v8 = vld [vmem:[%s11008_s6 + $0xe4] sm:$0xf] }
 0x46c   : > { %3396 = vmatmul.bf16.gmra.mxu1 %v6887_v42  ;;  %v7747_v42 = vld [vmem:[%s11008_s6 + $0x24] sm:$0xf]  ;;  %v7786_v3 = vld [vmem:[%s11009_s7 + $0x5c] sm:$0xff] }
 0x46d   : > { %v3361_v46 = vsel %vm835_vm0, %v3246_v54, 0  ;;  %v6867_v39 = vor.u32 %v7747_v42, %v6864_v29  ;;  %v6947_v54 = vor.u32 %v7761_v50, %v6944_v52  ;;  %v7778_v52 = vld [vmem:[%s11009_s7 + $0x18] sm:$0xff] }
 0x46e   : > { %3413 = vmatpush.bf16.msrb.mxu2 %v3361_v46  ;;  %3624 = vmatpush.bf16.msra.mxu1 %v3361_v46  ;;  %v6967_v46 = vor.u32 %v7768_v32, %v6966_v55  ;;  %v7093_v55 = vld [vmem:[%s11009_s7 + $0x98] sm:$0xf] }
 0x46f   : > { %v4072_v32 = vunpack.c.l.b16 %v7093_v55  ;;  %v4217_v55 = vld [vmem:[%s11011_s9 + $0x18] sm:$0xff] }
 0x471   : > { %v4079_v60 = vpack.c.b16 %v4072_v32, %v4072_v32 }
 0x472   : > { %3414 = vmatpush.bf16.msrb.mxu2 %v3245_v1  ;;  %3625 = vmatpush.bf16.msra.mxu1 %v3245_v1 }
 0x473   : > { %v4111_v21 = vsel %vm3850_vm7, %v4079_v60, 0 }
 0x474   : > { %4114 = vmatpush.bf16.msra.mxu0 %v4111_v21 }
 0x476   : > { %3415 = vmatpush.bf16.msrb.mxu2 %v3244_v44  ;;  %3626 = vmatpush.bf16.msra.mxu1 %v3244_v44  ;;  %v7751_v44 = vld [vmem:[%s11008_s6 + $0x44] sm:$0xf] }
 0x477   : > { %v6883_v17 = vor.u32 %v7751_v44, %v6880_v37  ;;  %v6992_v44 = vld [vmem:[%s11008_s6 + $0xf8] sm:$0xf0] }
 0x478   : > { %4115 = vmatpush.bf16.msra.mxu0 %v7792_v62 }
 0x479   : > { %3592 = vmatmul.bf16.gmra.mxu3 %v6951_v4  ;;  %v3928_v4 = vunpack.c.l.b16 %v3700_v10  ;;  %v4214_v10 = vld [vmem:[%s11011_s9] sm:$0xff] }
 0x47a   : > { %3416 = vmatpush.bf16.msrb.mxu2 %v3243_v13  ;;  %3627 = vmatpush.bf16.msra.mxu1 %v3243_v13 }
 0x47b   : > { %v3935_v23 = vpack.c.b16 %v3928_v4, %v3928_v4 }
 0x47c   : > { %3401 = vmatmul.bf16.gmra.mxu1 %v6895_v7  ;;  %v6982_v7 = vld [vmem:[%s11008_s6 + $0xe0] sm:$0xf] }
 0x47d   : > { %v6983_v5 = vor.u32 %v7772_v49, %v6982_v7  ;;  %v3959_v16 = vsel %vm3850_vm7, %v3935_v23, 0  ;;  %v7785_v49 = vld [vmem:[%s11009_s7 + $0x54] sm:$0xff] }
 0x47e   : > { %3417 = vmatpush.bf16.msrb.mxu2 %v3242_v12  ;;  %3628 = vmatpush.bf16.msra.mxu1 %v3242_v12  ;;  %v7753_v12 = vld [vmem:[%s11008_s6 + $0x54] sm:$0xf] }
 0x47f   : > { %v6891_v24 = vor.u32 %v7753_v12, %v6888_v56  ;;  %3962 = vmatpush.bf16.msra.mxu3 %v3959_v16  ;;  %v7790_v12 = vld [vmem:[%s11009_s7 + $0x80] sm:$0xff]  ;;  %v7784_v56 = vld [vmem:[%s11009_s7 + $0x4c] sm:$0xff] }
 0x482   : > { %3418 = vmatpush.bf16.msrb.mxu2 %v3241_v38  ;;  %3629 = vmatpush.bf16.msra.mxu1 %v3241_v38  ;;  %v7774_v38 = vld [vmem:[%s11008_s6 + $0xf4] sm:$0xf0] }
 0x483   : > { %v6991_v45 = vor.u32 %v7774_v38, %v6990_v0  ;;  %3963 = vmatpush.bf16.msra.mxu3 %v7780_v34  ;;  %v7788_v38 = vld [vmem:[%s11009_s7 + $0x70] sm:$0xff] }
 0x486   : > { %3419 = vmatpush.bf16.msrb.mxu2 %v3240_v22  ;;  %3630 = vmatpush.bf16.msra.mxu1 %v3240_v22  ;;  %v6896_v22 = vld [vmem:[%s11008_s6 + $0x68] sm:$0xf0] }
 0x487   : > { %3964 = vmatpush.bf16.msra.mxu3 %v7779_v15 }
 0x489   : > { %6908 = vmatmul.msk.bf16.vlgmr.msrb.gmra.mxu2 %vm3335_vm6, %v6851_v59  ;;  %3597 = vmatmul.bf16.gmra.mxu3 %v6959_v2  ;;  %v6899_v59 = vor.u32 %v7755_v18, %v6896_v22  ;;  %v6984_v2 = vld [vmem:[%s11008_s6 + $0xe8] sm:$0xf0] }
 0x48a   : > { %v6987_v29 = vor.u32 %v7771_v8, %v6984_v2  ;;  %v7787_v18 = vld [vmem:[%s11009_s7 + $0x68] sm:$0xff] }
 0x48b   : > { %3965 = vmatpush.bf16.msra.mxu3 %v7778_v52  ;;  %v4216_v52 = vld [vmem:[%s11011_s9 + $0x10] sm:$0xff] }
 0x48c   : > { %3406 = vmatmul.bf16.gmra.mxu1 %v6903_v30  ;;  %v6979_v30 = vor.u32 %v7769_v28, %v6976_v35  ;;  %v7781_v35 = vld [vmem:[%s11009_s7 + $0x34] sm:$0xff] }
 0x499   : > { %v9923_v43 = vpop.f32.mrf.mxu1  ;;  %6909 = vmatmul.msk.bf16.gmra.mxu2 %vm3335_vm6, %v6859_v36  ;;  %3602 = vmatmul.bf16.gmra.mxu3 %v6967_v46  ;;  %v7757_v36 = vld [vmem:[%s11008_s6 + $0x74] sm:$0xf]  ;;  %v7016_v46 = vld [vmem:[%s11009_s7 + $0x64] sm:$0xf] }
 0x49a   : > { %v3811_v51 = vunpack.c.l.b16 %v7016_v46 }
 0x49c   : > { %6996 = vmatmul.msk.bf16.vlgmr.msra.gmra.mxu1 %vm3335_vm6, %v6939_v40  ;;  %v6904_v40 = vld [vmem:[%s11008_s6 + $0x78] sm:$0xf0] }
 0x49d   : > { %v6907_v42 = vor.u32 %v7757_v36, %v6904_v40 }
 0x4a1   : > { %v9933_v63 = vpop.f32.mrf.mxu1 }
 0x4a9   : > { %v9947_v48 = vpop.f32.mrf.mxu1  ;;  %6910 = vmatmul.msk.bf16.gmra.mxu2 %vm3335_vm6, %v6867_v39  ;;  %3607 = vmatmul.bf16.gmra.mxu3 %v6975_v6  ;;  %v7773_v6 = vld [vmem:[%s11008_s6 + $0xf4] sm:$0xf] }
 0x4ac   : > { %6997 = vmatmul.msk.bf16.gmra.mxu1 %vm3335_vm6, %v6947_v54  ;;  %v7777_v54 = vld [vmem:[%s11009_s7 + $0x10] sm:$0xff] }
 0x4ad   : > { %3966 = vmatpush.bf16.msra.mxu3 %v7777_v54  ;;  %v4220_v54 = vld [vmem:[%s11011_s9 + $0x30] sm:$0xff] }
 0x4b1   : > { %v9957_v27 = vpop.f32.mrf.mxu1 }
 0x4b9   : > { %v9971_v1 = vpop.f32.mrf.mxu1  ;;  %6911 = vmatmul.msk.bf16.gmra.mxu2 %vm3335_vm6, %v6875_v58  ;;  %3612 = vmatmul.bf16.gmra.mxu3 %v6983_v5  ;;  %v7776_v58 = vld [vmem:[%s11009_s7 + $0x8] sm:$0xff] }
 0x4ba   : > { %3967 = vmatpush.bf16.msra.mxu3 %v7776_v58 }
 0x4bc   : > { %6998 = vmatmul.msk.bf16.gmra.mxu1 %vm3335_vm6, %v6955_v11  ;;  %v3818_v11 = vpack.c.b16 %v3811_v51, %v3811_v51 }
 0x4be   : > { %v3852_v61 = vsel %vm3850_vm7, %v3818_v11, 0  ;;  %3968 = vmatpush.bf16.msra.mxu3 %v7775_v57 }
 0x4bf   : > { %3855 = vmatpush.bf16.msra.mxu2 %v3852_v61 }
 0x4c1   : > { %v9981_v20 = vpop.f32.mrf.mxu1 }
 0x4c3   : > { %3856 = vmatpush.bf16.msra.mxu2 %v7786_v3  ;;  %v4221_v3 = vld [vmem:[%s11011_s9 + $0x38] sm:$0xff] }
 0x4c7   : > { %3857 = vmatpush.bf16.msra.mxu2 %v7785_v49 }
 0x4c9   : > { %v9995_v13 = vpop.f32.mrf.mxu1  ;;  %6912 = vmatmul.msk.bf16.gmra.mxu2 %vm3335_vm6, %v6883_v17  ;;  %3617 = vmatmul.bf16.gmra.mxu3 %v6991_v45  ;;  %v6995_v17 = vor.u32 %v7773_v6, %v6992_v44  ;;  %v7782_v45 = vld [vmem:[%s11009_s7 + $0x3c] sm:$0xff]  ;;  %v4223_v6 = vld [vmem:[%s11011_s9 + $0x48] sm:$0xff] }
 0x4cb   : > { %3858 = vmatpush.bf16.msra.mxu2 %v7784_v56 }
 0x4cc   : > { %6999 = vmatmul.msk.bf16.gmra.mxu1 %vm3335_vm6, %v6963_v47  ;;  %v7791_v47 = vld [vmem:[%s11009_s7 + $0x88] sm:$0xff] }
 0x4cd   : > { %4116 = vmatpush.bf16.msra.mxu0 %v7791_v47 }
 0x4d1   : > { %v10005_v26 = vpop.f32.mrf.mxu1  ;;  %4117 = vmatpush.bf16.msra.mxu0 %v7790_v12 }
 0x4d5   : > { %4118 = vmatpush.bf16.msra.mxu0 %v7789_v41 }
 0x4d9   : > { %v10019_v14 = vpop.f32.mrf.mxu1  ;;  %6913 = vmatmul.msk.bf16.gmra.mxu2 %vm3335_vm6, %v6891_v24  ;;  %4119 = vmatpush.bf16.msra.mxu0 %v7788_v38 }
 0x4dc   : > { %7000 = vmatmul.msk.bf16.gmra.mxu1 %vm3335_vm6, %v6971_v31  ;;  %v10077_v39 = vpop.f32.mrf.mxu3  ;;  %v7783_v31 = vld [vmem:[%s11009_s7 + $0x44] sm:$0xff] }
 0x4dd   : > { %3859 = vmatpush.bf16.msra.mxu2 %v7783_v31  ;;  %4120 = vmatpush.bf16.msra.mxu0 %v7787_v18  ;;  %v4226_v31 = vld [vmem:[%s11011_s9 + $0x60] sm:$0xff] }
 0x4e1   : > { %v10029_v9 = vpop.f32.mrf.mxu1  ;;  %3860 = vmatpush.bf16.msra.mxu2 %v7782_v45 }
 0x4e4   : > { %v3585_v37 = vpop.f32.mrf.mxu3 }
 0x4e5   : > { %3861 = vmatpush.bf16.msra.mxu2 %v7781_v35 }
 0x4e9   : > { %v10043_v53 = vpop.f32.mrf.mxu1  ;;  %6914 = vmatmul.msk.bf16.gmra.mxu2 %vm3335_vm6, %v6899_v59 }
 0x4ec   : > { %7001 = vmatmul.msk.bf16.gmra.mxu1 %vm3335_vm6, %v6979_v30  ;;  %v3588_v33 = vpop.f32.mrf.mxu3  ;;  %v8010_v30 = vmov 0  }
 0x4ed   : > { %7935 = vset.pattern.permute.xlu0 %v8010_v30  ;;  %7936 = vset.pattern.permute.xlu1 %v8010_v30 }
 0x4ee   : > { %4232 = vperm.xlu0 %7935, %v4214_v10   ;;  %7937 = vset.pattern.permute.xlu2 %v8010_v30 }
 0x4ef   : > { %4242 = vperm.xlu1 %7936, %v4216_v52   ;;  %v4218_v52 = vld [vmem:[%s11011_s9 + $0x20] sm:$0xff] }
 0x4f0   : > { %4252 = vperm.xlu2 %7937, %v4218_v52  }
 0x4f1   : > { %v10051_v25 = vpop.f32.mrf.mxu1 }
 0x4f4   : > { %v3590_v28 = vpop.f32.mrf.mxu3 }
 0x4f7   : > { %4247 = vperm.xlu1 %7936, %v4217_v55  }
 0x4f9   : > { %v10071_v50 = vpop.f32.mrf.mxu1  ;;  %6915 = vmatmul.msk.bf16.gmra.mxu2 %vm3335_vm6, %v6907_v42  ;;  %v4215_v42 = vld [vmem:[%s11011_s9 + $0x8] sm:$0xff] }
 0x4fa   : > { %4237 = vperm.xlu0 %7935, %v4215_v42  }
 0x4fc   : > { %7002 = vmatmul.msk.bf16.gmra.mxu1 %vm3335_vm6, %v6987_v29  ;;  %v3593_v40 = vpop.f32.mrf.mxu3 }
 0x4ff   : > { %4267 = vperm.xlu1 %7936, %v4221_v3  }
 0x501   : > { %v10089_v19 = vpop.f32.mrf.mxu1 }
 0x502   : > { %4262 = vperm.xlu0 %7935, %v4220_v54  }
 0x509   : > { %v10114_v7 = vpop.f32.mrf.mxu1 }
 0x50a   : > { %4277 = vperm.xlu0 %7935, %v4223_v6  }
 0x50c   : > { %7003 = vmatmul.msk.bf16.gmra.mxu1 %vm3335_vm6, %v6995_v17  ;;  %v3421_v5 = vpop.f32.mrf.mxu2 }
 0x50d   : > { %v3422_v16 = vadd.f32 %v3421_v5, %v9923_v43 }
 0x511   : > { %v10129_v24 = vpop.f32.mrf.mxu1 }
 0x512   : > { %4292 = vperm.xlu0 %7935, %v4226_v31   ;;  %v4225_v31 = vld [vmem:[%s11011_s9 + $0x58] sm:$0xff] }
 0x514   : > { %v3423_v0 = vpop.f32.mrf.mxu2 }
 0x515   : > { %v3424_v34 = vadd.f32 %v3423_v0, %v9933_v63  ;;  %v4224_v0 = vld [vmem:[%s11011_s9 + $0x50] sm:$0xff] }
 0x516   : > { %4282 = vperm.xlu1 %7936, %v4224_v0  }
 0x519   : > { %v3632_v22 = vpop.f32.mrf.mxu1 }
 0x51a   : > { %v3633_v4 = vadd.f32 %v3632_v22, %v10077_v39  ;;  %v3595_v39 = vpop.f32.mrf.mxu3 }
 0x51c   : > { %v3426_v59 = vpop.f32.mrf.mxu2  ;;  %v3672_v15 = vmax.f32 %v3422_v16, %v3633_v4  ;;  %v4229_v4 = vld [vmem:[%s11011_s9 + $0x78] sm:$0x3f]  ;;  %v4227_v16 = vld [vmem:[%s11011_s9 + $0x68] sm:$0xff] }
 0x51d   : > { %v3427_v60 = vadd.f32 %v3426_v59, %v9947_v48  ;;  %4307 = vperm.xlu0 %7935, %v4229_v4  }
 0x51e   : > { %4297 = vperm.xlu1 %7936, %v4227_v16  }
 0x521   : > { %v3634_v23 = vpop.f32.mrf.mxu1 }
 0x522   : > { %v3635_v36 = vadd.f32 %v3634_v23, %v3585_v37  ;;  %v3598_v57 = vpop.f32.mrf.mxu3 }
 0x524   : > { %v3673_v8 = vmax.f32 %v3424_v34, %v3635_v36  ;;  %v3428_v2 = vpop.f32.mrf.mxu2 }
 0x525   : > { %v3429_v21 = vadd.f32 %v3428_v2, %v9957_v27 }
 0x526   : > { %v3701_v29 = vpack.c.bf16 %v3673_v8, %v3672_v15 }
 0x528   : > { %7073 = vmatmul.msk.bf16.vlgmr.msra.gmra.mxu3 %vm3825_vm8, %v3701_v29  ;;  %v3726_v51 = vshll.u32 %v3701_v29, 16  ;;  %v3724_v48 = vshrl.u32 %v3701_v29, 16  ;;  %v4032_v27 = vrot.slane %v3701_v29, 1 }
 0x529   : > { %v3637_v43 = vpop.f32.mrf.mxu1 }
 0x52a   : > { %v3638_v32 = vadd.f32 %v3637_v43, %v3588_v33  ;;  %v3728_v44 = vrot.slane %v3726_v51, 1  ;;  %v3600_v18 = vpop.f32.mrf.mxu3 }
 0x52c   : > { %v3431_v63 = vpop.f32.mrf.mxu2  ;;  %v3674_v11 = vmax.f32 %v3427_v60, %v3638_v32  ;;  %v3729_v12 = vor.u32 %v3728_v44, %v3724_v48  ;;  %v4222_v48 = vld [vmem:[%s11011_s9 + $0x40] sm:$0xff] }
 0x52d   : > { %v3432_v22 = vadd.f32 %v3431_v63, %v9971_v1 }
 0x531   : > { %v3639_v46 = vpop.f32.mrf.mxu1 }
 0x532   : > { %v3640_v58 = vadd.f32 %v3639_v46, %v3590_v28  ;;  %v3603_v2 = vpop.f32.mrf.mxu3 }
 0x534   : > { %v3675_v61 = vmax.f32 %v3429_v21, %v3640_v58  ;;  %v3433_v62 = vpop.f32.mrf.mxu2  ;;  %v4219_v58 = vld [vmem:[%s11011_s9 + $0x28] sm:$0xff] }
 0x535   : > { %v3434_v28 = vadd.f32 %v3433_v62, %v9981_v20  ;;  %4257 = vperm.xlu2 %7937, %v4219_v58  }
 0x536   : > { %v3702_v37 = vpack.c.bf16 %v3675_v61, %v3674_v11 }
 0x538   : > { %7074 = vmatmul.msk.bf16.gmra.mxu3 %vm3825_vm8, %v3702_v37  ;;  %v4033_v17 = vrot.slane %v3702_v37, 1  ;;  %v3731_v47 = vshll.u32 %v3702_v37, 16  ;;  %v3735_v1 = vshrl.u32 %v3702_v37, 16 }
 0x539   : > { %v3642_v49 = vpop.f32.mrf.mxu1 }
 0x53a   : > { %v4034_v5 = vsel %vm1071_vm2, %v4032_v27, %v4033_v17  ;;  %v3733_v56 = vrot.slane %v3731_v47, 1  ;;  %v3643_v38 = vadd.f32 %v3642_v49, %v3593_v40  ;;  %v3605_v51 = vpop.f32.mrf.mxu3 }
 0x53b   : > { %7118 = vmatmul.msk.bf16.vlgmr.msra.gmra.mxu0 %vm3825_vm8, %v4034_v5 }
 0x53c   : > { %v3734_v41 = vsel %vm658_vm3, %v3729_v12, %v3733_v56  ;;  %v3436_v33 = vpop.f32.mrf.mxu2  ;;  %v3676_v59 = vmax.f32 %v3432_v22, %v3643_v38  ;;  %v3737_v15 = vor.u32 %v3735_v1, %v3733_v56 }
 0x53d   : > { %7041 = vmatmul.msk.bf16.vlgmr.msra.gmra.mxu2 %vm3825_vm8, %v3734_v41  ;;  %4272 = vperm.xlu2 %7937, %v4222_v48  }
 0x541   : > { %v3644_v45 = vpop.f32.mrf.mxu1 }
 0x542   : > { %v3645_v35 = vadd.f32 %v3644_v45, %v3595_v39  ;;  %v3437_v39 = vadd.f32 %v3436_v33, %v9995_v13  ;;  %v3608_v3 = vpop.f32.mrf.mxu3 }
 0x544   : > { %v3677_v30 = vmax.f32 %v3434_v28, %v3645_v35  ;;  %v3438_v10 = vpop.f32.mrf.mxu2 }
 0x545   : > { %v3439_v54 = vadd.f32 %v3438_v10, %v10005_v26  ;;  %4287 = vperm.xlu2 %7937, %v4225_v31  }
 0x546   : > { %v3703_v23 = vpack.c.bf16 %v3677_v30, %v3676_v59  ;;  %v4228_v59 = vld [vmem:[%s11011_s9 + $0x70] sm:$0xff] }
 0x548   : > { %7075 = vmatmul.msk.bf16.gmra.mxu3 %vm3825_vm8, %v3703_v23  ;;  %v4035_v34 = vrot.slane %v3703_v23, 1  ;;  %v3739_v36 = vshll.u32 %v3703_v23, 16  ;;  %v3743_v61 = vshrl.u32 %v3703_v23, 16 }
 0x549   : > { %v3647_v20 = vpop.f32.mrf.mxu1 }
 0x54a   : > { %v4036_v40 = vsel %vm1071_vm2, %v4033_v17, %v4035_v34  ;;  %v3741_v8 = vrot.slane %v3739_v36, 1  ;;  %v3648_v43 = vadd.f32 %v3647_v20, %v3598_v57  ;;  %v3610_v22 = vpop.f32.mrf.mxu3 }
 0x54b   : > { %7119 = vmatmul.msk.bf16.gmra.mxu0 %vm3825_vm8, %v4036_v40 }
 0x54c   : > { %v3742_v42 = vsel %vm658_vm3, %v3737_v15, %v3741_v8  ;;  %v3441_v29 = vpop.f32.mrf.mxu2  ;;  %v3678_v32 = vmax.f32 %v3437_v39, %v3648_v43  ;;  %v3745_v26 = vor.u32 %v3743_v61, %v3741_v8 }
 0x54d   : > { %7042 = vmatmul.msk.bf16.gmra.mxu2 %vm3825_vm8, %v3742_v42  ;;  %v3442_v47 = vadd.f32 %v3441_v29, %v10019_v14  ;;  %4302 = vperm.xlu2 %7937, %v4228_v59   ;;  %v7802_v59 = vld [vmem:[%s11012_s10 + $0x44] sm:$0xf0] }
 0x551   : > { %v3649_v63 = vpop.f32.mrf.mxu1 }
 0x552   : > { %v3650_v55 = vadd.f32 %v3649_v63, %v3600_v18  ;;  %v3613_v1 = vpop.f32.mrf.mxu3 }
 0x554   : > { %v3679_v46 = vmax.f32 %v3439_v54, %v3650_v55  ;;  %v3443_v60 = vpop.f32.mrf.mxu2 }
 0x555   : > { %v3444_v49 = vadd.f32 %v3443_v60, %v10029_v9 }
 0x556   : > { %v3704_v21 = vpack.c.bf16 %v3679_v46, %v3678_v32 }
 0x558   : > { %7076 = vmatmul.msk.bf16.gmra.mxu3 %vm3825_vm8, %v3704_v21  ;;  %v4037_v11 = vrot.slane %v3704_v21, 1  ;;  %v3747_v62 = vshll.u32 %v3704_v21, 16  ;;  %v3751_v38 = vshrl.u32 %v3704_v21, 16 }
 0x559   : > { %v3652_v6 = vpop.f32.mrf.mxu1 }
 0x55a   : > { %v4038_v13 = vsel %vm1071_vm2, %v4035_v34, %v4037_v11  ;;  %v3749_v44 = vrot.slane %v3747_v62, 1  ;;  %v3653_v27 = vadd.f32 %v3652_v6, %v3603_v2 }
 0x55b   : > { %7120 = vmatmul.msk.bf16.gmra.mxu0 %vm3825_vm8, %v4038_v13 }
 0x55c   : > { %v3750_v37 = vsel %vm658_vm3, %v3745_v26, %v3749_v44  ;;  %v3446_v57 = vpop.f32.mrf.mxu2  ;;  %v3680_v12 = vmax.f32 %v3442_v47, %v3653_v27  ;;  %v3753_v9 = vor.u32 %v3751_v38, %v3749_v44 }
 0x55d   : > { %7043 = vmatmul.msk.bf16.gmra.mxu2 %vm3825_vm8, %v3750_v37  ;;  %v3447_v23 = vadd.f32 %v3446_v57, %v10043_v53 }
 0x561   : > { %v3654_v17 = vpop.f32.mrf.mxu1 }
 0x562   : > { %v3655_v5 = vadd.f32 %v3654_v17, %v3605_v51 }
 0x564   : > { %v3681_v56 = vmax.f32 %v3444_v49, %v3655_v5  ;;  %v3448_v33 = vpop.f32.mrf.mxu2 }
 0x565   : > { %v3449_v16 = vadd.f32 %v3448_v33, %v10051_v25  ;;  %v3615_v25 = vpop.f32.mrf.mxu3 }
 0x566   : > { %v3705_v41 = vpack.c.bf16 %v3681_v56, %v3680_v12 }
 0x568   : > { %7077 = vmatmul.msk.bf16.gmra.mxu3 %vm3825_vm8, %v3705_v41  ;;  %v4039_v0 = vrot.slane %v3705_v41, 1  ;;  %v3755_v45 = vshll.u32 %v3705_v41, 16  ;;  %v3759_v8 = vshrl.u32 %v3705_v41, 16 }
 0x569   : > { %v3657_v18 = vpop.f32.mrf.mxu1 }
 0x56a   : > { %v4040_v14 = vsel %vm1071_vm2, %v4037_v11, %v4039_v0  ;;  %v3757_v28 = vrot.slane %v3755_v45, 1  ;;  %v3658_v30 = vadd.f32 %v3657_v18, %v3608_v3  ;;  %v4336_v45 = vld [vmem:[%s11012_s10 + $0x50] sm:$0xff] }
 0x56b   : > { %7121 = vmatmul.msk.bf16.gmra.mxu0 %vm3825_vm8, %v4040_v14 }
 0x56c   : > { %v3758_v35 = vsel %vm658_vm3, %v3753_v9, %v3757_v28  ;;  %v3451_v10 = vpop.f32.mrf.mxu2  ;;  %v3682_v36 = vmax.f32 %v3447_v23, %v3658_v30  ;;  %v3761_v52 = vor.u32 %v3759_v8, %v3757_v28  ;;  %v7801_v30 = vld [vmem:[%s11012_s10 + $0x44] sm:$0xf]  ;;  %v7211_v8 = vld [vmem:[%s11012_s10 + $0x20] sm:$0xf] }
 0x56d   : > { %7044 = vmatmul.msk.bf16.gmra.mxu2 %vm3825_vm8, %v3758_v35  ;;  %v3452_v55 = vadd.f32 %v3451_v10, %v10071_v50  ;;  %v3618_v11 = vpop.f32.mrf.mxu3  ;;  %v7227_v35 = vld [vmem:[%s11012_s10 + $0x40] sm:$0xf] }
 0x56e   : > { %v7228_v10 = vor.u32 %v7802_v59, %v7227_v35  ;;  %v7147_v35 = vld [vmem:[%s11012_s10 + $0x68] sm:$0xf]  ;;  %v7806_v59 = vld [vmem:[%s11012_s10 + $0x6c] sm:$0xf0] }
 0x571   : > { %v3659_v4 = vpop.f32.mrf.mxu1 }
 0x572   : > { %v3660_v34 = vadd.f32 %v3659_v4, %v3610_v22  ;;  %v7229_v4 = vld [vmem:[%s11012_s10 + $0x48] sm:$0xf0] }
 0x573   : > { %v7232_v23 = vor.u32 %v7801_v30, %v7229_v4  ;;  %v7805_v30 = vld [vmem:[%s11012_s10 + $0x6c] sm:$0xf]  ;;  %v7148_v4 = vor.u32 %v7806_v59, %v7147_v35 }
 0x574   : > { %v3683_v20 = vmax.f32 %v3449_v16, %v3660_v34  ;;  %v3453_v63 = vpop.f32.mrf.mxu2  ;;  %v7219_v16 = vld [vmem:[%s11012_s10 + $0x30] sm:$0xf]  ;;  %v7800_v34 = vld [vmem:[%s11012_s10 + $0x34] sm:$0xf0] }
 0x575   : > { %v3454_v32 = vadd.f32 %v3453_v63, %v10089_v19  ;;  %v3620_v3 = vpop.f32.mrf.mxu3 }
 0x576   : > { %v3706_v40 = vpack.c.bf16 %v3683_v20, %v3682_v36  ;;  %v7220_v36 = vor.u32 %v7800_v34, %v7219_v16  ;;  %v7221_v20 = vld [vmem:[%s11012_s10 + $0x38] sm:$0xf0] }
 0x578   : > { %7078 = vmatmul.msk.bf16.gmra.mxu3 %vm3825_vm8, %v3706_v40  ;;  %v4041_v15 = vrot.slane %v3706_v40, 1  ;;  %v3763_v2 = vshll.u32 %v3706_v40, 16  ;;  %v3767_v62 = vshrl.u32 %v3706_v40, 16 }
 0x579   : > { %v3662_v42 = vpop.f32.mrf.mxu1 }
 0x57a   : > { %v4042_v29 = vsel %vm1071_vm2, %v4039_v0, %v4041_v15  ;;  %v3765_v43 = vrot.slane %v3763_v2, 1  ;;  %v3663_v39 = vadd.f32 %v3662_v42, %v3613_v1  ;;  %v7799_v1 = vld [vmem:[%s11012_s10 + $0x34] sm:$0xf]  ;;  %v7798_v2 = vld [vmem:[%s11012_s10 + $0x24] sm:$0xf0] }
 0x57b   : > { %7122 = vmatmul.msk.bf16.gmra.mxu0 %vm3825_vm8, %v4042_v29  ;;  %v7224_v40 = vor.u32 %v7799_v1, %v7221_v20  ;;  %v7797_v42 = vld [vmem:[%s11012_s10 + $0x24] sm:$0xf]  ;;  %v7212_v29 = vor.u32 %v7798_v2, %v7211_v8  ;;  %v4233_v1 = vpop.permute.xlu0 %4232  ;;  %v7804_v20 = vld [vmem:[%s11012_s10 + $0x5c] sm:$0xf0] }
 0x57c   : > { %v3766_v53 = vsel %vm658_vm3, %v3761_v52, %v3765_v43  ;;  %v3684_v60 = vmax.f32 %v3452_v55, %v3663_v39  ;;  %v3456_v21 = vpop.f32.mrf.mxu2  ;;  %v3769_v44 = vor.u32 %v3767_v62, %v3765_v43  ;;  %v7213_v52 = vld [vmem:[%s11012_s10 + $0x28] sm:$0xf0]  ;;  %v7796_v39 = vld [vmem:[%s11012_s10 + $0x14] sm:$0xf0]  ;;  %v7141_v8 = vld [vmem:[%s11012_s10 + $0x60] sm:$0xf0] }
 0x57d   : > { %7045 = vmatmul.msk.bf16.gmra.mxu2 %vm3825_vm8, %v3766_v53  ;;  %v3457_v27 = vadd.f32 %v3456_v21, %v10114_v7  ;;  %v4635_v7 = vunpack.c.l.b16 %v4336_v45  ;;  %v7216_v53 = vor.u32 %v7797_v42, %v7213_v52 }
 0x57f   : > { %v4647_v22 = vpack.c.b16 %v4635_v7, %v4635_v7  ;;  %v7807_v7 = vld [vmem:[%s11012_s10 + $0x7c] sm:$0xf] }
 0x581   : > { %v3664_v54 = vpop.f32.mrf.mxu1  ;;  %v4676_v9 = vsel %vm3850_vm7, %v4647_v22, 0 }
 0x582   : > { %v3665_v46 = vadd.f32 %v3664_v54, %v3615_v25  ;;  %4683 = vmatpush.bf16.msrb.mxu3 %v4676_v9  ;;  %v7203_v25 = vld [vmem:[%s11012_s10 + $0x10] sm:$0xf]  ;;  %v7795_v54 = vld [vmem:[%s11012_s10 + $0x14] sm:$0xf] }
 0x583   : > { %v7204_v55 = vor.u32 %v7796_v39, %v7203_v25 }
 0x584   : > { %v3685_v51 = vmax.f32 %v3454_v32, %v3665_v46  ;;  %v3458_v19 = vpop.f32.mrf.mxu2  ;;  %v7205_v32 = vld [vmem:[%s11012_s10 + $0x18] sm:$0xf0] }
 0x585   : > { %v3459_v17 = vadd.f32 %v3458_v19, %v10129_v24  ;;  %v4636_v24 = vunpack.c.h.b16 %v4336_v45  ;;  %v7208_v46 = vor.u32 %v7795_v54, %v7205_v32  ;;  %v7808_v45 = vld [vmem:[%s11012_s10 + $0x7c] sm:$0xf0] }
 0x586   : > { %v3707_v58 = vpack.c.bf16 %v3685_v51, %v3684_v60  ;;  %4684 = vmatpush.bf16.msrb.mxu3 %v7228_v10  ;;  %v7136_v60 = vld [vmem:[%s11012_s10 + $0xa8] sm:$0xff] }
 0x587   : > { %v4648_v14 = vpack.c.b16 %v4636_v24, %v4636_v24  ;;  %v4451_v51 = vunpack.c.l.b16 %v7136_v60  ;;  %v4452_v21 = vunpack.c.h.b16 %v7136_v60 }
 0x588   : > { %7079 = vmatmul.msk.bf16.gmra.mxu3 %vm3825_vm8, %v3707_v58  ;;  %v4043_v61 = vrot.slane %v3707_v58, 1  ;;  %v3771_v6 = vshll.u32 %v3707_v58, 16  ;;  %v3775_v41 = vshrl.u32 %v3707_v58, 16  ;;  %v7195_v58 = vld [vmem:[%s11012_s10] sm:$0xf] }
 0x589   : > { %v3667_v13 = vpop.f32.mrf.mxu1  ;;  %v4679_v28 = vsel %vm3850_vm7, %v4648_v14, 0 }
 0x58a   : > { %v4044_v26 = vsel %vm1071_vm2, %v4041_v15, %v4043_v61  ;;  %v3773_v37 = vrot.slane %v3771_v6, 1  ;;  %v3668_v57 = vadd.f32 %v3667_v13, %v3618_v11  ;;  %4732 = vmatpush.bf16.msrb.mxu0 %v4679_v28  ;;  %4685 = vmatpush.bf16.msrb.mxu3 %v7220_v36  ;;  %v7794_v11 = vld [vmem:[%s11012_s10 + $0x4] sm:$0xf0]  ;;  %v7197_v6 = vld [vmem:[%s11012_s10 + $0x8] sm:$0xf0]  ;;  %v4463_v13 = vpack.c.b16 %v4451_v51, %v4451_v51 }
 0x58b   : > { %7123 = vmatmul.msk.bf16.gmra.mxu0 %vm3825_vm8, %v4044_v26  ;;  %v7196_v62 = vor.u32 %v7794_v11, %v7195_v58  ;;  %v4464_v26 = vpack.c.b16 %v4452_v21, %v4452_v21  ;;  %v7139_v36 = vld [vmem:[%s11012_s10 + $0x58] sm:$0xf] }
 0x58c   : > { %v3774_v50 = vsel %vm658_vm3, %v3769_v44, %v3773_v37  ;;  %v3686_v49 = vmax.f32 %v3457_v27, %v3668_v57  ;;  %v3777_v0 = vor.u32 %v3775_v41, %v3773_v37  ;;  %v7171_v57 = vld [vmem:[%s11012_s10 + $0x98] sm:$0xf]  ;;  %v7811_v27 = vld [vmem:[%s11012_s10 + $0x9c] sm:$0xf] }
 0x58d   : > { %7046 = vmatmul.msk.bf16.gmra.mxu2 %vm3825_vm8, %v3774_v50  ;;  %v4501_v50 = vsel %vm3850_vm7, %v4463_v13, 0  ;;  %v4504_v19 = vsel %vm3850_vm7, %v4464_v26, 0 }
 0x58e   : > { %4733 = vmatpush.bf16.msrb.mxu0 %v7232_v23  ;;  %4686 = vmatpush.bf16.msrb.mxu3 %v7212_v29  ;;  %v7149_v23 = vld [vmem:[%s11012_s10 + $0x70] sm:$0xf0] }
 0x58f   : > { %4508 = vmatpush.bf16.msrb.mxu1 %v4501_v50  ;;  %4557 = vmatpush.bf16.msrb.mxu2 %v4504_v19  ;;  %v7152_v16 = vor.u32 %v7805_v30, %v7149_v23 }
 0x591   : > { %v3669_v48 = vpop.f32.mrf.mxu1 }
 0x592   : > { %v3670_v47 = vadd.f32 %v3669_v48, %v3620_v3  ;;  %4734 = vmatpush.bf16.msrb.mxu0 %v7224_v40  ;;  %4687 = vmatpush.bf16.msrb.mxu3 %v7204_v55  ;;  %v7812_v3 = vld [vmem:[%s11012_s10 + $0x9c] sm:$0xf0]  ;;  %v7140_v40 = vor.u32 %v7804_v20, %v7139_v36  ;;  %v4238_v55 = vpop.permute.xlu0 %4237 }
 0x593   : > { %v7172_v48 = vor.u32 %v7812_v3, %v7171_v57 }
 0x594   : > { %v3687_v5 = vmax.f32 %v3459_v17, %v3670_v47  ;;  %v7173_v17 = vld [vmem:[%s11012_s10 + $0xa0] sm:$0xf0] }
 0x595   : > { %v7176_v47 = vor.u32 %v7811_v27, %v7173_v17  ;;  %4509 = vmatpush.bf16.msrb.mxu1 %v7172_v48 }
 0x596   : > { %v3708_v12 = vpack.c.bf16 %v3687_v5, %v3686_v49  ;;  %4735 = vmatpush.bf16.msrb.mxu0 %v7216_v53  ;;  %4688 = vmatpush.bf16.msrb.mxu3 %v7196_v62  ;;  %v7163_v5 = vld [vmem:[%s11012_s10 + $0x88] sm:$0xf] }
 0x597   : > { %4558 = vmatpush.bf16.msrb.mxu2 %v7176_v47 }
 0x598   : > { %7080 = vmatmul.msk.bf16.gmra.mxu3 %vm3825_vm8, %v3708_v12  ;;  %v4045_v56 = vrot.slane %v3708_v12, 1  ;;  %v3779_v33 = vshll.u32 %v3708_v12, 16  ;;  %v3783_v15 = vshrl.u32 %v3708_v12, 16  ;;  %v7810_v12 = vld [vmem:[%s11012_s10 + $0x8c] sm:$0xf0] }
 0x59a   : > { %v4046_v31 = vsel %vm1071_vm2, %v4043_v61, %v4045_v56  ;;  %v3781_v38 = vrot.slane %v3779_v33, 1  ;;  %4736 = vmatpush.bf16.msrb.mxu0 %v7208_v46  ;;  %v7793_v61 = vld [vmem:[%s11012_s10 + $0x4] sm:$0xf]  ;;  %v7164_v33 = vor.u32 %v7810_v12, %v7163_v5 }
 0x59b   : > { %7124 = vmatmul.msk.bf16.gmra.mxu0 %vm3825_vm8, %v4046_v31  ;;  %v7200_v37 = vor.u32 %v7793_v61, %v7197_v6  ;;  %v7165_v31 = vld [vmem:[%s11012_s10 + $0x90] sm:$0xf0]  ;;  %v4243_v6 = vpop.permute.xlu1 %4242 }
 0x59c   : > { %v3782_v18 = vsel %vm658_vm3, %v3777_v0, %v3781_v38  ;;  %v3785_v63 = vor.u32 %v3783_v15, %v3781_v38  ;;  %4510 = vmatpush.bf16.msrb.mxu1 %v7164_v33  ;;  %v7155_v38 = vld [vmem:[%s11012_s10 + $0x78] sm:$0xf]  ;;  %v7803_v15 = vld [vmem:[%s11012_s10 + $0x5c] sm:$0xf] }
 0x59d   : > { %7047 = vmatmul.msk.bf16.gmra.mxu2 %vm3825_vm8, %v3782_v18  ;;  %v7156_v24 = vor.u32 %v7808_v45, %v7155_v38  ;;  %v7157_v18 = vld [vmem:[%s11012_s10 + $0x80] sm:$0xf0]  ;;  %v7144_v2 = vor.u32 %v7803_v15, %v7141_v8  ;;  %v4253_v38 = vpop.permute.xlu2 %4252 }
 0x59e   : > { %4737 = vmatpush.bf16.msrb.mxu0 %v7200_v37  ;;  %v7160_v22 = vor.u32 %v7807_v7, %v7157_v18 }
 0x5a0   : > { %4511 = vmatpush.bf16.msrb.mxu1 %v7156_v24 }
 0x5a3   : > { %v4248_v27 = vpop.permute.xlu1 %4247 }
 0x5a4   : > { %4512 = vmatpush.bf16.msrb.mxu1 %v7148_v4 }
 0x5a8   : > { %4513 = vmatpush.bf16.msrb.mxu1 %v7140_v40 }
 0x5ab   : > { %v3970_v43 = vpop.f32.mrf.mxu3  ;;  %7125 = vmatmul.msk.bf16.gmra.mxu0 %vm3825_vm8, %v4045_v56  ;;  %v7809_v56 = vld [vmem:[%s11012_s10 + $0x8c] sm:$0xf] }
 0x5ac   : > { %v7168_v0 = vor.u32 %v7809_v56, %v7165_v31 }
 0x5ad   : > { %7048 = vmatmul.msk.bf16.gmra.mxu2 %vm3825_vm8, %v3785_v63 }
 0x5ae   : > { %4559 = vmatpush.bf16.msrb.mxu2 %v7168_v0 }
 0x5b2   : > { %4560 = vmatpush.bf16.msrb.mxu2 %v7160_v22 }
 0x5b3   : > { %v3972_v44 = vpop.f32.mrf.mxu3 }
 0x5b6   : > { %4561 = vmatpush.bf16.msrb.mxu2 %v7152_v16 }
 0x5b8   : > { %v4122_v49 = vpop.f32.mrf.mxu0 }
 0x5ba   : > { %4562 = vmatpush.bf16.msrb.mxu2 %v7144_v2 }
 0x5bb   : > { %v3975_v41 = vpop.f32.mrf.mxu3 }
 0x5c0   : > { %v3863_v14 = vpop.f32.mrf.mxu2  ;;  %v4124_v9 = vpop.f32.mrf.mxu0 }
 0x5c1   : > { %v3971_v28 = vadd.f32 %v3970_v43, %v3863_v14  ;;  %v10382_v43 = vld [vmem:[%s11010_s8] ss:$0 sm:$0xff] }
 0x5c3   : > { %v3977_v10 = vpop.f32.mrf.mxu3  ;;  %v4162_v34 = vadd.f32 %v4122_v49, %v3971_v28 }
 0x5c5   : > { %v4178_v52 = vmax.f32 %v4162_v34, 0.0  ;;  %v4258_v34 = vpop.permute.xlu2 %4257 }
 0x5c7   : > { %v4198_v39 = vadd.f32 %v10382_v43, %v4178_v52 }
 0x5c8   : > { %v3865_v42 = vpop.f32.mrf.mxu2  ;;  %v4127_v29 = vpop.f32.mrf.mxu0 }
 0x5c9   : > { %v3973_v63 = vadd.f32 %v3972_v44, %v3865_v42  ;;  %v4310_v51 = vmul.f32 %v4233_v1, %v4198_v39 }
 0x5cb   : > { %v4163_v53 = vadd.f32 %v4124_v9, %v3973_v63  ;;  %v3980_v25 = vpop.f32.mrf.mxu3 }
 0x5cd   : > { %v4179_v54 = vmax.f32 %v4163_v53, 0.0 }
 0x5cf   : > { %v4199_v32 = vadd.f32 %v10382_v43, %v4179_v54 }
 0x5d0   : > { %v3868_v46 = vpop.f32.mrf.mxu2  ;;  %v4129_v60 = vpop.f32.mrf.mxu0 }
 0x5d1   : > { %v4311_v21 = vmul.f32 %v4238_v55, %v4199_v32  ;;  %v3976_v58 = vadd.f32 %v3975_v41, %v3868_v46 }
 0x5d3   : > { %v4337_v11 = vpack.c.bf16 %v4311_v21, %v4310_v51  ;;  %v3982_v61 = vpop.f32.mrf.mxu3  ;;  %v4164_v62 = vadd.f32 %v4127_v29, %v3976_v58 }
 0x5d5   : > { %7233 = vmatmul.msk.bf16.vlgmr.msrb.gmra.mxu3 %vm4475_vm9, %v4337_v11  ;;  %7241 = vmatmul.msk.bf16.vlgmr.msrb.gmra.mxu0 %vm4475_vm9, %v4337_v11  ;;  %v4180_v44 = vmax.f32 %v4164_v62, 0.0  ;;  %v4360_v48 = vshll.u32 %v4337_v11, 16  ;;  %v4358_v31 = vshrl.u32 %v4337_v11, 16  ;;  %v4799_v7 = vrot.slane %v4337_v11, 1  ;;  %v4263_v62 = vpop.permute.xlu0 %4262 }
 0x5d7   : > { %v4200_v19 = vadd.f32 %v10382_v43, %v4180_v44  ;;  %v4362_v33 = vrot.slane %v4360_v48, 1 }
 0x5d8   : > { %v3870_v13 = vpop.f32.mrf.mxu2  ;;  %v4132_v26 = vpop.f32.mrf.mxu0 }
 0x5d9   : > { %v3978_v37 = vadd.f32 %v3977_v10, %v3870_v13  ;;  %v4312_v5 = vmul.f32 %v4243_v6, %v4200_v19  ;;  %v4363_v22 = vor.u32 %v4362_v33, %v4358_v31  ;;  %v4268_v6 = vpop.permute.xlu1 %4267 }
 0x5db   : > { %v4165_v50 = vadd.f32 %v4129_v60, %v3978_v37  ;;  %v3985_v3 = vpop.f32.mrf.mxu3 }
 0x5dd   : > { %v4181_v57 = vmax.f32 %v4165_v50, 0.0 }
 0x5df   : > { %v4201_v17 = vadd.f32 %v10382_v43, %v4181_v57 }
 0x5e0   : > { %v3873_v47 = vpop.f32.mrf.mxu2  ;;  %v4134_v49 = vpop.f32.mrf.mxu0 }
 0x5e1   : > { %v4313_v12 = vmul.f32 %v4248_v27, %v4201_v17  ;;  %v3981_v56 = vadd.f32 %v3980_v25, %v3873_v47 }
 0x5e3   : > { %v4338_v41 = vpack.c.bf16 %v4313_v12, %v4312_v5  ;;  %v4166_v0 = vadd.f32 %v4132_v26, %v3981_v56  ;;  %v3987_v18 = vpop.f32.mrf.mxu3 }
 0x5e5   : > { %7234 = vmatmul.msk.bf16.gmra.mxu3 %vm4475_vm9, %v4338_v41  ;;  %7242 = vmatmul.msk.bf16.gmra.mxu0 %vm4475_vm9, %v4338_v41  ;;  %v4365_v45 = vshll.u32 %v4338_v41, 16  ;;  %v4800_v24 = vrot.slane %v4338_v41, 1  ;;  %v4182_v59 = vmax.f32 %v4166_v0, 0.0  ;;  %v4369_v52 = vshrl.u32 %v4338_v41, 16 }
 0x5e7   : > { %v4367_v14 = vrot.slane %v4365_v45, 1  ;;  %v10393_v9 = vsel %vm1071_vm2, %v4799_v7, %v4800_v24  ;;  %v4202_v23 = vadd.f32 %v10382_v43, %v4182_v59 }
 0x5e8   : > { %v3875_v28 = vpop.f32.mrf.mxu2  ;;  %v4137_v35 = vpop.f32.mrf.mxu0 }
 0x5e9   : > { %v3983_v30 = vadd.f32 %v3982_v61, %v3875_v28  ;;  %v4368_v10 = vsel %vm658_vm3, %v4363_v22, %v4367_v14  ;;  %v4314_v40 = vmul.f32 %v4253_v38, %v4202_v23  ;;  %v4371_v25 = vor.u32 %v4369_v52, %v4367_v14 }
 0x5ea   : > { %7177 = vmatmul.msk.bf16.vlgmr.msrb.gmra.mxu1 %vm4475_vm9, %v4368_v10  ;;  %7185 = vmatmul.msk.bf16.vlgmr.msrb.gmra.mxu2 %vm4475_vm9, %v4368_v10 }
 0x5eb   : > { %v4167_v4 = vadd.f32 %v4134_v49, %v3983_v30  ;;  %v3990_v2 = vpop.f32.mrf.mxu3 }
 0x5ed   : > { %v4183_v16 = vmax.f32 %v4167_v4, 0.0 }
 0x5ef   : > { %v4203_v1 = vadd.f32 %v10382_v43, %v4183_v16 }
 0x5f0   : > { %v3878_v36 = vpop.f32.mrf.mxu2  ;;  %v4139_v20 = vpop.f32.mrf.mxu0 }
 0x5f1   : > { %v4315_v15 = vmul.f32 %v4258_v34, %v4203_v1  ;;  %v3986_v8 = vadd.f32 %v3985_v3, %v3878_v36 }
 0x5f3   : > { %v4339_v42 = vpack.c.bf16 %v4315_v15, %v4314_v40  ;;  %v4168_v29 = vadd.f32 %v4137_v35, %v3986_v8  ;;  %v3992_v58 = vpop.f32.mrf.mxu3 }
 0x5f5   : > { %7235 = vmatmul.msk.bf16.gmra.mxu3 %vm4475_vm9, %v4339_v42  ;;  %7243 = vmatmul.msk.bf16.gmra.mxu0 %vm4475_vm9, %v4339_v42  ;;  %v4373_v63 = vshll.u32 %v4339_v42, 16  ;;  %v4802_v53 = vrot.slane %v4339_v42, 1  ;;  %v4184_v46 = vmax.f32 %v4168_v29, 0.0  ;;  %v4377_v48 = vshrl.u32 %v4339_v42, 16 }
 0x5f7   : > { %v4375_v39 = vrot.slane %v4373_v63, 1  ;;  %v10403_v54 = vsel %vm1071_vm2, %v4800_v24, %v4802_v53  ;;  %v4204_v11 = vadd.f32 %v10382_v43, %v4184_v46  ;;  %v4273_v24 = vpop.permute.xlu2 %4272 }
 0x5f8   : > { %v3880_v55 = vpop.f32.mrf.mxu2  ;;  %v4142_v32 = vpop.f32.mrf.mxu0 }
 0x5f9   : > { %v3988_v60 = vadd.f32 %v3987_v18, %v3880_v55  ;;  %v4376_v51 = vsel %vm658_vm3, %v4371_v25, %v4375_v39  ;;  %v4316_v37 = vmul.f32 %v4263_v62, %v4204_v11  ;;  %v4379_v49 = vor.u32 %v4377_v48, %v4375_v39  ;;  %v4278_v18 = vpop.permute.xlu0 %4277  ;;  %v4283_v39 = vpop.permute.xlu1 %4282 }
 0x5fa   : > { %7178 = vmatmul.msk.bf16.gmra.mxu1 %vm4475_vm9, %v4376_v51  ;;  %7186 = vmatmul.msk.bf16.gmra.mxu2 %vm4475_vm9, %v4376_v51 }
 0x5fb   : > { %v4169_v21 = vadd.f32 %v4139_v20, %v3988_v60  ;;  %v3995_v47 = vpop.f32.mrf.mxu3 }
 0x5fd   : > { %v4185_v61 = vmax.f32 %v4169_v21, 0.0 }
 0x5ff   : > { %v4205_v13 = vadd.f32 %v10382_v43, %v4185_v61 }
 0x600   : > { %v3883_v26 = vpop.f32.mrf.mxu2  ;;  %v4144_v44 = vpop.f32.mrf.mxu0 }
 0x601   : > { %v4317_v50 = vmul.f32 %v4268_v6, %v4205_v13  ;;  %v3991_v19 = vadd.f32 %v3990_v2, %v3883_v26 }
 0x603   : > { %v4340_v57 = vpack.c.bf16 %v4317_v50, %v4316_v37  ;;  %v4170_v3 = vadd.f32 %v4142_v32, %v3991_v19  ;;  %v3997_v14 = vpop.f32.mrf.mxu3  ;;  %v4288_v32 = vpop.permute.xlu2 %4287 }
 0x605   : > { %7236 = vmatmul.msk.bf16.gmra.mxu3 %vm4475_vm9, %v4340_v57  ;;  %7244 = vmatmul.msk.bf16.gmra.mxu0 %vm4475_vm9, %v4340_v57  ;;  %v4381_v27 = vshll.u32 %v4340_v57, 16  ;;  %v4804_v17 = vrot.slane %v4340_v57, 1  ;;  %v4186_v33 = vmax.f32 %v4170_v3, 0.0  ;;  %v4385_v16 = vshrl.u32 %v4340_v57, 16 }
 0x607   : > { %v4383_v5 = vrot.slane %v4381_v27, 1  ;;  %v10413_v12 = vsel %vm1071_vm2, %v4802_v53, %v4804_v17  ;;  %v4206_v45 = vadd.f32 %v10382_v43, %v4186_v33  ;;  %v7259_v33 = vld [vmem:[%s11012_s10 + $0x100] sm:$0xff] }
 0x608   : > { %v3885_v56 = vpop.f32.mrf.mxu2  ;;  %v4147_v41 = vpop.f32.mrf.mxu0 }
 0x609   : > { %v3993_v31 = vadd.f32 %v3992_v58, %v3885_v56  ;;  %v4384_v0 = vsel %vm658_vm3, %v4379_v49, %v4383_v5  ;;  %v4318_v35 = vmul.f32 %v4273_v24, %v4206_v45  ;;  %v4387_v36 = vor.u32 %v4385_v16, %v4383_v5  ;;  %v4293_v5 = vpop.permute.xlu0 %4292  ;;  %v4298_v56 = vpop.permute.xlu1 %4297  ;;  %v7296_v16 = vld [vmem:[%s11012_s10 + $0xf8] sm:$0xf0] }
 0x60a   : > { %7179 = vmatmul.msk.bf16.gmra.mxu1 %vm4475_vm9, %v4384_v0  ;;  %7187 = vmatmul.msk.bf16.gmra.mxu2 %vm4475_vm9, %v4384_v0  ;;  %v4846_v45 = vunpack.c.h.b16 %v7259_v33 }
 0x60b   : > { %v4171_v38 = vadd.f32 %v4144_v44, %v3993_v31  ;;  %v4000_v29 = vpop.f32.mrf.mxu3 }
 0x60d   : > { %v4187_v7 = vmax.f32 %v4171_v38, 0.0  ;;  %v4845_v38 = vunpack.c.l.b16 %v7259_v33 }
 0x60f   : > { %v4207_v22 = vadd.f32 %v10382_v43, %v4187_v7 }
 0x610   : > { %v3888_v28 = vpop.f32.mrf.mxu2  ;;  %v4149_v10 = vpop.f32.mrf.mxu0 }
 0x611   : > { %v4319_v59 = vmul.f32 %v4278_v18, %v4207_v22  ;;  %v3996_v30 = vadd.f32 %v3995_v47, %v3888_v28  ;;  %v4857_v22 = vpack.c.b16 %v4845_v38, %v4845_v38  ;;  %v7262_v38 = vld [vmem:[%s11012_s10 + $0xb0] sm:$0xf] }
 0x613   : > { %v4341_v4 = vpack.c.bf16 %v4319_v59, %v4318_v35  ;;  %v4172_v23 = vadd.f32 %v4147_v41, %v3996_v30  ;;  %v4002_v11 = vpop.f32.mrf.mxu3  ;;  %v7294_v59 = vld [vmem:[%s11012_s10 + $0xf0] sm:$0xf]  ;;  %v7822_v30 = vld [vmem:[%s11012_s10 + $0xf4] sm:$0xf0] }
 0x615   : > { %7237 = vmatmul.msk.bf16.gmra.mxu3 %vm4475_vm9, %v4341_v4  ;;  %7245 = vmatmul.msk.bf16.gmra.mxu0 %vm4475_vm9, %v4341_v4  ;;  %v4389_v34 = vshll.u32 %v4341_v4, 16  ;;  %v4806_v1 = vrot.slane %v4341_v4, 1  ;;  %v4188_v8 = vmax.f32 %v4172_v23, 0.0  ;;  %v4393_v62 = vshrl.u32 %v4341_v4, 16  ;;  %v7821_v23 = vld [vmem:[%s11012_s10 + $0xf4] sm:$0xf] }
 0x617   : > { %v4391_v20 = vrot.slane %v4389_v34, 1  ;;  %v10423_v40 = vsel %vm1071_vm2, %v4804_v17, %v4806_v1  ;;  %v4208_v53 = vadd.f32 %v10382_v43, %v4188_v8  ;;  %v7295_v8 = vor.u32 %v7822_v30, %v7294_v59 }
 0x618   : > { %v3890_v15 = vpop.f32.mrf.mxu2  ;;  %v4152_v63 = vpop.f32.mrf.mxu0 }
 0x619   : > { %v3998_v2 = vadd.f32 %v3997_v14, %v3890_v15  ;;  %v4392_v42 = vsel %vm658_vm3, %v4387_v36, %v4391_v20  ;;  %v4320_v60 = vmul.f32 %v4283_v39, %v4208_v53  ;;  %v4395_v44 = vor.u32 %v4393_v62, %v4391_v20  ;;  %v7817_v62 = vld [vmem:[%s11012_s10 + $0xd4] sm:$0xf] }
 0x61a   : > { %7180 = vmatmul.msk.bf16.gmra.mxu1 %vm4475_vm9, %v4392_v42  ;;  %7188 = vmatmul.msk.bf16.gmra.mxu2 %vm4475_vm9, %v4392_v42  ;;  %v4858_v14 = vpack.c.b16 %v4846_v45, %v4846_v45  ;;  %v7814_v45 = vld [vmem:[%s11012_s10 + $0xb4] sm:$0xf0] }
 0x61b   : > { %v4173_v52 = vadd.f32 %v4149_v10, %v3998_v2  ;;  %v4005_v49 = vpop.f32.mrf.mxu3  ;;  %v4894_v10 = vsel %vm3850_vm7, %v4857_v22, 0  ;;  %v7299_v2 = vor.u32 %v7821_v23, %v7296_v16  ;;  %v7263_v22 = vor.u32 %v7814_v45, %v7262_v38  ;;  %v7831_v45 = vld [vmem:[%s11014_s12 + $0x40] sm:$0xff] }
 0x61c   : > { %v4897_v4 = vsel %vm3850_vm7, %v4858_v14, 0  ;;  %4901 = vmatpush.bf16.msra.mxu1 %v4894_v10  ;;  %v7264_v14 = vld [vmem:[%s11012_s10 + $0xb8] sm:$0xf0] }
 0x61d   : > { %v4189_v25 = vmax.f32 %v4173_v52, 0.0  ;;  %4950 = vmatpush.bf16.msra.mxu2 %v4897_v4 }
 0x61f   : > { %v4209_v55 = vadd.f32 %v10382_v43, %v4189_v25 }
 0x620   : > { %v3893_v46 = vpop.f32.mrf.mxu2  ;;  %v4154_v26 = vpop.f32.mrf.mxu0  ;;  %4902 = vmatpush.bf16.msra.mxu1 %v7295_v8 }
 0x621   : > { %v4321_v51 = vmul.f32 %v4288_v32, %v4209_v55  ;;  %v4001_v21 = vadd.f32 %v4000_v29, %v3893_v46  ;;  %v7286_v55 = vld [vmem:[%s11012_s10 + $0xe0] sm:$0xf]  ;;  %v7820_v32 = vld [vmem:[%s11012_s10 + $0xe4] sm:$0xf0]  ;;  %v7819_v46 = vld [vmem:[%s11012_s10 + $0xe4] sm:$0xf]  ;;  %4951 = vmatpush.bf16.msra.mxu2 %v7299_v2 }
 0x623   : > { %v4342_v58 = vpack.c.bf16 %v4321_v51, %v4320_v60  ;;  %v4174_v61 = vadd.f32 %v4152_v63, %v4001_v21  ;;  %v4007_v29 = vpop.f32.mrf.mxu3  ;;  %v7287_v51 = vor.u32 %v7820_v32, %v7286_v55  ;;  %v7288_v21 = vld [vmem:[%s11012_s10 + $0xe8] sm:$0xf0]  ;;  %v7830_v32 = vld [vmem:[%s11014_s12 + $0x38] sm:$0xff] }
 0x624   : > { %7882 = vmatpush.bf16.msra.mxu3 %v7830_v32 }
 0x625   : > { %7238 = vmatmul.msk.bf16.gmra.mxu3 %vm4475_vm9, %v4342_v58  ;;  %7246 = vmatmul.msk.bf16.gmra.mxu0 %vm4475_vm9, %v4342_v58  ;;  %v4397_v6 = vshll.u32 %v4342_v58, 16  ;;  %v4808_v13 = vrot.slane %v4342_v58, 1  ;;  %v4190_v57 = vmax.f32 %v4174_v61, 0.0  ;;  %v4401_v35 = vshrl.u32 %v4342_v58, 16  ;;  %v7278_v58 = vld [vmem:[%s11012_s10 + $0xd0] sm:$0xf] }
 0x626   : > { %v7818_v61 = vld [vmem:[%s11012_s10 + $0xd4] sm:$0xf0]  ;;  %4903 = vmatpush.bf16.msra.mxu1 %v7287_v51  ;;  %v7840_v51 = vld [vmem:[%s11014_s12 + $0x88] sm:$0xff] }
 0x627   : > { %v4399_v37 = vrot.slane %v4397_v6, 1  ;;  %v10433_v50 = vsel %vm1071_vm2, %v4806_v1, %v4808_v13  ;;  %v4210_v17 = vadd.f32 %v10382_v43, %v4190_v57  ;;  %v7280_v6 = vld [vmem:[%s11012_s10 + $0xd8] sm:$0xf0]  ;;  %v4303_v57 = vpop.permute.xlu2 %4302 }
 0x628   : > { %v3895_v19 = vpop.f32.mrf.mxu2  ;;  %v4157_v31 = vpop.f32.mrf.mxu0 }
 0x629   : > { %v4003_v3 = vadd.f32 %v4002_v11, %v3895_v19  ;;  %v4400_v48 = vsel %vm658_vm3, %v4395_v44, %v4399_v37  ;;  %v4322_v7 = vmul.f32 %v4293_v5, %v4210_v17  ;;  %v4403_v20 = vor.u32 %v4401_v35, %v4399_v37  ;;  %v7270_v17 = vld [vmem:[%s11012_s10 + $0xc0] sm:$0xf] }
 0x62a   : > { %7181 = vmatmul.msk.bf16.gmra.mxu1 %vm4475_vm9, %v4400_v48  ;;  %7189 = vmatmul.msk.bf16.gmra.mxu2 %vm4475_vm9, %v4400_v48  ;;  %v7291_v11 = vor.u32 %v7819_v46, %v7288_v21  ;;  %v7279_v37 = vor.u32 %v7818_v61, %v7278_v58  ;;  %v7283_v19 = vor.u32 %v7817_v62, %v7280_v6  ;;  %v7841_v46 = vld [vmem:[%s11014_s12 + $0x90] sm:$0xff]  ;;  %v7839_v58 = vld [vmem:[%s11014_s12 + $0x80] sm:$0xff]  ;;  %v7838_v62 = vld [vmem:[%s11014_s12 + $0x78] sm:$0xff] }
 0x62b   : > { %v4175_v27 = vadd.f32 %v4154_v26, %v4003_v3  ;;  %v4308_v3 = vpop.permute.xlu0 %4307  ;;  %v7827_v61 = vld [vmem:[%s11014_s12 + $0x20] sm:$0xff] }
 0x62c   : > { %4952 = vmatpush.bf16.msra.mxu2 %v7291_v11  ;;  %4904 = vmatpush.bf16.msra.mxu1 %v7279_v37 }
 0x62d   : > { %v4191_v47 = vmax.f32 %v4175_v27, 0.0 }
 0x62f   : > { %v4211_v41 = vadd.f32 %v10382_v43, %v4191_v47  ;;  %v7816_v47 = vld [vmem:[%s11012_s10 + $0xc4] sm:$0xf0] }
 0x630   : > { %v3898_v0 = vpop.f32.mrf.mxu2  ;;  %v4159_v39 = vpop.f32.mrf.mxu0  ;;  %4953 = vmatpush.bf16.msra.mxu2 %v7283_v19  ;;  %v7271_v5 = vor.u32 %v7816_v47, %v7270_v17  ;;  %v7824_v17 = vld [vmem:[%s11014_s12 + $0x8] sm:$0xff]  ;;  %v7835_v47 = vld [vmem:[%s11014_s12 + $0x60] sm:$0xff] }
 0x631   : > { %v4323_v24 = vmul.f32 %v4298_v56, %v4211_v41  ;;  %v4006_v18 = vadd.f32 %v4005_v49, %v3898_v0  ;;  %v7272_v56 = vld [vmem:[%s11012_s10 + $0xc8] sm:$0xf0] }
 0x632   : > { %4905 = vmatpush.bf16.msra.mxu1 %v7271_v5  ;;  %v7823_v5 = vld [vmem:[%s11014_s12] sm:$0xff] }
 0x633   : > { %v10443_v28 = vpack.c.bf16 %v4323_v24, %v4322_v7  ;;  %v4176_v34 = vadd.f32 %v4157_v31, %v4006_v18  ;;  %v7813_v7 = vld [vmem:[%s11012_s10 + $0xb4] sm:$0xf] }
 0x634   : > { %v7267_v59 = vor.u32 %v7813_v7, %v7264_v14 }
 0x635   : > { %7239 = vmatmul.msk.bf16.gmra.mxu3 %vm4475_vm9, %v10443_v28  ;;  %7247 = vmatmul.msk.bf16.gmra.mxu0 %vm4475_vm9, %v10443_v28  ;;  %v4405_v1 = vshll.u32 %v10443_v28, 16  ;;  %v4810_v36 = vrot.slane %v10443_v28, 1  ;;  %v4192_v63 = vmax.f32 %v4176_v34, 0.0  ;;  %v4409_v33 = vshrl.u32 %v10443_v28, 16 }
 0x636   : > { %4906 = vmatpush.bf16.msra.mxu1 %v7263_v22 }
 0x637   : > { %v4407_v15 = vrot.slane %v4405_v1, 1  ;;  %v10468_v42 = vsel %vm1071_vm2, %v4808_v13, %v4810_v36  ;;  %v4212_v13 = vadd.f32 %v10382_v43, %v4192_v63 }
 0x638   : > { %v3900_v52 = vpop.f32.mrf.mxu2 }
 0x639   : > { %v4008_v53 = vadd.f32 %v4007_v29, %v3900_v52  ;;  %v4408_v25 = vsel %vm658_vm3, %v4403_v20, %v4407_v15  ;;  %v4324_v48 = vmul.f32 %v4303_v57, %v4212_v13  ;;  %v4411_v24 = vor.u32 %v4409_v33, %v4407_v15  ;;  %v7825_v57 = vld [vmem:[%s11014_s12 + $0x10] sm:$0xff] }
 0x63a   : > { %7182 = vmatmul.msk.bf16.gmra.mxu1 %vm4475_vm9, %v4408_v25  ;;  %7190 = vmatmul.msk.bf16.gmra.mxu2 %vm4475_vm9, %v4408_v25 }
 0x63b   : > { %v4177_v60 = vadd.f32 %v4159_v39, %v4008_v53  ;;  %5415 = vmatpush.bf16.msrb.mxu1 %v7841_v46  ;;  %v5061_v46 = vld [vmem:[%s11013_s11] sm:$0x3] }
 0x63d   : > { %v4193_v26 = vmax.f32 %v4177_v60, 0.0  ;;  %v7829_v60 = vld [vmem:[%s11014_s12 + $0x30] sm:$0xff] }
 0x63e   : > { %7883 = vmatpush.bf16.msra.mxu3 %v7829_v60 }
 0x63f   : > { %v4213_v44 = vadd.f32 %v10382_v43, %v4193_v26  ;;  %v7815_v43 = vld [vmem:[%s11012_s10 + $0xc4] sm:$0xf]  ;;  %5416 = vmatpush.bf16.msrb.mxu1 %v7840_v51  ;;  %v7826_v26 = vld [vmem:[%s11014_s12 + $0x18] sm:$0xff] }
 0x640   : > { %v7275_v41 = vor.u32 %v7815_v43, %v7272_v56  ;;  %v7833_v43 = vld [vmem:[%s11014_s12 + $0x50] sm:$0xff]  ;;  %v7834_v56 = vld [vmem:[%s11014_s12 + $0x58] sm:$0xff] }
 0x641   : > { %v4325_v27 = vmul.f32 %v4308_v3, %v4213_v44  ;;  %v7837_v44 = vld [vmem:[%s11014_s12 + $0x70] sm:$0xff]  ;;  %v7836_v3 = vld [vmem:[%s11014_s12 + $0x68] sm:$0xff]  ;;  %5282 = vmatpush.bf16.msra.mxu0 %v7833_v43 }
 0x642   : > { %4954 = vmatpush.bf16.msra.mxu2 %v7275_v41 }
 0x643   : > { %v4344_v49 = vpack.c.bf16 %v4325_v27, %v4324_v48  ;;  %5417 = vmatpush.bf16.msrb.mxu1 %v7839_v58 }
 0x645   : > { %7240 = vmatmul.msk.bf16.gmra.mxu3 %vm4475_vm9, %v4344_v49  ;;  %7248 = vmatmul.msk.bf16.gmra.mxu0 %vm4475_vm9, %v4344_v49  ;;  %v4413_v31 = vshll.u32 %v4344_v49, 16  ;;  %v10514_v0 = vrot.slane %v4344_v49, 1  ;;  %v4417_v10 = vshrl.u32 %v4344_v49, 16 }
 0x646   : > { %4955 = vmatpush.bf16.msra.mxu2 %v7267_v59  ;;  %v7842_v59 = vld [vmem:[%s11014_s12 + $0x98] sm:$0xff] }
 0x647   : > { %v4415_v18 = vrot.slane %v4413_v31, 1  ;;  %v10532_v35 = vsel %vm1071_vm2, %v4810_v36, %v10514_v0  ;;  %5418 = vmatpush.bf16.msrb.mxu1 %v7838_v62  ;;  %v7832_v31 = vld [vmem:[%s11014_s12 + $0x48] sm:$0xff] }
 0x648   : > { %5283 = vmatpush.bf16.msra.mxu0 %v7832_v31 }
 0x649   : > { %v4416_v30 = vsel %vm658_vm3, %v4411_v24, %v4415_v18  ;;  %v4419_v4 = vor.u32 %v4417_v10, %v4415_v18  ;;  %v7844_v24 = vld [vmem:[%s11014_s12 + $0xa8] sm:$0xff] }
 0x64a   : > { %7183 = vmatmul.msk.bf16.gmra.mxu1 %vm4475_vm9, %v4416_v30  ;;  %7191 = vmatmul.msk.bf16.gmra.mxu2 %vm4475_vm9, %v4416_v30 }
 0x64b   : > { %5228 = vmatpush.bf16.msrb.mxu2 %v7830_v32  ;;  %5419 = vmatpush.bf16.msrb.mxu1 %v7837_v44 }
 0x64c   : > { %5284 = vmatpush.bf16.msra.mxu0 %v7831_v45 }
 0x64f   : > { %5229 = vmatpush.bf16.msrb.mxu2 %v7829_v60  ;;  %5420 = vmatpush.bf16.msrb.mxu1 %v7836_v3 }
 0x652   : > { %v4739_v37 = vpop.f32.mrf.mxu0 }
 0x653   : > { %5421 = vmatpush.bf16.msrb.mxu1 %v7835_v47 }
 0x657   : > { %5422 = vmatpush.bf16.msrb.mxu1 %v7834_v56 }
 0x658   : > { %v4690_v6 = vpop.f32.mrf.mxu3 }
 0x65a   : > { %7184 = vmatmul.msk.bf16.gmra.mxu1 %vm4475_vm9, %v4419_v4  ;;  %7192 = vmatmul.msk.bf16.gmra.mxu2 %vm4475_vm9, %v4419_v4  ;;  %v4741_v41 = vpop.f32.mrf.mxu0 }
 0x660   : > { %v4692_v27 = vpop.f32.mrf.mxu3 }
 0x662   : > { %v4744_v22 = vpop.f32.mrf.mxu0 }
 0x667   : > { %v10539_v23 = vpop.f32.mrf.mxu1 }
 0x668   : > { %v4695_v38 = vpop.f32.mrf.mxu3  ;;  %v4691_v10 = vadd.f32 %v4690_v6, %v10539_v23 }
 0x66a   : > { %7300 = vmatmul.msk.bf16.vlgmr.msra.gmra.mxu1 %vm4475_vm9, %v10393_v9  ;;  %7308 = vmatmul.msk.bf16.vlgmr.msra.gmra.mxu2 %vm4475_vm9, %v10393_v9  ;;  %v4746_v4 = vpop.f32.mrf.mxu0 }
 0x66d   : > { %v10545_v28 = vpop.f32.mrf.mxu2 }
 0x66f   : > { %v10547_v16 = vpop.f32.mrf.mxu1 }
 0x670   : > { %v4697_v14 = vpop.f32.mrf.mxu3  ;;  %v4693_v51 = vadd.f32 %v4692_v27, %v10547_v16  ;;  %v10712_v16 = vperm.slane %v5061_v46, 1 }
 0x672   : > { %v4749_v47 = vpop.f32.mrf.mxu0 }
 0x675   : > { %v10549_v34 = vpop.f32.mrf.mxu2 }
 0x676   : > { %v4742_v23 = vadd.f32 %v4741_v41, %v10549_v34 }
 0x677   : > { %v10551_v1 = vpop.f32.mrf.mxu1 }
 0x678   : > { %v4696_v45 = vadd.f32 %v4695_v38, %v10551_v1 }
 0x67a   : > { %7301 = vmatmul.msk.bf16.gmra.mxu1 %vm4475_vm9, %v10403_v54  ;;  %7309 = vmatmul.msk.bf16.gmra.mxu2 %vm4475_vm9, %v10403_v54 }
 0x67d   : > { %v10557_v36 = vpop.f32.mrf.mxu2 }
 0x67f   : > { %v10559_v20 = vpop.f32.mrf.mxu1 }
 0x685   : > { %v10561_v15 = vpop.f32.mrf.mxu2 }
 0x687   : > { %v10563_v9 = vpop.f32.mrf.mxu1 }
 0x68a   : > { %7302 = vmatmul.msk.bf16.gmra.mxu1 %vm4475_vm9, %v10413_v12  ;;  %7310 = vmatmul.msk.bf16.gmra.mxu2 %vm4475_vm9, %v10413_v12 }
 0x68d   : > { %v10569_v8 = vpop.f32.mrf.mxu2 }
 0x68f   : > { %v10571_v2 = vpop.f32.mrf.mxu1 }
 0x695   : > { %v10573_v29 = vpop.f32.mrf.mxu2 }
 0x697   : > { %v10575_v54 = vpop.f32.mrf.mxu1 }
 0x69a   : > { %7303 = vmatmul.msk.bf16.gmra.mxu1 %vm4475_vm9, %v10423_v40  ;;  %7311 = vmatmul.msk.bf16.gmra.mxu2 %vm4475_vm9, %v10423_v40 }
 0x69d   : > { %v10581_v52 = vpop.f32.mrf.mxu2 }
 0x69f   : > { %v10583_v63 = vpop.f32.mrf.mxu1 }
 0x6a5   : > { %v10585_v53 = vpop.f32.mrf.mxu2 }
 0x6a7   : > { %v10587_v12 = vpop.f32.mrf.mxu1 }
 0x6aa   : > { %7304 = vmatmul.msk.bf16.gmra.mxu1 %vm4475_vm9, %v10433_v50  ;;  %7312 = vmatmul.msk.bf16.gmra.mxu2 %vm4475_vm9, %v10433_v50 }
 0x6ad   : > { %v10593_v25 = vpop.f32.mrf.mxu2 }
 0x6af   : > { %v10595_v39 = vpop.f32.mrf.mxu1 }
 0x6b5   : > { %v10597_v55 = vpop.f32.mrf.mxu2 }
 0x6b7   : > { %v10599_v40 = vpop.f32.mrf.mxu1 }
 0x6ba   : > { %7305 = vmatmul.msk.bf16.gmra.mxu1 %vm4475_vm9, %v10468_v42  ;;  %7313 = vmatmul.msk.bf16.gmra.mxu2 %vm4475_vm9, %v10468_v42  ;;  %v7828_v42 = vld [vmem:[%s11014_s12 + $0x28] sm:$0xff] }
 0x6bb   : > { %5230 = vmatpush.bf16.msrb.mxu2 %v7828_v42  ;;  %7884 = vmatpush.bf16.msra.mxu3 %v7828_v42  ;;  %v4700_v42 = vpop.f32.mrf.mxu3 }
 0x6bd   : > { %v10611_v50 = vpop.f32.mrf.mxu2 }
 0x6bf   : > { %v10619_v21 = vpop.f32.mrf.mxu1  ;;  %5231 = vmatpush.bf16.msrb.mxu2 %v7827_v61  ;;  %7885 = vmatpush.bf16.msra.mxu3 %v7827_v61  ;;  %v4740_v61 = vadd.f32 %v4739_v37, %v10545_v28 }
 0x6c3   : > { %5232 = vmatpush.bf16.msrb.mxu2 %v7826_v26  ;;  %7886 = vmatpush.bf16.msra.mxu3 %v7826_v26  ;;  %v10707_v26 = vperm.slane %v5061_v46, 0  ;;  %v4702_v31 = vpop.f32.mrf.mxu3  ;;  %v4745_v46 = vadd.f32 %v4744_v22, %v10557_v36  ;;  %v4701_v22 = vadd.f32 %v4700_v42, %v10563_v9 }
 0x6c5   : > { %v10627_v11 = vpop.f32.mrf.mxu2 }
 0x6c7   : > { %v10635_v13 = vpop.f32.mrf.mxu1  ;;  %5233 = vmatpush.bf16.msrb.mxu2 %v7825_v57  ;;  %7887 = vmatpush.bf16.msra.mxu3 %v7825_v57 }
 0x6ca   : > { %7306 = vmatmul.msk.bf16.gmra.mxu1 %vm4475_vm9, %v10532_v35  ;;  %7314 = vmatmul.msk.bf16.gmra.mxu2 %vm4475_vm9, %v10532_v35 }
 0x6cb   : > { %5234 = vmatpush.bf16.msrb.mxu2 %v7824_v17  ;;  %7888 = vmatpush.bf16.msra.mxu3 %v7824_v17  ;;  %v4705_v38 = vpop.f32.mrf.mxu3 }
 0x6cd   : > { %v10647_v19 = vpop.f32.mrf.mxu2 }
 0x6cf   : > { %v10655_v48 = vpop.f32.mrf.mxu1  ;;  %5235 = vmatpush.bf16.msrb.mxu2 %v7823_v5  ;;  %7889 = vmatpush.bf16.msra.mxu3 %v7823_v5 }
 0x6d3   : > { %5469 = vmatpush.bf16.msra.mxu2 %v7844_v24 }
 0x6d5   : > { %v10666_v49 = vpop.f32.mrf.mxu2 }
 0x6d7   : > { %v10674_v33 = vpop.f32.mrf.mxu1 }
 0x6da   : > { %7307 = vmatmul.msk.bf16.gmra.mxu1 %vm4475_vm9, %v10514_v0  ;;  %7315 = vmatmul.msk.bf16.gmra.mxu2 %vm4475_vm9, %v10514_v0  ;;  %v7843_v0 = vld [vmem:[%s11014_s12 + $0xa0] sm:$0xff] }
 0x6db   : > { %5470 = vmatpush.bf16.msra.mxu2 %v7843_v0 }
 0x6dd   : > { %v10686_v7 = vpop.f32.mrf.mxu2 }
 0x6df   : > { %v10691_v18 = vpop.f32.mrf.mxu1  ;;  %5471 = vmatpush.bf16.msra.mxu2 %v7842_v59 }
 0x6e5   : > { %v10696_v35 = vpop.f32.mrf.mxu2 }
 0x6e7   : > { %v4908_v30 = vpop.f32.mrf.mxu1 }
 0x6e8   : > { %v4997_v32 = vadd.f32 %v4908_v30, %v4691_v10  ;;  %v4698_v30 = vadd.f32 %v4697_v14, %v10559_v20  ;;  %v4751_v10 = vpop.f32.mrf.mxu0 }
 0x6e9   : > { %v4752_v42 = vadd.f32 %v4751_v10, %v10573_v29 }
 0x6ea   : > { %v5029_v62 = vmax.f32 %v4997_v32, 0.0 }
 0x6ec   : > { %v5067_v6 = vadd.f32 %v10707_v26, %v5029_v62 }
 0x6ed   : > { %v4957_v60 = vpop.f32.mrf.mxu2 }
 0x6ee   : > { %v4998_v57 = vadd.f32 %v4957_v60, %v4740_v61  ;;  %v4747_v61 = vadd.f32 %v4746_v4, %v10561_v15 }
 0x6ef   : > { %v4910_v58 = vpop.f32.mrf.mxu1 }
 0x6f0   : > { %v4999_v44 = vadd.f32 %v4910_v58, %v4693_v51  ;;  %v5030_v5 = vmax.f32 %v4998_v57, 0.0  ;;  %v4754_v36 = vpop.f32.mrf.mxu0 }
 0x6f2   : > { %v5031_v3 = vmax.f32 %v4999_v44, 0.0  ;;  %v5068_v34 = vadd.f32 %v10712_v16, %v5030_v5  ;;  %v4707_v5 = vpop.f32.mrf.mxu3 }
 0x6f4   : > { %v5069_v17 = vadd.f32 %v10707_v26, %v5031_v3 }
 0x6f5   : > { %v4959_v43 = vpop.f32.mrf.mxu2 }
 0x6f6   : > { %v5121_v27 = vpack.c.bf16 %v5069_v17, %v5067_v6  ;;  %v5000_v56 = vadd.f32 %v4959_v43, %v4742_v23 }
 0x6f7   : > { %v4913_v28 = vpop.f32.mrf.mxu1 }
 0x6f8   : > { %v5032_v37 = vmax.f32 %v5000_v56, 0.0  ;;  %5236 = vmatmul.bf16.vlgmr.msrb.gmra.mxu2 %v5121_v27  ;;  %5423 = vmatmul.bf16.vlgmr.msrb.gmra.mxu1 %v5121_v27  ;;  %v5001_v0 = vadd.f32 %v4913_v28, %v4696_v45  ;;  %v4703_v56 = vadd.f32 %v4702_v31, %v10571_v2  ;;  %v4756_v9 = vpop.f32.mrf.mxu0 }
 0x6fa   : > { %v5070_v41 = vadd.f32 %v10712_v16, %v5032_v37  ;;  %v5033_v60 = vmax.f32 %v5001_v0, 0.0  ;;  %v4750_v37 = vadd.f32 %v4749_v47, %v10569_v8  ;;  %v4710_v31 = vpop.f32.mrf.mxu3  ;;  %v4706_v8 = vadd.f32 %v4705_v38, %v10575_v54 }
 0x6fb   : > { %v4757_v38 = vadd.f32 %v4756_v9, %v10585_v53 }
 0x6fc   : > { %v5122_v24 = vpack.c.bf16 %v5070_v41, %v5068_v34  ;;  %v5071_v62 = vadd.f32 %v10707_v26, %v5033_v60 }
 0x6fd   : > { %v4962_v59 = vpop.f32.mrf.mxu2 }
 0x6fe   : > { %7360 = vmatmul.msk.bf16.vlgmr.msra.gmra.mxu0 %vm5203_vm10, %v5122_v24  ;;  %v5002_v58 = vadd.f32 %v4962_v59, %v4745_v46 }
 0x6ff   : > { %v4915_v32 = vpop.f32.mrf.mxu1 }
 0x700   : > { %v5003_v51 = vadd.f32 %v4915_v32, %v4698_v30  ;;  %v5034_v3 = vmax.f32 %v5002_v58, 0.0 }
 0x702   : > { %v5035_v1 = vmax.f32 %v5003_v51, 0.0  ;;  %v5072_v17 = vadd.f32 %v10712_v16, %v5034_v3 }
 0x704   : > { %v5073_v44 = vadd.f32 %v10707_v26, %v5035_v1  ;;  %v4759_v1 = vpop.f32.mrf.mxu0 }
 0x705   : > { %v4964_v57 = vpop.f32.mrf.mxu2 }
 0x706   : > { %v5123_v20 = vpack.c.bf16 %v5073_v44, %v5071_v62  ;;  %v5004_v14 = vadd.f32 %v4964_v57, %v4747_v61  ;;  %v4708_v62 = vadd.f32 %v4707_v5, %v10583_v63  ;;  %v4755_v57 = vadd.f32 %v4754_v36, %v10581_v52 }
 0x707   : > { %v4918_v23 = vpop.f32.mrf.mxu1  ;;  %v4711_v52 = vadd.f32 %v4710_v31, %v10587_v12 }
 0x708   : > { %v5036_v6 = vmax.f32 %v5004_v14, 0.0  ;;  %5241 = vmatmul.bf16.vlgmr.msra.gmra.mxu3 %v5123_v20  ;;  %5428 = vmatmul.bf16.gmra.mxu1 %v5123_v20  ;;  %v5005_v43 = vadd.f32 %v4918_v23, %v4701_v22  ;;  %v4712_v14 = vpop.f32.mrf.mxu3 }
 0x709   : > { %7434 = vmatmul.msk.bf16.vlgmr.msra.gmra.mxu2 %vm5203_vm10, %v5122_v24 }
 0x70a   : > { %v5074_v15 = vadd.f32 %v10712_v16, %v5036_v6  ;;  %v5037_v45 = vmax.f32 %v5005_v43, 0.0 }
 0x70c   : > { %v5124_v4 = vpack.c.bf16 %v5074_v15, %v5072_v17  ;;  %v5075_v0 = vadd.f32 %v10707_v26, %v5037_v45  ;;  %v4761_v43 = vpop.f32.mrf.mxu0 }
 0x70d   : > { %v4967_v27 = vpop.f32.mrf.mxu2 }
 0x70e   : > { %7361 = vmatmul.msk.bf16.gmra.mxu0 %vm5203_vm10, %v5124_v4  ;;  %v5006_v41 = vadd.f32 %v4967_v27, %v4750_v37 }
 0x70f   : > { %v4920_v28 = vpop.f32.mrf.mxu1 }
 0x710   : > { %v5007_v34 = vadd.f32 %v4920_v28, %v4703_v56  ;;  %v5038_v32 = vmax.f32 %v5006_v41, 0.0  ;;  %v4715_v56 = vpop.f32.mrf.mxu3 }
 0x712   : > { %v5039_v24 = vmax.f32 %v5007_v34, 0.0  ;;  %v5076_v47 = vadd.f32 %v10712_v16, %v5038_v32  ;;  %v4713_v34 = vadd.f32 %v4712_v14, %v10595_v39 }
 0x714   : > { %v5077_v59 = vadd.f32 %v10707_v26, %v5039_v24  ;;  %v4760_v24 = vadd.f32 %v4759_v1, %v10593_v25  ;;  %v4716_v25 = vadd.f32 %v4715_v56, %v10599_v40 }
 0x715   : > { %v4969_v30 = vpop.f32.mrf.mxu2 }
 0x716   : > { %v5008_v46 = vadd.f32 %v4969_v30, %v4752_v42  ;;  %v5125_v2 = vpack.c.bf16 %v5077_v59, %v5075_v0  ;;  %v4764_v0 = vpop.f32.mrf.mxu0  ;;  %v4762_v30 = vadd.f32 %v4761_v43, %v10597_v55 }
 0x717   : > { %v4923_v60 = vpop.f32.mrf.mxu1 }
 0x718   : > { %v5040_v51 = vmax.f32 %v5008_v46, 0.0  ;;  %5246 = vmatmul.bf16.gmra.mxu3 %v5125_v2  ;;  %5433 = vmatmul.bf16.gmra.mxu1 %v5125_v2  ;;  %v5009_v58 = vadd.f32 %v4923_v60, %v4706_v8  ;;  %v4717_v2 = vpop.f32.mrf.mxu3 }
 0x719   : > { %7435 = vmatmul.msk.bf16.gmra.mxu2 %vm5203_vm10, %v5124_v4 }
 0x71a   : > { %v5078_v29 = vadd.f32 %v10712_v16, %v5040_v51  ;;  %v5041_v3 = vmax.f32 %v5009_v58, 0.0 }
 0x71c   : > { %v5126_v10 = vpack.c.bf16 %v5078_v29, %v5076_v47  ;;  %v5079_v6 = vadd.f32 %v10707_v26, %v5041_v3  ;;  %v4765_v3 = vadd.f32 %v4764_v0, %v10611_v50 }
 0x71d   : > { %v4972_v61 = vpop.f32.mrf.mxu2 }
 0x71e   : > { %7362 = vmatmul.msk.bf16.gmra.mxu0 %vm5203_vm10, %v5126_v10  ;;  %v5010_v23 = vadd.f32 %v4972_v61, %v4755_v57 }
 0x71f   : > { %v4925_v44 = vpop.f32.mrf.mxu1 }
 0x720   : > { %v5011_v20 = vadd.f32 %v4925_v44, %v4708_v62  ;;  %v5042_v15 = vmax.f32 %v5010_v23, 0.0  ;;  %v4718_v62 = vadd.f32 %v4717_v2, %v10619_v21  ;;  %v4720_v44 = vpop.f32.mrf.mxu3 }
 0x722   : > { %v5043_v54 = vmax.f32 %v5011_v20, 0.0  ;;  %v5080_v36 = vadd.f32 %v10712_v16, %v5042_v15 }
 0x724   : > { %v5081_v22 = vadd.f32 %v10707_v26, %v5043_v54 }
 0x725   : > { %v4974_v17 = vpop.f32.mrf.mxu2 }
 0x726   : > { %v5012_v4 = vadd.f32 %v4974_v17, %v4757_v38  ;;  %v5127_v63 = vpack.c.bf16 %v5081_v22, %v5079_v6 }
 0x727   : > { %v4928_v5 = vpop.f32.mrf.mxu1 }
 0x728   : > { %v5044_v27 = vmax.f32 %v5012_v4, 0.0  ;;  %5251 = vmatmul.bf16.gmra.mxu3 %v5127_v63  ;;  %5438 = vmatmul.bf16.gmra.mxu1 %v5127_v63  ;;  %v5013_v37 = vadd.f32 %v4928_v5, %v4711_v52  ;;  %v4722_v50 = vpop.f32.mrf.mxu3  ;;  %v4721_v5 = vadd.f32 %v4720_v44, %v10635_v13 }
 0x729   : > { %7436 = vmatmul.msk.bf16.gmra.mxu2 %vm5203_vm10, %v5126_v10  ;;  %v4766_v10 = vpop.f32.mrf.mxu0  ;;  %v4723_v56 = vadd.f32 %v4722_v50, %v10655_v48 }
 0x72a   : > { %v5082_v53 = vadd.f32 %v10712_v16, %v5044_v27  ;;  %v5045_v9 = vmax.f32 %v5013_v37, 0.0  ;;  %v4767_v54 = vadd.f32 %v4766_v10, %v10627_v11 }
 0x72c   : > { %v5128_v28 = vpack.c.bf16 %v5082_v53, %v5080_v36  ;;  %v5083_v32 = vadd.f32 %v10707_v26, %v5045_v9 }
 0x72d   : > { %v4977_v45 = vpop.f32.mrf.mxu2 }
 0x72e   : > { %7363 = vmatmul.msk.bf16.gmra.mxu0 %vm5203_vm10, %v5128_v28  ;;  %v5014_v59 = vadd.f32 %v4977_v45, %v4760_v24 }
 0x72f   : > { %v4930_v41 = vpop.f32.mrf.mxu1 }
 0x730   : > { %v5015_v42 = vadd.f32 %v4930_v41, %v4713_v34  ;;  %v5046_v60 = vmax.f32 %v5014_v59, 0.0  ;;  %v4725_v13 = vpop.f32.mrf.mxu3 }
 0x731   : > { %v4769_v22 = vpop.f32.mrf.mxu0 }
 0x732   : > { %v5047_v12 = vmax.f32 %v5015_v42, 0.0  ;;  %v5084_v29 = vadd.f32 %v10712_v16, %v5046_v60  ;;  %v4770_v45 = vadd.f32 %v4769_v22, %v10647_v19 }
 0x734   : > { %v5085_v46 = vadd.f32 %v10707_v26, %v5047_v12 }
 0x735   : > { %v4979_v31 = vpop.f32.mrf.mxu2 }
 0x736   : > { %v5016_v39 = vadd.f32 %v4979_v31, %v4762_v30  ;;  %v5129_v51 = vpack.c.bf16 %v5085_v46, %v5083_v32  ;;  %v4726_v31 = vadd.f32 %v4725_v13, %v10674_v33 }
 0x737   : > { %v4933_v8 = vpop.f32.mrf.mxu1 }
 0x738   : > { %v5048_v47 = vmax.f32 %v5016_v39, 0.0  ;;  %5256 = vmatmul.bf16.gmra.mxu3 %v5129_v51  ;;  %5443 = vmatmul.bf16.gmra.mxu1 %v5129_v51  ;;  %v5017_v1 = vadd.f32 %v4933_v8, %v4716_v25  ;;  %v4727_v8 = vpop.f32.mrf.mxu3 }
 0x739   : > { %7437 = vmatmul.msk.bf16.gmra.mxu2 %vm5203_vm10, %v5128_v28  ;;  %v4771_v28 = vpop.f32.mrf.mxu0  ;;  %v4728_v25 = vadd.f32 %v4727_v8, %v10691_v18 }
 0x73a   : > { %v5086_v55 = vadd.f32 %v10712_v16, %v5048_v47  ;;  %v5049_v20 = vmax.f32 %v5017_v1, 0.0  ;;  %v4772_v42 = vadd.f32 %v4771_v28, %v10666_v49 }
 0x73c   : > { %v5130_v58 = vpack.c.bf16 %v5086_v55, %v5084_v29  ;;  %v5087_v38 = vadd.f32 %v10707_v26, %v5049_v20 }
 0x73d   : > { %v4982_v61 = vpop.f32.mrf.mxu2 }
 0x73e   : > { %7364 = vmatmul.msk.bf16.gmra.mxu0 %vm5203_vm10, %v5130_v58  ;;  %v5018_v23 = vadd.f32 %v4982_v61, %v4765_v3 }
 0x73f   : > { %v4935_v57 = vpop.f32.mrf.mxu1 }
 0x740   : > { %v5019_v14 = vadd.f32 %v4935_v57, %v4718_v62  ;;  %v5050_v15 = vmax.f32 %v5018_v23, 0.0 }
 0x741   : > { %v4774_v19 = vpop.f32.mrf.mxu0 }
 0x742   : > { %v5051_v40 = vmax.f32 %v5019_v14, 0.0  ;;  %v5088_v11 = vadd.f32 %v10712_v16, %v5050_v15  ;;  %v4775_v55 = vadd.f32 %v4774_v19, %v10686_v7 }
 0x744   : > { %v5089_v6 = vadd.f32 %v10707_v26, %v5051_v40 }
 0x745   : > { %v4984_v17 = vpop.f32.mrf.mxu2 }
 0x746   : > { %v5020_v21 = vadd.f32 %v4984_v17, %v4767_v54  ;;  %v5131_v4 = vpack.c.bf16 %v5089_v6, %v5087_v38 }
 0x747   : > { %v4938_v63 = vpop.f32.mrf.mxu1 }
 0x748   : > { %v5052_v43 = vmax.f32 %v5020_v21, 0.0  ;;  %5261 = vmatmul.bf16.gmra.mxu3 %v5131_v4  ;;  %5448 = vmatmul.bf16.gmra.mxu1 %v5131_v4  ;;  %v5021_v36 = vadd.f32 %v4938_v63, %v4721_v5 }
 0x749   : > { %7438 = vmatmul.msk.bf16.gmra.mxu2 %vm5203_vm10, %v5130_v58  ;;  %v4776_v33 = vpop.f32.mrf.mxu0 }
 0x74a   : > { %v5090_v27 = vadd.f32 %v10712_v16, %v5052_v43  ;;  %v5053_v34 = vmax.f32 %v5021_v36, 0.0  ;;  %v4777_v62 = vadd.f32 %v4776_v33, %v10696_v35 }
 0x74c   : > { %v5132_v52 = vpack.c.bf16 %v5090_v27, %v5088_v11  ;;  %v5091_v0 = vadd.f32 %v10707_v26, %v5053_v34 }
 0x74d   : > { %v4987_v53 = vpop.f32.mrf.mxu2 }
 0x74e   : > { %7365 = vmatmul.msk.bf16.gmra.mxu0 %vm5203_vm10, %v5132_v52  ;;  %v5022_v24 = vadd.f32 %v4987_v53, %v4770_v45 }
 0x74f   : > { %v4940_v37 = vpop.f32.mrf.mxu1 }
 0x750   : > { %v5023_v41 = vadd.f32 %v4940_v37, %v4723_v56  ;;  %v5054_v30 = vmax.f32 %v5022_v24, 0.0 }
 0x752   : > { %v5055_v9 = vmax.f32 %v5023_v41, 0.0  ;;  %v5092_v60 = vadd.f32 %v10712_v16, %v5054_v30 }
 0x754   : > { %v5093_v59 = vadd.f32 %v10707_v26, %v5055_v9 }
 0x755   : > { %v4989_v12 = vpop.f32.mrf.mxu2 }
 0x756   : > { %v5024_v48 = vadd.f32 %v4989_v12, %v4772_v42  ;;  %v5133_v32 = vpack.c.bf16 %v5093_v59, %v5091_v0 }
 0x757   : > { %v4943_v46 = vpop.f32.mrf.mxu1 }
 0x758   : > { %v5056_v2 = vmax.f32 %v5024_v48, 0.0  ;;  %5266 = vmatmul.bf16.gmra.mxu3 %v5133_v32  ;;  %5453 = vmatmul.bf16.gmra.mxu1 %v5133_v32  ;;  %v5025_v51 = vadd.f32 %v4943_v46, %v4726_v31 }
 0x759   : > { %7439 = vmatmul.msk.bf16.gmra.mxu2 %vm5203_vm10, %v5132_v52 }
 0x75a   : > { %v5094_v49 = vadd.f32 %v10712_v16, %v5056_v2  ;;  %v5057_v10 = vmax.f32 %v5025_v51, 0.0 }
 0x75c   : > { %v5134_v39 = vpack.c.bf16 %v5094_v49, %v5092_v60  ;;  %v5095_v44 = vadd.f32 %v10707_v26, %v5057_v10 }
 0x75d   : > { %v4992_v47 = vpop.f32.mrf.mxu2 }
 0x75e   : > { %7366 = vmatmul.msk.bf16.gmra.mxu0 %vm5203_vm10, %v5134_v39  ;;  %v5026_v1 = vadd.f32 %v4992_v47, %v4775_v55 }
 0x75f   : > { %v4945_v29 = vpop.f32.mrf.mxu1 }
 0x760   : > { %v5027_v58 = vadd.f32 %v4945_v29, %v4728_v25  ;;  %v5058_v20 = vmax.f32 %v5026_v1, 0.0 }
 0x762   : > { %v5059_v61 = vmax.f32 %v5027_v58, 0.0  ;;  %v5096_v7 = vadd.f32 %v10712_v16, %v5058_v20 }
 0x764   : > { %v5097_v57 = vadd.f32 %v10707_v26, %v5059_v61 }
 0x765   : > { %v4994_v3 = vpop.f32.mrf.mxu2 }
 0x766   : > { %v5028_v14 = vadd.f32 %v4994_v3, %v4777_v62  ;;  %v5135_v18 = vpack.c.bf16 %v5097_v57, %v5095_v44 }
 0x768   : > { %v5060_v23 = vmax.f32 %v5028_v14, 0.0  ;;  %5271 = vmatmul.bf16.gmra.mxu3 %v5135_v18  ;;  %5458 = vmatmul.bf16.gmra.mxu1 %v5135_v18 }
 0x769   : > { %7440 = vmatmul.msk.bf16.gmra.mxu2 %vm5203_vm10, %v5134_v39 }
 0x76a   : > { %v5098_v40 = vadd.f32 %v10712_v16, %v5060_v23 }
 0x76c   : > { %v5136_v54 = vpack.c.bf16 %v5098_v40, %v5096_v7 }
 0x76e   : > { %7367 = vmatmul.msk.bf16.gmra.mxu0 %vm5203_vm10, %v5136_v54 }
 0x775   : > { %v5424_v35 = vpop.f32.mrf.mxu1 }
 0x779   : > { %7441 = vmatmul.msk.bf16.gmra.mxu2 %vm5203_vm10, %v5136_v54 }
 0x77b   : > { %v5237_v26 = vpop.f32.mrf.mxu2  ;;  %v5286_v38 = vpop.f32.mrf.mxu0 }
 0x77c   : > { %v5287_v6 = vadd.f32 %v5286_v38, %v5237_v26 }
 0x77d   : > { %v5426_v22 = vpop.f32.mrf.mxu1 }
 0x783   : > { %v5239_v17 = vpop.f32.mrf.mxu2  ;;  %v5288_v15 = vpop.f32.mrf.mxu0 }
 0x784   : > { %v5289_v36 = vadd.f32 %v5288_v15, %v5239_v17 }
 0x785   : > { %v5429_v21 = vpop.f32.mrf.mxu1 }
 0x78b   : > { %v5242_v4 = vpop.f32.mrf.mxu3  ;;  %v5291_v63 = vpop.f32.mrf.mxu0 }
 0x78c   : > { %v5473_v43 = vpop.f32.mrf.mxu2  ;;  %v5292_v9 = vadd.f32 %v5291_v63, %v5242_v4 }
 0x78d   : > { %v5474_v50 = vadd.f32 %v5473_v43, %v5424_v35  ;;  %v5431_v5 = vpop.f32.mrf.mxu1 }
 0x78f   : > { %v5513_v11 = vmax.f32 %v5287_v6, %v5474_v50 }
 0x793   : > { %v5244_v16 = vpop.f32.mrf.mxu3  ;;  %v5293_v27 = vpop.f32.mrf.mxu0 }
 0x794   : > { %v5475_v52 = vpop.f32.mrf.mxu2  ;;  %v5294_v48 = vadd.f32 %v5293_v27, %v5244_v16 }
 0x795   : > { %v5476_v53 = vadd.f32 %v5475_v52, %v5426_v22  ;;  %v5434_v56 = vpop.f32.mrf.mxu1 }
 0x797   : > { %v5514_v28 = vmax.f32 %v5289_v36, %v5476_v53 }
 0x799   : > { %v10788_v37 = vpack.c.bf16 %v5514_v28, %v5513_v11 }
 0x79b   : > { %v5247_v45 = vpop.f32.mrf.mxu3  ;;  %v5296_v34 = vpop.f32.mrf.mxu0 }
 0x79c   : > { %v5297_v41 = vadd.f32 %v5296_v34, %v5247_v45  ;;  %v5478_v24 = vpop.f32.mrf.mxu2 }
 0x79d   : > { %v5479_v13 = vadd.f32 %v5478_v24, %v5429_v21  ;;  %v5436_v0 = vpop.f32.mrf.mxu1 }
 0x79f   : > { %v5515_v42 = vmax.f32 %v5292_v9, %v5479_v13 }
 0x7a3   : > { %v5249_v59 = vpop.f32.mrf.mxu3  ;;  %v5298_v12 = vpop.f32.mrf.mxu0 }
 0x7a4   : > { %v5480_v30 = vpop.f32.mrf.mxu2  ;;  %v5299_v10 = vadd.f32 %v5298_v12, %v5249_v59 }
 0x7a5   : > { %v5481_v32 = vadd.f32 %v5480_v30, %v5431_v5  ;;  %v5439_v19 = vpop.f32.mrf.mxu1 }
 0x7a7   : > { %v5516_v46 = vmax.f32 %v5294_v48, %v5481_v32 }
 0x7a9   : > { %v10790_v2 = vpack.c.bf16 %v5516_v46, %v5515_v42 }
 0x7ab   : > { %v5252_v31 = vpop.f32.mrf.mxu3  ;;  %v5301_v60 = vpop.f32.mrf.mxu0 }
 0x7ac   : > { %v5302_v49 = vadd.f32 %v5301_v60, %v5252_v31  ;;  %v5483_v39 = vpop.f32.mrf.mxu2 }
 0x7ad   : > { %v5484_v51 = vadd.f32 %v5483_v39, %v5434_v56  ;;  %v5441_v29 = vpop.f32.mrf.mxu1 }
 0x7af   : > { %v5517_v8 = vmax.f32 %v5297_v41, %v5484_v51 }
 0x7b3   : > { %v5254_v47 = vpop.f32.mrf.mxu3  ;;  %v5303_v25 = vpop.f32.mrf.mxu0 }
 0x7b4   : > { %v5485_v55 = vpop.f32.mrf.mxu2  ;;  %v5304_v23 = vadd.f32 %v5303_v25, %v5254_v47 }
 0x7b5   : > { %v5486_v58 = vadd.f32 %v5485_v55, %v5436_v0  ;;  %v5444_v20 = vpop.f32.mrf.mxu1 }
 0x7b7   : > { %v5518_v1 = vmax.f32 %v5299_v10, %v5486_v58 }
 0x7b9   : > { %v10792_v61 = vpack.c.bf16 %v5518_v1, %v5517_v8 }
 0x7bb   : > { %v5257_v33 = vpop.f32.mrf.mxu3  ;;  %v5306_v62 = vpop.f32.mrf.mxu0 }
 0x7bc   : > { %v10794_v44 = vadd.f32 %v5306_v62, %v5257_v33  ;;  %v5488_v57 = vpop.f32.mrf.mxu2 }
 0x7bd   : > { %v5489_v3 = vadd.f32 %v5488_v57, %v5439_v19  ;;  %v5446_v26 = vpop.f32.mrf.mxu1 }
 0x7bf   : > { %v5519_v14 = vmax.f32 %v5302_v49, %v5489_v3 }
 0x7c3   : > { %v5259_v7 = vpop.f32.mrf.mxu3  ;;  %v5308_v54 = vpop.f32.mrf.mxu0 }
 0x7c4   : > { %v5490_v18 = vpop.f32.mrf.mxu2  ;;  %v5309_v57 = vadd.f32 %v5308_v54, %v5259_v7  ;;  %v7846_v7 = vld [vmem:[%s11015_s13 + $0x8] sm:$0xff] }
 0x7c5   : > { %v5491_v40 = vadd.f32 %v5490_v18, %v5441_v29  ;;  %v5449_v4 = vpop.f32.mrf.mxu1 }
 0x7c7   : > { %v5520_v35 = vmax.f32 %v5304_v23, %v5491_v40  ;;  %v7845_v23 = vld [vmem:[%s11015_s13] sm:$0xff]  ;;  %v5541_v40 = vld [vmem:[%s11015_s13 + $0x10] sm:$0xf] }
 0x7c8   : > { %v5551_v54 = vunpack.c.l.b16 %v5541_v40  ;;  %v7868_v40 = vld [vmem:[%s11018_s16 + $0x20] sm:$0xff] }
 0x7c9   : > { %v10796_v38 = vpack.c.bf16 %v5520_v35, %v5519_v14 }
 0x7ca   : > { %v5554_v35 = vpack.c.b16 %v5551_v54, %v5551_v54 }
 0x7cb   : > { %v5262_v17 = vpop.f32.mrf.mxu3  ;;  %v5311_v21 = vpop.f32.mrf.mxu0 }
 0x7cc   : > { %v5493_v6 = vpop.f32.mrf.mxu2  ;;  %v5312_v1 = vadd.f32 %v5311_v21, %v5262_v17  ;;  %v7853_v17 = vld [vmem:[%s11016_s14 + $0x20] sm:$0xff] }
 0x7cd   : > { %v5494_v22 = vadd.f32 %v5493_v6, %v5444_v20  ;;  %v5451_v5 = vpop.f32.mrf.mxu1 }
 0x7cf   : > { %v5521_v15 = vmax.f32 %v10794_v44, %v5494_v22 }
 0x7d3   : > { %v5264_v43 = vpop.f32.mrf.mxu3  ;;  %v5313_v50 = vpop.f32.mrf.mxu0 }
 0x7d4   : > { %v5495_v63 = vpop.f32.mrf.mxu2  ;;  %v5314_v55 = vadd.f32 %v5313_v50, %v5264_v43  ;;  %v7849_v50 = vld [vmem:[%s11016_s14] sm:$0xff] }
 0x7d5   : > { %v5454_v36 = vpop.f32.mrf.mxu1  ;;  %v5496_v33 = vadd.f32 %v5495_v63, %v5446_v26  ;;  %v7847_v26 = vld [vmem:[%s11015_s13 + $0x14] sm:$0xff]  ;;  %v7850_v63 = vld [vmem:[%s11016_s14 + $0x8] sm:$0xff] }
 0x7d7   : > { %v5522_v20 = vmax.f32 %v5309_v57, %v5496_v33 }
 0x7d9   : > { %v5533_v18 = vpack.c.bf16 %v5522_v20, %v5521_v15  ;;  %v7852_v15 = vld [vmem:[%s11016_s14 + $0x18] sm:$0xff] }
 0x7db   : > { %v5267_v16 = vpop.f32.mrf.mxu3  ;;  %v5316_v27 = vpop.f32.mrf.mxu0 }
 0x7dc   : > { %v5498_v11 = vpop.f32.mrf.mxu2  ;;  %v5317_v8 = vadd.f32 %v5316_v27, %v5267_v16  ;;  %v7857_v16 = vld [vmem:[%s11016_s14 + $0x40] sm:$0xff]  ;;  %v7856_v27 = vld [vmem:[%s11016_s14 + $0x38] sm:$0xff] }
 0x7dd   : > { %v5456_v45 = vpop.f32.mrf.mxu1  ;;  %v5499_v10 = vadd.f32 %v5498_v11, %v5449_v4  ;;  %v7851_v4 = vld [vmem:[%s11016_s14 + $0x10] sm:$0xff] }
 0x7df   : > { %v5523_v3 = vmax.f32 %v5312_v1, %v5499_v10 }
 0x7e3   : > { %v5269_v56 = vpop.f32.mrf.mxu3  ;;  %v5318_v28 = vpop.f32.mrf.mxu0 }
 0x7e4   : > { %v5500_v52 = vpop.f32.mrf.mxu2  ;;  %v5319_v49 = vadd.f32 %v5318_v28, %v5269_v56  ;;  %v7863_v28 = vld [vmem:[%s11016_s14 + $0x70] sm:$0xff] }
 0x7e5   : > { %v5459_v9 = vpop.f32.mrf.mxu1  ;;  %v5501_v47 = vadd.f32 %v5500_v52, %v5451_v5  ;;  %v7858_v5 = vld [vmem:[%s11016_s14 + $0x48] sm:$0xff] }
 0x7e6   : > { %7890 = vmatpush.bf16.msra.mxu1 %v7858_v5  ;;  %5736 = vmatpush.bf16.msrb.mxu0 %v7858_v5  ;;  %v7878_v5 = vld [vmem:[%s11018_s16 + $0x70] sm:$0xff] }
 0x7e7   : > { %v5524_v62 = vmax.f32 %v5314_v55, %v5501_v47 }
 0x7e9   : > { %v5534_v14 = vpack.c.bf16 %v5524_v62, %v5523_v3 }
 0x7ea   : > { %7891 = vmatpush.bf16.msra.mxu1 %v7857_v16  ;;  %5737 = vmatpush.bf16.msrb.mxu0 %v7857_v16  ;;  %v7872_v16 = vld [vmem:[%s11018_s16 + $0x40] sm:$0xff] }
 0x7eb   : > { %v5272_v41 = vpop.f32.mrf.mxu3  ;;  %v5321_v24 = vpop.f32.mrf.mxu0 }
 0x7ec   : > { %v5503_v53 = vpop.f32.mrf.mxu2  ;;  %v5322_v48 = vadd.f32 %v5321_v24, %v5272_v41 }
 0x7ed   : > { %v5461_v12 = vpop.f32.mrf.mxu1  ;;  %v5504_v39 = vadd.f32 %v5503_v53, %v5454_v36  ;;  %v7855_v36 = vld [vmem:[%s11016_s14 + $0x30] sm:$0xff]  ;;  %v7854_v53 = vld [vmem:[%s11016_s14 + $0x28] sm:$0xff] }
 0x7ee   : > { %7892 = vmatpush.bf16.msra.mxu1 %v7856_v27  ;;  %5738 = vmatpush.bf16.msrb.mxu0 %v7856_v27  ;;  %v7877_v27 = vld [vmem:[%s11018_s16 + $0x68] sm:$0xff] }
 0x7ef   : > { %v5525_v58 = vmax.f32 %v5317_v8, %v5504_v39 }
 0x7f2   : > { %7893 = vmatpush.bf16.msra.mxu1 %v7855_v36  ;;  %5739 = vmatpush.bf16.msrb.mxu0 %v7855_v36 }
 0x7f3   : > { %v5274_v42 = vpop.f32.mrf.mxu3  ;;  %v5323_v0 = vpop.f32.mrf.mxu0 }
 0x7f4   : > { %v5505_v34 = vpop.f32.mrf.mxu2  ;;  %v5324_v32 = vadd.f32 %v5323_v0, %v5274_v42  ;;  %v7860_v0 = vld [vmem:[%s11016_s14 + $0x58] sm:$0xff] }
 0x7f5   : > { %v5506_v19 = vadd.f32 %v5505_v34, %v5456_v45 }
 0x7f6   : > { %7894 = vmatpush.bf16.msra.mxu1 %v7854_v53  ;;  %5740 = vmatpush.bf16.msrb.mxu0 %v7854_v53 }
 0x7f7   : > { %v5526_v25 = vmax.f32 %v5319_v49, %v5506_v19 }
 0x7f9   : > { %v5535_v44 = vpack.c.bf16 %v5526_v25, %v5525_v58 }
 0x7fa   : > { %5876 = vmatpush.bf16.msrb.mxu1 %v7863_v28 }
 0x7fc   : > { %v5508_v13 = vpop.f32.mrf.mxu2 }
 0x7fd   : > { %v5509_v59 = vadd.f32 %v5508_v13, %v5459_v9  ;;  %v7862_v9 = vld [vmem:[%s11016_s14 + $0x68] sm:$0xff]  ;;  %v7861_v13 = vld [vmem:[%s11016_s14 + $0x60] sm:$0xff] }
 0x7fe   : > { %5877 = vmatpush.bf16.msrb.mxu1 %v7862_v9 }
 0x7ff   : > { %v5527_v31 = vmax.f32 %v5322_v48, %v5509_v59  ;;  %v7859_v59 = vld [vmem:[%s11016_s14 + $0x50] sm:$0xff] }
 0x802   : > { %5878 = vmatpush.bf16.msrb.mxu1 %v7861_v13 }
 0x804   : > { %v5510_v30 = vpop.f32.mrf.mxu2 }
 0x805   : > { %v5511_v46 = vadd.f32 %v5510_v30, %v5461_v12 }
 0x806   : > { %5879 = vmatpush.bf16.msrb.mxu1 %v7860_v0 }
 0x807   : > { %v5528_v60 = vmax.f32 %v5324_v32, %v5511_v46 }
 0x809   : > { %v5536_v51 = vpack.c.bf16 %v5528_v60, %v5527_v31 }
 0x80a   : > { %5880 = vmatpush.bf16.msrb.mxu1 %v7859_v59 }
 0x80b   : > { %v5566_v29 = vsel %vm835_vm0, %v5536_v51, 0 }
 0x80c   : > { %5568 = vmatpush.bf16.msrb.mxu3 %v5566_v29 }
 0x810   : > { %5569 = vmatpush.bf16.msrb.mxu3 %v5535_v44 }
 0x814   : > { %5570 = vmatpush.bf16.msrb.mxu3 %v5534_v14 }
 0x818   : > { %5571 = vmatpush.bf16.msrb.mxu3 %v5533_v18 }
 0x81c   : > { %5572 = vmatpush.bf16.msrb.mxu3 %v10796_v38 }
 0x820   : > { %5573 = vmatpush.bf16.msrb.mxu3 %v10792_v61 }
 0x824   : > { %5574 = vmatpush.bf16.msrb.mxu3 %v10790_v2 }
 0x828   : > { %5575 = vmatpush.bf16.msrb.mxu3 %v10788_v37 }
 0x82b   : > { %7450 = vmatmul.msk.bf16.vlgmr.msrb.gmra.mxu3 %vm5555_vm11, %v7845_v23 }
 0x82c   : > { %5619 = vmatpush.bf16.msra.mxu3 %v5566_v29 }
 0x830   : > { %5620 = vmatpush.bf16.msra.mxu3 %v5535_v44 }
 0x834   : > { %5621 = vmatpush.bf16.msra.mxu3 %v5534_v14 }
 0x838   : > { %5622 = vmatpush.bf16.msra.mxu3 %v5533_v18 }
 0x83b   : > { %7451 = vmatmul.msk.bf16.gmra.mxu3 %vm5555_vm11, %v7846_v7  ;;  %v7869_v7 = vld [vmem:[%s11018_s16 + $0x28] sm:$0xff] }
 0x83c   : > { %5623 = vmatpush.bf16.msra.mxu3 %v10796_v38  ;;  %6079 = vmatpush.bf16.msra.mxu0 %v7869_v7 }
 0x840   : > { %5624 = vmatpush.bf16.msra.mxu3 %v10792_v61  ;;  %v7848_v61 = vld [vmem:[%s11015_s13 + $0x1c] sm:$0xff]  ;;  %6080 = vmatpush.bf16.msra.mxu0 %v7868_v40 }
 0x844   : > { %5625 = vmatpush.bf16.msra.mxu3 %v10790_v2  ;;  %v7457_v2 = vld [vmem:[%s11015_s13 + $0x24] sm:$0xf] }
 0x848   : > { %5626 = vmatpush.bf16.msra.mxu3 %v10788_v37  ;;  %v5606_v37 = vunpack.c.l.b16 %v7457_v2  ;;  %v7865_v2 = vld [vmem:[%s11018_s16 + $0x8] sm:$0xff] }
 0x84a   : > { %v5609_v38 = vpack.c.b16 %v5606_v37, %v5606_v37  ;;  %v7881_v37 = vld [vmem:[%s11018_s16 + $0x88] sm:$0xff] }
 0x84b   : > { %7452 = vmatmul.msk.bf16.gmra.mxu3 %vm5555_vm11, %v5554_v35  ;;  %v7867_v35 = vld [vmem:[%s11018_s16 + $0x18] sm:$0xff] }
 0x84c   : > { %5795 = vmatpush.bf16.msrb.mxu3 %v7853_v17  ;;  %6081 = vmatpush.bf16.msra.mxu0 %v7867_v35  ;;  %v7880_v17 = vld [vmem:[%s11018_s16 + $0x80] sm:$0xff] }
 0x850   : > { %5796 = vmatpush.bf16.msrb.mxu3 %v7852_v15 }
 0x854   : > { %5797 = vmatpush.bf16.msrb.mxu3 %v7851_v4  ;;  %v7879_v4 = vld [vmem:[%s11018_s16 + $0x78] sm:$0xff] }
 0x858   : > { %5798 = vmatpush.bf16.msrb.mxu3 %v7850_v63 }
 0x85b   : > { %7466 = vmatmul.msk.bf16.vlgmr.msra.gmra.mxu3 %vm5555_vm11, %v7847_v26  ;;  %v7866_v26 = vld [vmem:[%s11018_s16 + $0x10] sm:$0xff] }
 0x85c   : > { %5799 = vmatpush.bf16.msrb.mxu3 %v7849_v50  ;;  %6082 = vmatpush.bf16.msra.mxu0 %v7866_v26 }
 0x860   : > { %6083 = vmatpush.bf16.msra.mxu0 %v7865_v2  ;;  %6168 = vmatpush.bf16.msra.mxu3 %v7881_v37 }
 0x864   : > { %6169 = vmatpush.bf16.msra.mxu3 %v7880_v17 }
 0x868   : > { %6170 = vmatpush.bf16.msra.mxu3 %v7879_v4 }
 0x86b   : > { %7467 = vmatmul.msk.bf16.gmra.mxu3 %vm5555_vm11, %v7848_v61 }
 0x86c   : > { %6171 = vmatpush.bf16.msra.mxu3 %v7878_v5 }
 0x870   : > { %6172 = vmatpush.bf16.msra.mxu3 %v7877_v27 }
 0x87b   : > { %7468 = vmatmul.msk.bf16.gmra.mxu3 %vm5555_vm11, %v5609_v38  ;;  %v7864_v38 = vld [vmem:[%s11018_s16] sm:$0xff] }
 0x87c   : > { %6084 = vmatpush.bf16.msra.mxu0 %v7864_v38 }
 0x8ae   : > { %v5577_v6 = vpop.f32.mrf.mxu3 }
 0x8b6   : > { %v5579_v22 = vpop.f32.mrf.mxu3 }
 0x8be   : > { %v5582_v21 = vpop.f32.mrf.mxu3 }
 0x8c6   : > { %v5584_v43 = vpop.f32.mrf.mxu3 }
 0x8ce   : > { %v5587_v11 = vpop.f32.mrf.mxu3 }
 0x8d6   : > { %v5589_v52 = vpop.f32.mrf.mxu3 }
 0x8d7   : > { %v7871_v52 = vld [vmem:[%s11018_s16 + $0x38] sm:$0xff] }
 0x8de   : > { %v5628_v56 = vpop.f32.mrf.mxu3 }
 0x8df   : > { %v5642_v34 = vmax.f32 %v5577_v6, %v5628_v56  ;;  %v7875_v6 = vld [vmem:[%s11018_s16 + $0x58] sm:$0xff]  ;;  %v7876_v56 = vld [vmem:[%s11018_s16 + $0x60] sm:$0xff] }
 0x8e0   : > { %6014 = vmatpush.bf16.msrb.mxu2 %v7875_v6  ;;  %6173 = vmatpush.bf16.msra.mxu3 %v7876_v56 }
 0x8e6   : > { %v5630_v45 = vpop.f32.mrf.mxu3 }
 0x8e7   : > { %v5643_v41 = vmax.f32 %v5579_v22, %v5630_v45  ;;  %v7870_v45 = vld [vmem:[%s11018_s16 + $0x30] sm:$0xff] }
 0x8e9   : > { %v5657_v24 = vpack.c.bf16 %v5643_v41, %v5642_v34 }
 0x8eb   : > { %7522 = vmatmul.msk.bf16.vlgmr.msrb.gmra.mxu3 %vm2715_vm5, %v5657_v24  ;;  %v5674_v12 = vshll.u32 %v5657_v24, 16  ;;  %v5672_v31 = vshrl.u32 %v5657_v24, 16  ;;  %v5829_v3 = vrot.slane %v5657_v24, 1 }
 0x8ed   : > { %v5676_v46 = vrot.slane %v5674_v12, 1 }
 0x8ee   : > { %v5633_v42 = vpop.f32.mrf.mxu3 }
 0x8ef   : > { %v5644_v48 = vmax.f32 %v5582_v21, %v5633_v42  ;;  %v5677_v49 = vor.u32 %v5676_v46, %v5672_v31  ;;  %v7874_v21 = vld [vmem:[%s11018_s16 + $0x50] sm:$0xff]  ;;  %v7940_v42 = vld [vmem:[%s11017_s15] ss:$0 sm:$0xff] }
 0x8f0   : > { %6015 = vmatpush.bf16.msrb.mxu2 %v7874_v21 }
 0x8f6   : > { %v5635_v30 = vpop.f32.mrf.mxu3 }
 0x8f7   : > { %v5645_v32 = vmax.f32 %v5584_v43, %v5635_v30  ;;  %v7873_v43 = vld [vmem:[%s11018_s16 + $0x48] sm:$0xff] }
 0x8f8   : > { %6016 = vmatpush.bf16.msrb.mxu2 %v7873_v43 }
 0x8f9   : > { %v5658_v19 = vpack.c.bf16 %v5645_v32, %v5644_v48 }
 0x8fb   : > { %v5679_v60 = vshll.u32 %v5658_v19, 16  ;;  %7523 = vmatmul.msk.bf16.gmra.mxu3 %vm2715_vm5, %v5658_v19  ;;  %v5683_v33 = vshrl.u32 %v5658_v19, 16  ;;  %v5830_v57 = vrot.slane %v5658_v19, 1 }
 0x8fc   : > { %6017 = vmatpush.bf16.msrb.mxu2 %v7872_v16 }
 0x8fd   : > { %v5681_v39 = vrot.slane %v5679_v60, 1  ;;  %v5831_v20 = vsel %vm1071_vm2, %v5829_v3, %v5830_v57 }
 0x8fe   : > { %v5638_v51 = vpop.f32.mrf.mxu3 }
 0x8ff   : > { %v5646_v8 = vmax.f32 %v5587_v11, %v5638_v51  ;;  %v5682_v47 = vsel %vm658_vm3, %v5677_v49, %v5681_v39  ;;  %v5685_v62 = vor.u32 %v5683_v33, %v5681_v39 }
 0x900   : > { %7499 = vmatmul.msk.bf16.vlgmr.msrb.gmra.mxu0 %vm2715_vm5, %v5682_v47  ;;  %6018 = vmatpush.bf16.msrb.mxu2 %v7871_v52 }
 0x901   : > { %v5659_v25 = vpack.c.bf16 %v5646_v8, %v5646_v8 }
 0x903   : > { %v5687_v29 = vshll.u32 %v5659_v25, 16  ;;  %v5691_v10 = vshrl.u32 %v5659_v25, 16  ;;  %v5832_v14 = vrot.slane %v5659_v25, 1 }
 0x904   : > { %6019 = vmatpush.bf16.msrb.mxu2 %v7870_v45 }
 0x905   : > { %v5689_v55 = vrot.slane %v5687_v29, 1  ;;  %v5833_v18 = vsel %vm1071_vm2, %v5830_v57, %v5832_v14 }
 0x906   : > { %v5640_v58 = vpop.f32.mrf.mxu3 }
 0x907   : > { %v5693_v1 = vor.u32 %v5691_v10, %v5689_v55  ;;  %v5690_v44 = vsel %vm658_vm3, %v5685_v62, %v5689_v55 }
 0x909   : > { %7501 = vmatmul.msk.bf16.vlgmr.msra.gmra.mxu1 %vm2715_vm5, %v5693_v1 }
 0x90b   : > { %7524 = vmatmul.msk.bf16.gmra.mxu3 %vm2715_vm5, %v5659_v25 }
 0x910   : > { %7500 = vmatmul.msk.bf16.gmra.mxu0 %vm2715_vm5, %v5690_v44 }
 0x919   : > { %7555 = vmatmul.msk.bf16.vlgmr.msrb.gmra.mxu1 %vm2715_vm5, %v5831_v20 }
 0x929   : > { %7556 = vmatmul.msk.bf16.gmra.mxu1 %vm2715_vm5, %v5833_v18 }
 0x939   : > { %7557 = vmatmul.msk.bf16.gmra.mxu1 %vm2715_vm5, %v5832_v14 }
 0x96e   : > { %v5801_v23 = vpop.f32.mrf.mxu3 }
 0x976   : > { %v5803_v54 = vpop.f32.mrf.mxu3 }
 0x97d   : > { %v5742_v63 = vpop.f32.mrf.mxu0 }
 0x97e   : > { %v5806_v61 = vpop.f32.mrf.mxu3  ;;  %v5802_v34 = vadd.f32 %v5801_v23, %v5742_v63 }
 0x985   : > { %v5744_v36 = vpop.f32.mrf.mxu0 }
 0x986   : > { %v5752_v22 = vpop.f32.mrf.mxu1  ;;  %v5808_v15 = vpop.f32.mrf.mxu3  ;;  %v5804_v24 = vadd.f32 %v5803_v54, %v5744_v36 }
 0x98d   : > { %v5747_v59 = vpop.f32.mrf.mxu0 }
 0x98e   : > { %v5754_v50 = vpop.f32.mrf.mxu1  ;;  %v5811_v11 = vpop.f32.mrf.mxu3  ;;  %v5807_v19 = vadd.f32 %v5806_v61, %v5747_v59 }
 0x98f   : > { %v5812_v1 = vadd.f32 %v5811_v11, %v5752_v22 }
 0x995   : > { %v5749_v31 = vpop.f32.mrf.mxu0 }
 0x996   : > { %v5882_v53 = vpop.f32.mrf.mxu1  ;;  %v5813_v28 = vpop.f32.mrf.mxu3  ;;  %v5809_v49 = vadd.f32 %v5808_v15, %v5749_v31  ;;  %v6194_v31 = vld [vmem:[%s11019_s17] sm:$0xff] }
 0x997   : > { %v5896_v41 = vadd.f32 %v5882_v53, %v5802_v34 }
 0x999   : > { %v5901_v13 = vmax.f32 %v5896_v41, 0.0 }
 0x99b   : > { %v5910_v30 = vadd.f32 %v7940_v42, %v5901_v13 }
 0x99e   : > { %v5884_v9 = vpop.f32.mrf.mxu1 }
 0x99f   : > { %v5897_v0 = vadd.f32 %v5884_v9, %v5804_v24 }
 0x9a1   : > { %v5902_v12 = vmax.f32 %v5897_v0, 0.0 }
 0x9a3   : > { %v5911_v48 = vadd.f32 %v7940_v42, %v5902_v12 }
 0x9a5   : > { %v5927_v32 = vpack.c.bf16 %v5911_v48, %v5910_v30 }
 0x9a6   : > { %v5887_v46 = vpop.f32.mrf.mxu1 }
 0x9a7   : > { %7621 = vmatmul.msk.bf16.vlgmr.msra.gmra.mxu0 %vm6002_vm12, %v5927_v32  ;;  %v5898_v60 = vadd.f32 %v5887_v46, %v5807_v19  ;;  %v5946_v47 = vshll.u32 %v5927_v32, 16  ;;  %v5944_v33 = vshrl.u32 %v5927_v32, 16  ;;  %v6116_v3 = vrot.slane %v5927_v32, 1 }
 0x9a9   : > { %v5903_v51 = vmax.f32 %v5898_v60, 0.0  ;;  %v5948_v10 = vrot.slane %v5946_v47, 1  ;;  %v7941_v60 = vld [vmem:[%s11020_s18] ss:$0 sm:$0xff] }
 0x9ab   : > { %v5912_v29 = vadd.f32 %v7940_v42, %v5903_v51  ;;  %v5949_v14 = vor.u32 %v5948_v10, %v5944_v33 }
 0x9ae   : > { %v5889_v39 = vpop.f32.mrf.mxu1 }
 0x9af   : > { %v5899_v8 = vadd.f32 %v5889_v39, %v5809_v49 }
 0x9b1   : > { %v5904_v25 = vmax.f32 %v5899_v8, 0.0 }
 0x9b3   : > { %v5913_v55 = vadd.f32 %v7940_v42, %v5904_v25 }
 0x9b5   : > { %v5928_v58 = vpack.c.bf16 %v5913_v55, %v5912_v29 }
 0x9b6   : > { %v5892_v62 = vpop.f32.mrf.mxu1 }
 0x9b7   : > { %v5951_v44 = vshll.u32 %v5928_v58, 16  ;;  %v5900_v57 = vadd.f32 %v5892_v62, %v5812_v1  ;;  %v6117_v20 = vrot.slane %v5928_v58, 1  ;;  %7622 = vmatmul.msk.bf16.gmra.mxu0 %vm6002_vm12, %v5928_v58  ;;  %v5955_v37 = vshrl.u32 %v5928_v58, 16 }
 0x9b9   : > { %v5953_v18 = vrot.slane %v5951_v44, 1  ;;  %v5905_v23 = vmax.f32 %v5900_v57, 0.0  ;;  %v6118_v7 = vsel %vm1071_vm2, %v6116_v3, %v6117_v20 }
 0x9ba   : > { %7660 = vmatmul.msk.bf16.vlgmr.msra.gmra.mxu3 %vm6002_vm12, %v6118_v7 }
 0x9bb   : > { %v5954_v40 = vsel %vm658_vm3, %v5949_v14, %v5953_v18  ;;  %v5914_v54 = vadd.f32 %v7940_v42, %v5905_v23  ;;  %v5957_v6 = vor.u32 %v5955_v37, %v5953_v18 }
 0x9bc   : > { %7594 = vmatmul.msk.bf16.vlgmr.msrb.gmra.mxu2 %vm6002_vm12, %v5954_v40 }
 0x9bd   : > { %v5929_v26 = vpack.c.bf16 %v5914_v54, %v5914_v54 }
 0x9be   : > { %v5894_v35 = vpop.f32.mrf.mxu1 }
 0x9bf   : > { %v5959_v61 = vshll.u32 %v5929_v26, 16  ;;  %v6119_v2 = vrot.slane %v5929_v26, 1  ;;  %v5963_v15 = vshrl.u32 %v5929_v26, 16 }
 0x9c1   : > { %v5961_v38 = vrot.slane %v5959_v61, 1  ;;  %v6120_v22 = vsel %vm1071_vm2, %v6117_v20, %v6119_v2 }
 0x9c3   : > { %v5962_v17 = vsel %vm658_vm3, %v5957_v6, %v5961_v38  ;;  %v5965_v21 = vor.u32 %v5963_v15, %v5961_v38 }
 0x9c7   : > { %7623 = vmatmul.msk.bf16.gmra.mxu0 %vm6002_vm12, %v5929_v26 }
 0x9ca   : > { %7661 = vmatmul.msk.bf16.gmra.mxu3 %vm6002_vm12, %v6120_v22 }
 0x9cc   : > { %7595 = vmatmul.msk.bf16.gmra.mxu2 %vm6002_vm12, %v5962_v17 }
 0x9da   : > { %7662 = vmatmul.msk.bf16.gmra.mxu3 %vm6002_vm12, %v6119_v2 }
 0x9dc   : > { %7596 = vmatmul.msk.bf16.gmra.mxu2 %vm6002_vm12, %v5965_v21 }
 0xa24   : > { %v6086_v4 = vpop.f32.mrf.mxu0 }
 0xa2c   : > { %v6088_v63 = vpop.f32.mrf.mxu0 }
 0xa34   : > { %v6091_v43 = vpop.f32.mrf.mxu0 }
 0xa3c   : > { %v6093_v50 = vpop.f32.mrf.mxu0 }
 0xa3d   : > { %v6175_v5 = vpop.f32.mrf.mxu3 }
 0xa3f   : > { %v6021_v11 = vpop.f32.mrf.mxu2 }
 0xa40   : > { %v6087_v30 = vadd.f32 %v6086_v4, %v6021_v11 }
 0xa42   : > { %v6189_v19 = vadd.f32 %v6175_v5, %v6087_v30 }
 0xa44   : > { %v6096_v16 = vpop.f32.mrf.mxu0 }
 0xa45   : > { %v6177_v27 = vpop.f32.mrf.mxu3 }
 0xa47   : > { %v6023_v52 = vpop.f32.mrf.mxu2 }
 0xa48   : > { %v6089_v0 = vadd.f32 %v6088_v63, %v6023_v52 }
 0xa4a   : > { %v6190_v46 = vadd.f32 %v6177_v27, %v6089_v0 }
 0xa4c   : > { %v6098_v36 = vpop.f32.mrf.mxu0 }
 0xa4d   : > { %v6180_v53 = vpop.f32.mrf.mxu3 }
 0xa4f   : > { %v6026_v56 = vpop.f32.mrf.mxu2 }
 0xa50   : > { %v6092_v13 = vadd.f32 %v6091_v43, %v6026_v56 }
 0xa52   : > { %v6191_v48 = vadd.f32 %v6180_v53, %v6092_v13 }
 0xa55   : > { %v6182_v28 = vpop.f32.mrf.mxu3 }
 0xa57   : > { %v6028_v45 = vpop.f32.mrf.mxu2 }
 0xa58   : > { %v6094_v24 = vadd.f32 %v6093_v50, %v6028_v45 }
 0xa5a   : > { %v6192_v59 = vadd.f32 %v6182_v28, %v6094_v24 }
 0xa5d   : > { %v6185_v34 = vpop.f32.mrf.mxu3 }
 0xa5f   : > { %v6031_v41 = vpop.f32.mrf.mxu2 }
 0xa60   : > { %v6097_v9 = vadd.f32 %v6096_v16, %v6031_v41 }
 0xa62   : > { %v6193_v42 = vadd.f32 %v6185_v34, %v6097_v9 }
 0xa64   : > { %7663 = vmatpush.msk.msrb.mxu0 %vm3850_vm7, %v6193_v42 }
 0xa65   : > { %v6187_v12 = vpop.f32.mrf.mxu3 }
 0xa66   : > { %6218 = vmatpush.msrb.mxu0 %v6192_v59 }
 0xa67   : > { %v6033_v32 = vpop.f32.mrf.mxu2 }
 0xa68   : > { %6219 = vmatpush.msrb.mxu0 %v6191_v48 }
 0xa6a   : > { %6220 = vmatpush.msrb.mxu0 %v6190_v46 }
 0xa6c   : > { %6221 = vmatpush.msrb.mxu0 %v6189_v19 }
 0xa6d   : > { %7664 = vmatmul.msk.f32.vlgmr.msrb.gmra.mxu0 %vm6199_vm13, %v6194_v31 }
 0xaea   : > { %v6223_v49 = vpop.f32.mrf.mxu0 }
 0xaeb   : > { %v6224_v39 = vadd.f32 %v7941_v60, %v6223_v49 }
 0xaed   : > { %v6227_v51 = vsel %vm6226_vm14, %v6224_v39, -inf }
 0xaee   : > { %6228 = vmax.xlane.f32.xlu1 %v6227_v51 }
 0xb61   : > { %v6229_v8 = vpop.xlane.xlu1 %6228 }
 0xb62   : > { %v6230_v47 = vsub.f32 %v6224_v39, %v6229_v8 }
 0xb64   : > { %v6231_v25 = vmul.f32 1.442695, %v6230_v47 }
 0xb66   : > { %7942 = vpow2.f32 %v6231_v25 }
 0xb6c   : > { %v7943_v29 = vpop.eup %7942 }
 0xb6d   : > { %v6233_v55 = vsel %vm6226_vm14, %v7943_v29, 0.0 }
 0xb6e   : > { %6234 = vadd.xlane.f32.xlu2 %v6233_v55 }
 0xbe1   : > { %v6235_v10 = vpop.xlane.xlu2 %6234 }
 0xbe2   : > { %7944 = vlog2.f32 %v6235_v10 }
 0xbe8   : > { %v7945_v58 = vpop.eup %7944 }
 0xbe9   : > { %v6237_v1 = vmul.f32 0.6931472, %v7945_v58 }
 0xbeb   : > { %v6238_v33 = vsub.f32 %v6230_v47, %v6237_v1 }
 0xbed   : > { %6239 = vst.msk [vmem:[%s596_s29] sm:$0xff] %vm6226_vm14, %v6238_v33 }
 0xbee   : > { %7973 = shalt.err (!%p7970_p3)
}
 0xbef   : > { %7895 = dma.vmem_to_hbm [thread:$0]  (%p8149_p5), %s6254_s23, 128, %s6256_s0, %s6241_s20  }
 0xbf0 PF: > { %s11122_s21 = sld [smem:[#allocation7_spill]] }
 0xbf1   : > { %s11123_s28 = sld [smem:[#allocation5_spill]] }
 0xbf6   : > { %p7901_p4 = scmp.ge.s32.totalorder %s11122_s21, 2 }
 0xbf7   : > { %s6267_s4 = sand.u32 1, %s11123_s28  }
 0xbf8   : > { %p7898_p7 = pnand %p7901_p4, %p8153_p6  ;;  %s6268_s1 = scalar_lea.sflag [#allocation3], %s6267_s4 }
 0xbfa   : > { %p7899_p8 = pneg %p7898_p7 }
 0xbfc   : > { %7991 = dma.done.wait (%p7899_p8), %s6268_s1, 128  }
 0xbfd   : > { %7993 = vsyncadd (%p7899_p8), %s6268_s1, 4294967168  ;;  %s11125_s21 = sld [smem:[#allocation8_spill]]  ;;  %s11128_s0 = smov %s8000_s30 }
 0xbfe   : > { %s11126_s2 = sld [smem:[#allocation6_spill]] }
 0xbff   : > { %s11127_s20 = sld [smem:[#allocation9_spill]] }
 0xc03   : > { %p29_p9 = scmp.ge.s32.totalorder %s11125_s21, 4  }
 0xc04   : > { %s11129_s30 = smov %s11126_s2 }
 0xc05   :  { %31 = sbr.rel (!%p29_p9) target bundleno = 9 (0x9), region = 147 }
 0xc0a   :  { %6274 = vsyncpa [#allocation3], 1 }
 0xc0b   :  { %6276 = vsyncpa [#allocation3 + $0x1], 1 }

</bundles_post_ra>
